<compile_context>
chip_gen: v7x
topology: tpu7x:2x2x1
jax: 0.10.0
libtpu: 0.0.40
codegen_flags: <defaults>
</compile_context>

<pallas_src>
import jax
import jax.numpy as jnp
from jax.experimental import pallas as pl
from jax.experimental.pallas import tpu as pltpu


def _adjoint_kernel(kr_ref, ki_ref, m_ref, fh_ref, fwr_ref, fwi_ref,
                    or_ref, oi_ref, y_ref):
    # Blocks: kr/ki (1, CT, Hp, W); mask (1, {1|CT}, Hp, W); fh (2H, Hp) =
    # [Fh_r; Fh_i]; fwr/fwi (W, W); outputs (1, CT, H, W);
    # scratch y_ref (2*CT*Hp, W).
    _, CT, Hp, W = kr_ref.shape
    H = or_ref.shape[2]
    CTH = CT * Hp
    prec = jax.lax.Precision.HIGHEST

    # Masked real / imag planes written straight into the scratch (no concat
    # temporary). Mask broadcasts over the coil axis when it is (1, Hp, W).
    m = m_ref[0]
    y_ref[:CTH, :] = (kr_ref[0] * m).reshape(CTH, W)
    y_ref[CTH:, :] = (ki_ref[0] * m).reshape(CTH, W)

    # ---- W-stage: Y = X @ F_W.  Two lane-aligned dots (real/imag DFT factors
    # kept separate -> no column concat/slice at offset W). ------------------
    a = y_ref[...]                                                 # (2CTH, W)
    pr = jnp.dot(a, fwr_ref[...], preferred_element_type=jnp.float32,
                 precision=prec)                                   # [xr@Fwr; xi@Fwr]
    pi = jnp.dot(a, fwi_ref[...], preferred_element_type=jnp.float32,
                 precision=prec)                                   # [xr@Fwi; xi@Fwi]
    # Reuse scratch for Y: rows [0, CTH) = Re(Y), rows [CTH, 2CTH) = Im(Y).
    y_ref[:CTH, :] = pr[:CTH] - pi[CTH:]
    y_ref[CTH:, :] = pi[:CTH] + pr[CTH:]

    # ---- H-stage: Z = F_H @ Y, one coil per fori_loop iteration ------------
    fh = fh_ref[...]                                               # (2H, Hp)

    def h_stage(c, carry):
        r0 = pl.multiple_of(c * Hp, Hp)
        r1 = pl.multiple_of(CTH + c * Hp, Hp)
        yr_c = y_ref[pl.ds(r0, Hp), :]                             # (Hp, W)
        yi_c = y_ref[pl.ds(r1, Hp), :]                             # (Hp, W)
        qr = jnp.dot(fh, yr_c, preferred_element_type=jnp.float32,
                     precision=prec)                               # (2H, W)
        qi = jnp.dot(fh, yi_c, preferred_element_type=jnp.float32,
                     precision=prec)                               # (2H, W)
        or_ref[0, c] = qr[:H] - qi[H:]                             # Re(F_H @ Y)
        oi_ref[0, c] = qi[:H] + qr[H:]                             # Im(F_H @ Y)
        return carry

    jax.lax.fori_loop(0, CT, h_stage, 0)


def _idft_factors(n):
    """Ortho inverse-DFT matrix for length n as (real, imag) f32.

    Phase uses exact integer reduction ((u*h) mod n) so large n keeps full f32
    accuracy in the cos/sin argument.
    """
    idx = jnp.arange(n, dtype=jnp.int32)
    prod = (idx[:, None] * idx[None, :]) % n                       # exact, int32
    ang = prod.astype(jnp.float32) * jnp.float32(2.0 * jnp.pi / n)
    scale = jnp.float32(1.0 / (float(n) ** 0.5))
    return jnp.cos(ang) * scale, jnp.sin(ang) * scale


def _vmem_capacity_bytes():
    try:
        return int(pltpu.get_tpu_info().vmem_capacity_bytes)
    except Exception:
        return 64 << 20        # conservative (v7x-sized) fallback


def adjoint_op(kspace, mask):
    """AdjointOp.forward: complex_scale -> ifft2(norm='ortho') -> unsqueeze(-1).

    kspace: complex64 (B, C, H, W) or (real, imag) pair of f32 arrays.
    mask:   real array broadcastable to (B, C, H, W) (typically (B, 1, H, W)).
    Returns complex64 of shape (B, C, H, W, 1).
    """
    if isinstance(kspace, (tuple, list)) and len(kspace) == 2:
        kr = jnp.asarray(kspace[0], jnp.float32)
        ki = jnp.asarray(kspace[1], jnp.float32)
    else:
        kr = jnp.real(kspace).astype(jnp.float32)
        ki = jnp.imag(kspace).astype(jnp.float32)
    B, C, H, W = kr.shape

    # Keep the mask un-broadcast over channels unless it truly varies per coil.
    mask = jnp.asarray(mask).astype(jnp.float32)
    if mask.ndim < 4:
        mask = mask.reshape((1,) * (4 - mask.ndim) + mask.shape)
    per_channel_mask = (C > 1 and mask.shape[1] == C)
    Cm = C if per_channel_mask else 1
    mask = jnp.broadcast_to(mask, (B, Cm, H, W))

    # Sublane-align H (exact: padded data rows are zero, F_H gets zero cols).
    Hp = -(-H // 8) * 8
    if Hp != H:
        ph = ((0, 0), (0, 0), (0, Hp - H), (0, 0))
        kr, ki, mask = jnp.pad(kr, ph), jnp.pad(ki, ph), jnp.pad(mask, ph)

    fhr, fhi = _idft_factors(H)
    fh_cat = jnp.concatenate([fhr, fhi], axis=0)                   # (2H, H)
    if Hp != H:
        fh_cat = jnp.pad(fh_cat, ((0, 0), (0, Hp - H)))            # (2H, Hp)
    fwr, fwi = _idft_factors(W)                                    # (W, W) each

    vmem_cap = _vmem_capacity_bytes()

    def per_step_bytes(ct, single_buffer_consts):
        f32 = 4
        cm_t = ct if per_channel_mask else 1
        io = (2 * ct + cm_t) * Hp * W * f32 * 2        # kr, ki, mask (x2 bufs)
        io += 2 * ct * H * W * f32 * 2                 # out_r, out_i (x2 bufs)
        scratch = 2 * ct * Hp * W * f32                # y_ref
        temps = 4 * ct * Hp * W * f32 + 4 * H * W * f32   # pr/pi, qr/qi
        consts = (2 * H * Hp + 2 * W * W) * f32
        consts *= 1 if single_buffer_consts else 2
        return io + scratch + temps + consts

    # Pick the coil-tile size: MXU fill target 2*CT*Hp >= ~1024, but keep the
    # per-step footprint well under the physical VMEM of this generation.
    ct_budget = max(vmem_cap - (16 << 20), 24 << 20)
    ct = max(1, min(C, -(-512 // Hp)))
    while ct > 1 and per_step_bytes(ct, True) > ct_budget:
        ct -= 1
    while ct < C and per_step_bytes(ct + 1, True) <= ct_budget // 2:
        ct += 1                                        # amortize per-step overhead

    grid = (B, pl.cdiv(C, ct))

    flops = 8 * B * C * Hp * W * (W + H)               # two complex DFT stages
    bytes_accessed = 4 * ((2 * B * C + B * Cm) * Hp * W
                          + 2 * B * C * H * W
                          + 2 * H * Hp + 2 * W * W)

    def run(single_buffer_consts):
        def const_spec(shape):
            if single_buffer_consts:
                # Constant index_map -> double-buffering buys nothing.
                return pl.BlockSpec(shape, lambda b, ci: (0, 0),
                                    pipeline_mode=pl.Buffered(1))
            return pl.BlockSpec(shape, lambda b, ci: (0, 0))

        img_in_spec = pl.BlockSpec((1, ct, Hp, W), lambda b, ci: (b, ci, 0, 0))
        if per_channel_mask:
            mask_spec = pl.BlockSpec((1, ct, Hp, W), lambda b, ci: (b, ci, 0, 0))
        else:
            mask_spec = pl.BlockSpec((1, 1, Hp, W), lambda b, ci: (b, 0, 0, 0))
        out_spec = pl.BlockSpec((1, ct, H, W), lambda b, ci: (b, ci, 0, 0))

        vmem_limit = int(min(
            max(int(1.5 * per_step_bytes(ct, single_buffer_consts)), 32 << 20),
            max(vmem_cap - (8 << 20), 32 << 20)))

        return pl.pallas_call(
            _adjoint_kernel,
            out_shape=(jax.ShapeDtypeStruct((B, C, H, W), jnp.float32),
                       jax.ShapeDtypeStruct((B, C, H, W), jnp.float32)),
            grid_spec=pltpu.PrefetchScalarGridSpec(
                num_scalar_prefetch=0,
                grid=grid,
                in_specs=[img_in_spec, img_in_spec, mask_spec,
                          const_spec((2 * H, Hp)),
                          const_spec((W, W)),
                          const_spec((W, W))],
                out_specs=[out_spec, out_spec],
                scratch_shapes=[pltpu.VMEM((2 * ct * Hp, W), jnp.float32)]),
            compiler_params=pltpu.CompilerParams(
                dimension_semantics=("parallel", "parallel"),
                vmem_limit_bytes=vmem_limit),
            cost_estimate=pl.CostEstimate(
                flops=int(flops), transcendentals=0,
                bytes_accessed=int(bytes_accessed)),
        )(kr, ki, mask, fh_cat, fwr, fwi)

    try:
        out_r, out_i = run(single_buffer_consts=True)
    except Exception:
        # Fallback for JAX versions without BlockSpec pipeline_mode support.
        out_r, out_i = run(single_buffer_consts=False)

    # Complex recombination + trailing unsqueeze(-1) (module returns complex).
    # TODO(synk): let consumers take (out_r, out_i) planes directly to skip
    # this extra mem-bound pass when possible.
    return jax.lax.complex(out_r, out_i)[..., None]


if __name__ == "__main__":
    key = jax.random.PRNGKey(0)
    B, C, H, W = 2, 4, 16, 16
    k1, k2, k3 = jax.random.split(key, 3)
    kspace_r = jax.random.normal(k1, (B, C, H, W), dtype=jnp.float32)
    kspace_i = jax.random.normal(k2, (B, C, H, W), dtype=jnp.float32)
    kspace = jax.lax.complex(kspace_r, kspace_i)
    # Typical undersampling mask, broadcast over coils: (B, 1, H, W) of {0, 1}.
    mask = (jax.random.uniform(k3, (B, 1, H, W)) > 0.5).astype(jnp.float32)

    out = adjoint_op(kspace, mask)
    out = jax.block_until_ready(out)

    # Reference: same semantics as torch.fft.ifft2(kspace * mask, norm='ortho').
    ref = jnp.fft.ifft2(kspace * mask, norm="ortho")[..., None]
    assert out.shape == (B, C, H, W, 1)
    err = float(jnp.max(jnp.abs(out - ref)))
    assert err < 1e-4, err
    print("KERNEL_OK")
</pallas_src>

<mosaic_0001>
module attributes {stable_mosaic.version = 11 : i64} {
  func.func @_adjoint_kernel(%arg0: i32, %arg1: i32, %arg2: memref<1x4x16x16xf32, #tpu.memory_space<vmem>>, %arg3: memref<1x4x16x16xf32, #tpu.memory_space<vmem>>, %arg4: memref<1x1x16x16xf32, #tpu.memory_space<vmem>>, %arg5: memref<32x16xf32, #tpu.memory_space<vmem>>, %arg6: memref<16x16xf32, #tpu.memory_space<vmem>>, %arg7: memref<16x16xf32, #tpu.memory_space<vmem>>, %arg8: memref<1x4x16x16xf32, #tpu.memory_space<vmem>>, %arg9: memref<1x4x16x16xf32, #tpu.memory_space<vmem>>, %arg10: memref<128x16xf32, #tpu.memory_space<vmem>>) attributes {dimension_semantics = [#tpu.dimension_semantics<parallel>, #tpu.dimension_semantics<parallel>], iteration_bounds = array<i64: 2, 1>, scalar_prefetch = 0 : i64, scratch_operands = 1 : i64, tpu.core_type = #tpu.core_type<tc>, window_params = [{transform_indices = @transform_0, window_bounds = array<i64: 1, 4, 16, 16>}, {transform_indices = @transform_1, window_bounds = array<i64: 1, 4, 16, 16>}, {transform_indices = @transform_2, window_bounds = array<i64: 1, 1, 16, 16>}, {pipeline_mode = #tpu.pipeline_mode<synchronous>, transform_indices = @transform_3, window_bounds = array<i64: 32, 16>}, {pipeline_mode = #tpu.pipeline_mode<synchronous>, transform_indices = @transform_4, window_bounds = array<i64: 16, 16>}, {pipeline_mode = #tpu.pipeline_mode<synchronous>, transform_indices = @transform_5, window_bounds = array<i64: 16, 16>}, {transform_indices = @transform_6, window_bounds = array<i64: 1, 4, 16, 16>}, {transform_indices = @transform_7, window_bounds = array<i64: 1, 4, 16, 16>}]} {
    %c0 = arith.constant 0 : index
    %c0_0 = arith.constant 0 : index
    %c0_1 = arith.constant 0 : index
    %c0_2 = arith.constant 0 : index
    %0 = vector.load %arg4[%c0, %c0_0, %c0_1, %c0_2] : memref<1x1x16x16xf32, #tpu.memory_space<vmem>>, vector<1x1x16x16xf32>
    %1 = vector.shape_cast %0 : vector<1x1x16x16xf32> to vector<1x16x16xf32>
    %c0_3 = arith.constant 0 : index
    %c0_4 = arith.constant 0 : index
    %c0_5 = arith.constant 0 : index
    %c0_6 = arith.constant 0 : index
    %2 = vector.load %arg2[%c0_3, %c0_4, %c0_5, %c0_6] : memref<1x4x16x16xf32, #tpu.memory_space<vmem>>, vector<1x4x16x16xf32>
    %3 = vector.shape_cast %2 : vector<1x4x16x16xf32> to vector<4x16x16xf32>
    %4 = vector.broadcast %1 : vector<1x16x16xf32> to vector<4x16x16xf32>
    %5 = arith.mulf %3, %4 : vector<4x16x16xf32>
    %6 = vector.shape_cast %5 : vector<4x16x16xf32> to vector<64x16xf32>
    %c0_7 = arith.constant 0 : index
    %c0_8 = arith.constant 0 : index
    %7 = vector.load %arg10[%c0_7, %c0_8] : memref<128x16xf32, #tpu.memory_space<vmem>>, vector<64x16xf32>
    tpu.vector_store %arg10[%c0_7, %c0_8], %6 {strides = array<i32>} : memref<128x16xf32, #tpu.memory_space<vmem>>, vector<64x16xf32>,
    %c0_9 = arith.constant 0 : index
    %c0_10 = arith.constant 0 : index
    %c0_11 = arith.constant 0 : index
    %c0_12 = arith.constant 0 : index
    %8 = vector.load %arg3[%c0_9, %c0_10, %c0_11, %c0_12] : memref<1x4x16x16xf32, #tpu.memory_space<vmem>>, vector<1x4x16x16xf32>
    %9 = vector.shape_cast %8 : vector<1x4x16x16xf32> to vector<4x16x16xf32>
    %10 = vector.broadcast %1 : vector<1x16x16xf32> to vector<4x16x16xf32>
    %11 = arith.mulf %9, %10 : vector<4x16x16xf32>
    %12 = vector.shape_cast %11 : vector<4x16x16xf32> to vector<64x16xf32>
    %c64 = arith.constant 64 : index
    %c0_13 = arith.constant 0 : index
    %13 = vector.load %arg10[%c64, %c0_13] : memref<128x16xf32, #tpu.memory_space<vmem>>, vector<64x16xf32>
    tpu.vector_store %arg10[%c64, %c0_13], %12 {strides = array<i32>} : memref<128x16xf32, #tpu.memory_space<vmem>>, vector<64x16xf32>,
    %c0_14 = arith.constant 0 : index
    %c0_15 = arith.constant 0 : index
    %14 = vector.load %arg10[%c0_14, %c0_15] : memref<128x16xf32, #tpu.memory_space<vmem>>, vector<128x16xf32>
    %c0_16 = arith.constant 0 : index
    %c0_17 = arith.constant 0 : index
    %15 = vector.load %arg6[%c0_16, %c0_17] : memref<16x16xf32, #tpu.memory_space<vmem>>, vector<16x16xf32>
    %cst = arith.constant dense<0.000000e+00> : vector<128x16xf32>
    %16 = tpu.matmul %14, %15, %cst {dimension_numbers = #tpu.dot_dimension_numbers<[1], [0], [0], [1], [0, 0, 1, 1], [], []>, precision = #tpu.contract_precision<fp32>} : vector<128x16xf32>, vector<16x16xf32>, vector<128x16xf32> -> vector<128x16xf32>
    %c0_18 = arith.constant 0 : index
    %c0_19 = arith.constant 0 : index
    %17 = vector.load %arg7[%c0_18, %c0_19] : memref<16x16xf32, #tpu.memory_space<vmem>>, vector<16x16xf32>
    %cst_20 = arith.constant dense<0.000000e+00> : vector<128x16xf32>
    %18 = tpu.matmul %14, %17, %cst_20 {dimension_numbers = #tpu.dot_dimension_numbers<[1], [0], [0], [1], [0, 0, 1, 1], [], []>, precision = #tpu.contract_precision<fp32>} : vector<128x16xf32>, vector<16x16xf32>, vector<128x16xf32> -> vector<128x16xf32>
    %19 = vector.extract_strided_slice %16 {offsets = [0, 0], sizes = [64, 16], strides = [1, 1]} : vector<128x16xf32> to vector<64x16xf32>
    %20 = vector.extract_strided_slice %18 {offsets = [64, 0], sizes = [64, 16], strides = [1, 1]} : vector<128x16xf32> to vector<64x16xf32>
    %21 = arith.subf %19, %20 : vector<64x16xf32>
    %c0_21 = arith.constant 0 : index
    %c0_22 = arith.constant 0 : index
    %22 = vector.load %arg10[%c0_21, %c0_22] : memref<128x16xf32, #tpu.memory_space<vmem>>, vector<64x16xf32>
    tpu.vector_store %arg10[%c0_21, %c0_22], %21 {strides = array<i32>} : memref<128x16xf32, #tpu.memory_space<vmem>>, vector<64x16xf32>,
    %23 = vector.extract_strided_slice %18 {offsets = [0, 0], sizes = [64, 16], strides = [1, 1]} : vector<128x16xf32> to vector<64x16xf32>
    %24 = vector.extract_strided_slice %16 {offsets = [64, 0], sizes = [64, 16], strides = [1, 1]} : vector<128x16xf32> to vector<64x16xf32>
    %25 = arith.addf %23, %24 : vector<64x16xf32>
    %c64_23 = arith.constant 64 : index
    %c0_24 = arith.constant 0 : index
    %26 = vector.load %arg10[%c64_23, %c0_24] : memref<128x16xf32, #tpu.memory_space<vmem>>, vector<64x16xf32>
    tpu.vector_store %arg10[%c64_23, %c0_24], %25 {strides = array<i32>} : memref<128x16xf32, #tpu.memory_space<vmem>>, vector<64x16xf32>,
    %c0_25 = arith.constant 0 : index
    %c0_26 = arith.constant 0 : index
    %27 = vector.load %arg5[%c0_25, %c0_26] : memref<32x16xf32, #tpu.memory_space<vmem>>, vector<32x16xf32>
    %c0_i32 = arith.constant 0 : i32
    %c4_i32 = arith.constant 4 : i32
    %28 = arith.addi %c0_i32, %c4_i32 : i32
    %c1_i32 = arith.constant 1 : i32
    scf.for %arg11 = %c0_i32 to %28 step %c1_i32  : i32 {
      %c16_i32 = arith.constant 16 : i32
      %29 = arith.muli %arg11, %c16_i32 : i32
      %30 = tpu.assume_multiple %29, 16 : i32
      %c16_i32_28 = arith.constant 16 : i32
      %31 = arith.muli %arg11, %c16_i32_28 : i32
      %c64_i32 = arith.constant 64 : i32
      %32 = arith.addi %c64_i32, %31 : i32
      %33 = tpu.assume_multiple %32, 16 : i32
      %34 = arith.index_cast %30 : i32 to index
      %c0_29 = arith.constant 0 : index
      %35 = vector.load %arg10[%34, %c0_29] : memref<128x16xf32, #tpu.memory_space<vmem>>, vector<16x16xf32>
      %36 = arith.index_cast %33 : i32 to index
      %c0_30 = arith.constant 0 : index
      %37 = vector.load %arg10[%36, %c0_30] : memref<128x16xf32, #tpu.memory_space<vmem>>, vector<16x16xf32>
      %cst_31 = arith.constant dense<0.000000e+00> : vector<32x16xf32>
      %38 = tpu.matmul %27, %35, %cst_31 {dimension_numbers = #tpu.dot_dimension_numbers<[1], [0], [0], [1], [0, 0, 1, 1], [], []>, precision = #tpu.contract_precision<fp32>} : vector<32x16xf32>, vector<16x16xf32>, vector<32x16xf32> -> vector<32x16xf32>
      %cst_32 = arith.constant dense<0.000000e+00> : vector<32x16xf32>
      %39 = tpu.matmul %27, %37, %cst_32 {dimension_numbers = #tpu.dot_dimension_numbers<[1], [0], [0], [1], [0, 0, 1, 1], [], []>, precision = #tpu.contract_precision<fp32>} : vector<32x16xf32>, vector<16x16xf32>, vector<32x16xf32> -> vector<32x16xf32>
      %40 = vector.extract_strided_slice %38 {offsets = [0, 0], sizes = [16, 16], strides = [1, 1]} : vector<32x16xf32> to vector<16x16xf32>
      %41 = vector.extract_strided_slice %39 {offsets = [16, 0], sizes = [16, 16], strides = [1, 1]} : vector<32x16xf32> to vector<16x16xf32>
      %42 = arith.subf %40, %41 : vector<16x16xf32>
      %c0_33 = arith.constant 0 : index
      %43 = arith.index_cast %arg11 : i32 to index
      %c0_34 = arith.constant 0 : index
      %c0_35 = arith.constant 0 : index
      %44 = vector.load %arg8[%c0_33, %43, %c0_34, %c0_35] : memref<1x4x16x16xf32, #tpu.memory_space<vmem>>, vector<1x1x16x16xf32>
      %45 = vector.shape_cast %44 : vector<1x1x16x16xf32> to vector<16x16xf32>
      %46 = vector.shape_cast %42 : vector<16x16xf32> to vector<1x1x16x16xf32>
      tpu.vector_store %arg8[%c0_33, %43, %c0_34, %c0_35], %46 {strides = array<i32>} : memref<1x4x16x16xf32, #tpu.memory_space<vmem>>, vector<1x1x16x16xf32>,
      %47 = vector.extract_strided_slice %39 {offsets = [0, 0], sizes = [16, 16], strides = [1, 1]} : vector<32x16xf32> to vector<16x16xf32>
      %48 = vector.extract_strided_slice %38 {offsets = [16, 0], sizes = [16, 16], strides = [1, 1]} : vector<32x16xf32> to vector<16x16xf32>
      %49 = arith.addf %47, %48 : vector<16x16xf32>
      %c0_36 = arith.constant 0 : index
      %50 = arith.index_cast %arg11 : i32 to index
      %c0_37 = arith.constant 0 : index
      %c0_38 = arith.constant 0 : index
      %51 = vector.load %arg9[%c0_36, %50, %c0_37, %c0_38] : memref<1x4x16x16xf32, #tpu.memory_space<vmem>>, vector<1x1x16x16xf32>
      %52 = vector.shape_cast %51 : vector<1x1x16x16xf32> to vector<16x16xf32>
      %53 = vector.shape_cast %49 : vector<16x16xf32> to vector<1x1x16x16xf32>
      tpu.vector_store %arg9[%c0_36, %50, %c0_37, %c0_38], %53 {strides = array<i32>} : memref<1x4x16x16xf32, #tpu.memory_space<vmem>>, vector<1x1x16x16xf32>,
    }
    %c4_i32_27 = arith.constant 4 : i32
    return
  }
  func.func @transform_0(%arg0: i32, %arg1: i32) -> (i32, i32, i32, i32) {
    %c0_i32 = arith.constant 0 : i32
    %c0_i32_0 = arith.constant 0 : i32
    %c0_i32_1 = arith.constant 0 : i32
    return %arg0, %arg1, %c0_i32, %c0_i32_0 : i32, i32, i32, i32
  }
  func.func @transform_1(%arg0: i32, %arg1: i32) -> (i32, i32, i32, i32) {
    %c0_i32 = arith.constant 0 : i32
    %c0_i32_0 = arith.constant 0 : i32
    %c0_i32_1 = arith.constant 0 : i32
    return %arg0, %arg1, %c0_i32, %c0_i32_0 : i32, i32, i32, i32
  }
  func.func @transform_2(%arg0: i32, %arg1: i32) -> (i32, i32, i32, i32) {
    %c0_i32 = arith.constant 0 : i32
    %c0_i32_0 = arith.constant 0 : i32
    %c0_i32_1 = arith.constant 0 : i32
    %c0_i32_2 = arith.constant 0 : i32
    return %arg0, %c0_i32, %c0_i32_0, %c0_i32_1 : i32, i32, i32, i32
  }
  func.func @transform_3(%arg0: i32, %arg1: i32) -> (i32, i32) {
    %c0_i32 = arith.constant 0 : i32
    %c0_i32_0 = arith.constant 0 : i32
    %c0_i32_1 = arith.constant 0 : i32
    return %c0_i32, %c0_i32_0 : i32, i32
  }
  func.func @transform_4(%arg0: i32, %arg1: i32) -> (i32, i32) {
    %c0_i32 = arith.constant 0 : i32
    %c0_i32_0 = arith.constant 0 : i32
    %c0_i32_1 = arith.constant 0 : i32
    return %c0_i32, %c0_i32_0 : i32, i32
  }
  func.func @transform_5(%arg0: i32, %arg1: i32) -> (i32, i32) {
    %c0_i32 = arith.constant 0 : i32
    %c0_i32_0 = arith.constant 0 : i32
    %c0_i32_1 = arith.constant 0 : i32
    return %c0_i32, %c0_i32_0 : i32, i32
  }
  func.func @transform_6(%arg0: i32, %arg1: i32) -> (i32, i32, i32, i32) {
    %c0_i32 = arith.constant 0 : i32
    %c0_i32_0 = arith.constant 0 : i32
    %c0_i32_1 = arith.constant 0 : i32
    return %arg0, %arg1, %c0_i32, %c0_i32_0 : i32, i32, i32, i32
  }
  func.func @transform_7(%arg0: i32, %arg1: i32) -> (i32, i32, i32, i32) {
    %c0_i32 = arith.constant 0 : i32
    %c0_i32_0 = arith.constant 0 : i32
    %c0_i32_1 = arith.constant 0 : i32
    return %arg0, %arg1, %c0_i32, %c0_i32_0 : i32, i32, i32, i32
  }
}

module attributes {stable_mosaic.version = 11 : i64} {
  func.func @_adjoint_kernel(%arg0: i32, %arg1: i32, %arg2: memref<1x4x16x16xf32, #tpu.memory_space<vmem>>, %arg3: memref<1x4x16x16xf32, #tpu.memory_space<vmem>>, %arg4: memref<1x1x16x16xf32, #tpu.memory_space<vmem>>, %arg5: memref<32x16xf32, #tpu.memory_space<vmem>>, %arg6: memref<16x16xf32, #tpu.memory_space<vmem>>, %arg7: memref<16x16xf32, #tpu.memory_space<vmem>>, %arg8: memref<1x4x16x16xf32, #tpu.memory_space<vmem>>, %arg9: memref<1x4x16x16xf32, #tpu.memory_space<vmem>>, %arg10: memref<128x16xf32, #tpu.memory_space<vmem>>) attributes {dimension_semantics = [#tpu.dimension_semantics<parallel>, #tpu.dimension_semantics<parallel>], iteration_bounds = array<i64: 2, 1>, scalar_prefetch = 0 : i64, scratch_operands = 1 : i64, tpu.core_type = #tpu.core_type<tc>, window_params = [{transform_indices = @transform_0, window_bounds = array<i64: 1, 4, 16, 16>}, {transform_indices = @transform_1, window_bounds = array<i64: 1, 4, 16, 16>}, {transform_indices = @transform_2, window_bounds = array<i64: 1, 1, 16, 16>}, {pipeline_mode = #tpu.pipeline_mode<synchronous>, transform_indices = @transform_3, window_bounds = array<i64: 32, 16>}, {pipeline_mode = #tpu.pipeline_mode<synchronous>, transform_indices = @transform_4, window_bounds = array<i64: 16, 16>}, {pipeline_mode = #tpu.pipeline_mode<synchronous>, transform_indices = @transform_5, window_bounds = array<i64: 16, 16>}, {transform_indices = @transform_6, window_bounds = array<i64: 1, 4, 16, 16>}, {transform_indices = @transform_7, window_bounds = array<i64: 1, 4, 16, 16>}]} {
    %c0 = arith.constant 0 : index
    %c0_0 = arith.constant 0 : index
    %c0_1 = arith.constant 0 : index
    %c0_2 = arith.constant 0 : index
    %0 = vector.load %arg4[%c0, %c0_0, %c0_1, %c0_2] : memref<1x1x16x16xf32, #tpu.memory_space<vmem>>, vector<1x1x16x16xf32>
    %1 = vector.shape_cast %0 : vector<1x1x16x16xf32> to vector<1x16x16xf32>
    %c0_3 = arith.constant 0 : index
    %c0_4 = arith.constant 0 : index
    %c0_5 = arith.constant 0 : index
    %c0_6 = arith.constant 0 : index
    %2 = vector.load %arg2[%c0_3, %c0_4, %c0_5, %c0_6] : memref<1x4x16x16xf32, #tpu.memory_space<vmem>>, vector<1x4x16x16xf32>
    %3 = vector.shape_cast %2 : vector<1x4x16x16xf32> to vector<4x16x16xf32>
    %4 = vector.broadcast %1 : vector<1x16x16xf32> to vector<4x16x16xf32>
    %5 = arith.mulf %3, %4 : vector<4x16x16xf32>
    %6 = vector.shape_cast %5 : vector<4x16x16xf32> to vector<64x16xf32>
    %c0_7 = arith.constant 0 : index
    %c0_8 = arith.constant 0 : index
    %7 = vector.load %arg10[%c0_7, %c0_8] : memref<128x16xf32, #tpu.memory_space<vmem>>, vector<64x16xf32>
    tpu.vector_store %arg10[%c0_7, %c0_8], %6 {strides = array<i32>} : memref<128x16xf32, #tpu.memory_space<vmem>>, vector<64x16xf32>,
    %c0_9 = arith.constant 0 : index
    %c0_10 = arith.constant 0 : index
    %c0_11 = arith.constant 0 : index
    %c0_12 = arith.constant 0 : index
    %8 = vector.load %arg3[%c0_9, %c0_10, %c0_11, %c0_12] : memref<1x4x16x16xf32, #tpu.memory_space<vmem>>, vector<1x4x16x16xf32>
    %9 = vector.shape_cast %8 : vector<1x4x16x16xf32> to vector<4x16x16xf32>
    %10 = vector.broadcast %1 : vector<1x16x16xf32> to vector<4x16x16xf32>
    %11 = arith.mulf %9, %10 : vector<4x16x16xf32>
    %12 = vector.shape_cast %11 : vector<4x16x16xf32> to vector<64x16xf32>
    %c64 = arith.constant 64 : index
    %c0_13 = arith.constant 0 : index
    %13 = vector.load %arg10[%c64, %c0_13] : memref<128x16xf32, #tpu.memory_space<vmem>>, vector<64x16xf32>
    tpu.vector_store %arg10[%c64, %c0_13], %12 {strides = array<i32>} : memref<128x16xf32, #tpu.memory_space<vmem>>, vector<64x16xf32>,
    %c0_14 = arith.constant 0 : index
    %c0_15 = arith.constant 0 : index
    %14 = vector.load %arg10[%c0_14, %c0_15] : memref<128x16xf32, #tpu.memory_space<vmem>>, vector<128x16xf32>
    %c0_16 = arith.constant 0 : index
    %c0_17 = arith.constant 0 : index
    %15 = vector.load %arg6[%c0_16, %c0_17] : memref<16x16xf32, #tpu.memory_space<vmem>>, vector<16x16xf32>
    %cst = arith.constant dense<0.000000e+00> : vector<128x16xf32>
    %16 = tpu.matmul %14, %15, %cst {dimension_numbers = #tpu.dot_dimension_numbers<[1], [0], [0], [1], [0, 0, 1, 1], [], []>, precision = #tpu.contract_precision<fp32>} : vector<128x16xf32>, vector<16x16xf32>, vector<128x16xf32> -> vector<128x16xf32>
    %c0_18 = arith.constant 0 : index
    %c0_19 = arith.constant 0 : index
    %17 = vector.load %arg7[%c0_18, %c0_19] : memref<16x16xf32, #tpu.memory_space<vmem>>, vector<16x16xf32>
    %cst_20 = arith.constant dense<0.000000e+00> : vector<128x16xf32>
    %18 = tpu.matmul %14, %17, %cst_20 {dimension_numbers = #tpu.dot_dimension_numbers<[1], [0], [0], [1], [0, 0, 1, 1], [], []>, precision = #tpu.contract_precision<fp32>} : vector<128x16xf32>, vector<16x16xf32>, vector<128x16xf32> -> vector<128x16xf32>
    %19 = vector.extract_strided_slice %16 {offsets = [0, 0], sizes = [64, 16], strides = [1, 1]} : vector<128x16xf32> to vector<64x16xf32>
    %20 = vector.extract_strided_slice %18 {offsets = [64, 0], sizes = [64, 16], strides = [1, 1]} : vector<128x16xf32> to vector<64x16xf32>
    %21 = arith.subf %19, %20 : vector<64x16xf32>
    %c0_21 = arith.constant 0 : index
    %c0_22 = arith.constant 0 : index
    %22 = vector.load %arg10[%c0_21, %c0_22] : memref<128x16xf32, #tpu.memory_space<vmem>>, vector<64x16xf32>
    tpu.vector_store %arg10[%c0_21, %c0_22], %21 {strides = array<i32>} : memref<128x16xf32, #tpu.memory_space<vmem>>, vector<64x16xf32>,
    %23 = vector.extract_strided_slice %18 {offsets = [0, 0], sizes = [64, 16], strides = [1, 1]} : vector<128x16xf32> to vector<64x16xf32>
    %24 = vector.extract_strided_slice %16 {offsets = [64, 0], sizes = [64, 16], strides = [1, 1]} : vector<128x16xf32> to vector<64x16xf32>
    %25 = arith.addf %23, %24 : vector<64x16xf32>
    %c64_23 = arith.constant 64 : index
    %c0_24 = arith.constant 0 : index
    %26 = vector.load %arg10[%c64_23, %c0_24] : memref<128x16xf32, #tpu.memory_space<vmem>>, vector<64x16xf32>
    tpu.vector_store %arg10[%c64_23, %c0_24], %25 {strides = array<i32>} : memref<128x16xf32, #tpu.memory_space<vmem>>, vector<64x16xf32>,
    %c0_25 = arith.constant 0 : index
    %c0_26 = arith.constant 0 : index
    %27 = vector.load %arg5[%c0_25, %c0_26] : memref<32x16xf32, #tpu.memory_space<vmem>>, vector<32x16xf32>
    %c0_i32 = arith.constant 0 : i32
    %c4_i32 = arith.constant 4 : i32
    %28 = arith.addi %c0_i32, %c4_i32 : i32
    %c1_i32 = arith.constant 1 : i32
    scf.for %arg11 = %c0_i32 to %28 step %c1_i32  : i32 {
      %c16_i32 = arith.constant 16 : i32
      %29 = arith.muli %arg11, %c16_i32 : i32
      %30 = tpu.assume_multiple %29, 16 : i32
      %c16_i32_28 = arith.constant 16 : i32
      %31 = arith.muli %arg11, %c16_i32_28 : i32
      %c64_i32 = arith.constant 64 : i32
      %32 = arith.addi %c64_i32, %31 : i32
      %33 = tpu.assume_multiple %32, 16 : i32
      %34 = arith.index_cast %30 : i32 to index
      %c0_29 = arith.constant 0 : index
      %35 = vector.load %arg10[%34, %c0_29] : memref<128x16xf32, #tpu.memory_space<vmem>>, vector<16x16xf32>
      %36 = arith.index_cast %33 : i32 to index
      %c0_30 = arith.constant 0 : index
      %37 = vector.load %arg10[%36, %c0_30] : memref<128x16xf32, #tpu.memory_space<vmem>>, vector<16x16xf32>
      %cst_31 = arith.constant dense<0.000000e+00> : vector<32x16xf32>
      %38 = tpu.matmul %27, %35, %cst_31 {dimension_numbers = #tpu.dot_dimension_numbers<[1], [0], [0], [1], [0, 0, 1, 1], [], []>, precision = #tpu.contract_precision<fp32>} : vector<32x16xf32>, vector<16x16xf32>, vector<32x16xf32> -> vector<32x16xf32>
      %cst_32 = arith.constant dense<0.000000e+00> : vector<32x16xf32>
      %39 = tpu.matmul %27, %37, %cst_32 {dimension_numbers = #tpu.dot_dimension_numbers<[1], [0], [0], [1], [0, 0, 1, 1], [], []>, precision = #tpu.contract_precision<fp32>} : vector<32x16xf32>, vector<16x16xf32>, vector<32x16xf32> -> vector<32x16xf32>
      %40 = vector.extract_strided_slice %38 {offsets = [0, 0], sizes = [16, 16], strides = [1, 1]} : vector<32x16xf32> to vector<16x16xf32>
      %41 = vector.extract_strided_slice %39 {offsets = [16, 0], sizes = [16, 16], strides = [1, 1]} : vector<32x16xf32> to vector<16x16xf32>
      %42 = arith.subf %40, %41 : vector<16x16xf32>
      %c0_33 = arith.constant 0 : index
      %43 = arith.index_cast %arg11 : i32 to index
      %c0_34 = arith.constant 0 : index
      %c0_35 = arith.constant 0 : index
      %44 = vector.load %arg8[%c0_33, %43, %c0_34, %c0_35] : memref<1x4x16x16xf32, #tpu.memory_space<vmem>>, vector<1x1x16x16xf32>
      %45 = vector.shape_cast %44 : vector<1x1x16x16xf32> to vector<16x16xf32>
      %46 = vector.shape_cast %42 : vector<16x16xf32> to vector<1x1x16x16xf32>
      tpu.vector_store %arg8[%c0_33, %43, %c0_34, %c0_35], %46 {strides = array<i32>} : memref<1x4x16x16xf32, #tpu.memory_space<vmem>>, vector<1x1x16x16xf32>,
      %47 = vector.extract_strided_slice %39 {offsets = [0, 0], sizes = [16, 16], strides = [1, 1]} : vector<32x16xf32> to vector<16x16xf32>
      %48 = vector.extract_strided_slice %38 {offsets = [16, 0], sizes = [16, 16], strides = [1, 1]} : vector<32x16xf32> to vector<16x16xf32>
      %49 = arith.addf %47, %48 : vector<16x16xf32>
      %c0_36 = arith.constant 0 : index
      %50 = arith.index_cast %arg11 : i32 to index
      %c0_37 = arith.constant 0 : index
      %c0_38 = arith.constant 0 : index
      %51 = vector.load %arg9[%c0_36, %50, %c0_37, %c0_38] : memref<1x4x16x16xf32, #tpu.memory_space<vmem>>, vector<1x1x16x16xf32>
      %52 = vector.shape_cast %51 : vector<1x1x16x16xf32> to vector<16x16xf32>
      %53 = vector.shape_cast %49 : vector<16x16xf32> to vector<1x1x16x16xf32>
      tpu.vector_store %arg9[%c0_36, %50, %c0_37, %c0_38], %53 {strides = array<i32>} : memref<1x4x16x16xf32, #tpu.memory_space<vmem>>, vector<1x1x16x16xf32>,
    }
    %c4_i32_27 = arith.constant 4 : i32
    return
  }
  func.func @transform_0(%arg0: i32, %arg1: i32) -> (i32, i32, i32, i32) {
    %c0_i32 = arith.constant 0 : i32
    %c0_i32_0 = arith.constant 0 : i32
    %c0_i32_1 = arith.constant 0 : i32
    return %arg0, %arg1, %c0_i32, %c0_i32_0 : i32, i32, i32, i32
  }
  func.func @transform_1(%arg0: i32, %arg1: i32) -> (i32, i32, i32, i32) {
    %c0_i32 = arith.constant 0 : i32
    %c0_i32_0 = arith.constant 0 : i32
    %c0_i32_1 = arith.constant 0 : i32
    return %arg0, %arg1, %c0_i32, %c0_i32_0 : i32, i32, i32, i32
  }
  func.func @transform_2(%arg0: i32, %arg1: i32) -> (i32, i32, i32, i32) {
    %c0_i32 = arith.constant 0 : i32
    %c0_i32_0 = arith.constant 0 : i32
    %c0_i32_1 = arith.constant 0 : i32
    %c0_i32_2 = arith.constant 0 : i32
    return %arg0, %c0_i32, %c0_i32_0, %c0_i32_1 : i32, i32, i32, i32
  }
  func.func @transform_3(%arg0: i32, %arg1: i32) -> (i32, i32) {
    %c0_i32 = arith.constant 0 : i32
    %c0_i32_0 = arith.constant 0 : i32
    %c0_i32_1 = arith.constant 0 : i32
    return %c0_i32, %c0_i32_0 : i32, i32
  }
  func.func @transform_4(%arg0: i32, %arg1: i32) -> (i32, i32) {
    %c0_i32 = arith.constant 0 : i32
    %c0_i32_0 = arith.constant 0 : i32
    %c0_i32_1 = arith.constant 0 : i32
    return %c0_i32, %c0_i32_0 : i32, i32
  }
  func.func @transform_5(%arg0: i32, %arg1: i32) -> (i32, i32) {
    %c0_i32 = arith.constant 0 : i32
    %c0_i32_0 = arith.constant 0 : i32
    %c0_i32_1 = arith.constant 0 : i32
    return %c0_i32, %c0_i32_0 : i32, i32
  }
  func.func @transform_6(%arg0: i32, %arg1: i32) -> (i32, i32, i32, i32) {
    %c0_i32 = arith.constant 0 : i32
    %c0_i32_0 = arith.constant 0 : i32
    %c0_i32_1 = arith.constant 0 : i32
    return %arg0, %arg1, %c0_i32, %c0_i32_0 : i32, i32, i32, i32
  }
  func.func @transform_7(%arg0: i32, %arg1: i32) -> (i32, i32, i32, i32) {
    %c0_i32 = arith.constant 0 : i32
    %c0_i32_0 = arith.constant 0 : i32
    %c0_i32_1 = arith.constant 0 : i32
    return %arg0, %arg1, %c0_i32, %c0_i32_0 : i32, i32, i32, i32
  }
}

</mosaic_0001>

<bundles_post_ra>
// kernel: tpu_custom_call.1
= control target key start
LH: loop header
LB: loop body
LE: loop exit
PB: predicated region body
PF: predicated region fallthrough
CT: control target
= control target key end

     0   :  { %s6510_s0 = inlined_call_operand.hbm [shape: f32[2,4,16,16], index: 0, kind: input, shape index: {}]   ;;  %s6511_s1 = inlined_call_operand.hbm [shape: f32[2,4,16,16], index: 1, kind: input, shape index: {}]   ;;  %s6512_s2 = inlined_call_operand.vmem [shape: f32[2,1,16,16], index: 2, kind: input, shape index: {}]   ;;  %s6513_s3 = inlined_call_operand.vmem [shape: f32[32,16], index: 3, kind: input, shape index: {}]   ;;  %s6514_s4 = inlined_call_operand.vmem [shape: f32[16,16], index: 4, kind: input, shape index: {}]   ;;  %s6515_s5 = inlined_call_operand.vmem [shape: f32[16,16], index: 5, kind: input, shape index: {}]   ;;  %s6516_s6 = inlined_call_operand.hbm [shape: f32[2,4,16,16], index: 6, kind: output, shape index: {0}]   ;;  %s6517_s7 = inlined_call_operand.hbm [shape: f32[2,4,16,16], index: 7, kind: output, shape index: {1}]  }
   0x1   :  { %6524 = sst [smem:[#allocation21_spill]] %s6510_s0 }
   0x2   :  { %13 = vsyncpa [#allocation4], 0 }
   0x3   :  { %15 = vsyncpa [#allocation4 + $0x1], 0 }
   0x4   :  { %16 = vsyncpa [#allocation7], 0 }
   0x5   :  { %18 = vsyncpa [#allocation7 + $0x1], 0 }
   0x6   :  { %19 = vsyncpa [#allocation5], 0 }
   0x7   :  { %21 = vsyncpa [#allocation5 + $0x1], 0 }
   0x8   :  { %22 = vsyncpa [#allocation10], 0 }
   0x9   :  { %24 = vsyncpa [#allocation10 + $0x1], 0  ;;  %s5592_s24 = smov 0   ;;  %s5594_s25 = smov 0  }
   0xa   :  { %s5596_s26 = smov 0   ;;  %s5598_s27 = smov 0  }
   0xb   :  { %s5600_s28 = smov 0   ;;  %s5602_s29 = smov 0  }
   0xc LB: > { %s4188_s30 = sadd.s32 4294967295, %s5538_s29   ;;  %s4189_s8 = sadd.s32 4294967294, %s5538_s29   ;;  %s5538_s29 = sphi %s5602_s29, %s30_s29   ;;  %s5534_s28 = sphi %s5600_s28, %s6556_s28   ;;  %s5530_s27 = sphi %s5598_s27, %s6555_s27   ;;  %s5526_s26 = sphi %s5596_s26, %s6554_s26   ;;  %s5522_s25 = sphi %s5594_s25, %s6553_s25   ;;  %s5518_s24 = sphi %s5592_s24, %s6552_s24  }
   0xd   : > { %s42_s9 = sadd.s32 1, %s5534_s28  ;;  %s51_s10 = sadd.s32 1, %s5526_s26 }
   0xe   : > { %p44_p0 = scmp.ge.s32.totalorder %s42_s9, 2  ;;  %p58_p1 = scmp.ne.s32.totalorder %s5526_s26, %s5522_s25 }
   0xf   : > { %p59_p2 = scmp.eq.s32.totalorder %s5538_s29, 0  ;;  %p64_p3 = scmp.ne.s32.totalorder %s5522_s25, %s5518_s24 }
  0x10   : > { %s6558_s9 = smov (%p44_p0, %s42_s9), 0  ;;  %p65_p5 = scmp.eq.s32.totalorder %s4188_s30, 0 }
  0x11   : > { %6525 = sst [smem:[#allocation15_spill]] %s6558_s9  ;;  %p5633_p4 = por %p59_p2, %p58_p1 }
  0x12   : > { %s46_s12 = ssub.s32 %s5534_s28, %s6558_s9  ;;  %p207_p6 = scmp.eq.s32.totalorder %s4188_s30, 1 }
  0x13   : > { %p49_p7 = scmp.eq.s32.totalorder %s46_s12, 0  ;;  %p5639_p8 = por %p65_p5, %p64_p3 }
  0x14   : > { %p5643_p9 = por %p207_p6, %p58_p1  ;;  %p213_p10 = scmp.eq.s32.totalorder %s4189_s8, 1 }
  0x15   : > { %s6527_s13 = scalar_select %p5639_p8, 1, 0 }
  0x16   : > { %s6528_s14 = scalar_select %p5643_p9, 1, 0 }
  0x17   : > { %s5648_s15 = scalar_select %p49_p7, %s5526_s26, %s51_s10  }
  0x18   : > { %p5650_p11 = por %p213_p10, %p64_p3  ;;  %p5294_p13 = scmp.lt.s32.totalorder %s5538_s29, 2 }
  0x19   : > { %6529 = sst [smem:[#allocation16_spill]] %s5648_s15  ;;  %s5657_s17 = sand.u32 1, %s5526_s26  }
  0x1a   : > { %s6530_s16 = scalar_select %p5650_p11, 1, 0 }
  0x1b   : > { %s6518_s18 = sshll.u32 %s5657_s17, 6  ;;  %s6519_s19 = sshll.u32 %s5534_s28, 10 }
  0x1c   : > { %s6531_s0 = sld [smem:[#allocation21_spill]]  ;;  %s274_s23 = scalar_lea.vmem [#allocation3], %s6518_s18 }
  0x1d   : > { %s284_s30 = sshll.u32 %s274_s23, 4  ;;  %p5674_p0 = pnand %p5294_p13, %p5633_p4  ;;  %s5670_s30 = int_to_ptr.vmem [resolvable:$true] %s284_s30 }
  0x1e   : > { %s271_s10 = scalar_lea.sflag [#allocation4], %s5657_s17 }
  0x1f   : > { %p5358_p3 = pneg %p5674_p0 }
  0x22   : > { %s5666_s22 = scalar_lea.hbm %s6531_s0, %s6519_s19  ;;  %s5361_s11 = scalar_lea.hbm %s6531_s0, 2048 }
  0x23   : > { %s5356_s12 = scalar_lea.hbm %s5666_s22, 1024  ;;  %p5362_p4 = scmp.lt.u32.totalorder %s5666_s22, %s6531_s0 }
  0x24   : > { %p5357_p2 = scmp.ne.s32.totalorder %s5666_s22, %s5356_s12  ;;  %p5363_p7 = scmp.lt.u32.totalorder %s5361_s11, %s5356_s12 }
  0x25   : > { %p5365_p13 = scmp.lt.u32.totalorder %s5356_s12, %s5666_s22 }
  0x26   : > { %p5359_p5 = pnand %p5358_p3, %p5357_p2  ;;  %p5364_p10 = por %p5363_p7, %p5362_p4 }
  0x28   : > { %p5360_p6 = pneg %p5359_p5  ;;  %p5366_p12 = por %p5365_p13, %p5364_p10 }
  0x2a   : > { %p5367_p1 = pnand %p5366_p12, %p5360_p6 }
  0x2c   : > { %5370 = shalt.err (!%p5367_p1)
}
  0x2d   : > { %s5371_s19 = scalar_lea.vmem %s5670_s30, 1024  ;;  %s5544_s20 = smov [#allocation3]  }
  0x2e   : > { %p5372_p2 = scmp.ne.s32.totalorder %s5670_s30, %s5371_s19  ;;  %s5376_s21 = sshll.u32 %s5544_s20, 4  ;;  %s5377_s21 = int_to_ptr.vmem [resolvable:$false] %s5376_s21 }
  0x2f   : > { %s5378_s18 = scalar_lea.vmem %s5377_s21, 2048  ;;  %p5379_p9 = scmp.lt.s32.totalorder %s5670_s30, %s5377_s21 }
  0x30   : > { %p5374_p5 = pnand %p5372_p2, %p5358_p3  ;;  %p5380_p4 = scmp.lt.s32.totalorder %s5378_s18, %s5371_s19 }
  0x32   : > { %p5375_p11 = pneg %p5374_p5  ;;  %p5381_p7 = por %p5380_p4, %p5379_p9 }
  0x34   : > { %p5382_p10 = pnand %p5381_p7, %p5375_p11 }
  0x36   : > { %5385 = shalt.err (!%p5382_p10)
}
  0x37   : > { %s6522_s12 = smov 128   ;;  %s5546_s11 = smov 8  }
  0x38   : > { %5283 = dma.hbm_to_vmem [thread:$0]  (!%p5674_p0), %s5666_s22, 1024, %s5670_s30, %s271_s10, %s6522_s12, %s6522_s12, %s5546_s11  }
  0x39   : > { %p324_p9 = scmp.lt.s32.totalorder %s5538_s29, 3  ;;  %s6533_s19 = sshll.u32 %s5534_s28, 10 }
  0x3a   : > { %s5716_s21 = scalar_lea.hbm %s6511_s1, %s6533_s19  ;;  %p6534_p11 = scmp.ge.s32.totalorder %s5538_s29, 1 }
  0x3b   : > { %s6536_s0 = sshll.u32 %s5657_s17, 6  ;;  %s295_s22 = scalar_lea.sflag [#allocation7], %s5657_s17 }
  0x3c   : > { %p5720_p12 = pnand %p6534_p11, %p324_p9  ;;  %s298_s9 = scalar_lea.vmem [#allocation6], %s6536_s0 }
  0x3d   : > { %s308_s15 = sshll.u32 %s298_s9, 4  ;;  %s5386_s30 = scalar_lea.hbm %s5716_s21, 1024  ;;  %s5726_s15 = int_to_ptr.vmem [resolvable:$true] %s308_s15 }
  0x3e   : > { %p5387_p1 = scmp.ne.s32.totalorder %s5716_s21, %s5386_s30  ;;  %s5391_s23 = scalar_lea.hbm %s6511_s1, 2048 }
  0x3f   : > { %p5392_p2 = scmp.lt.u32.totalorder %s5716_s21, %s6511_s1  ;;  %p5393_p5 = scmp.lt.u32.totalorder %s5391_s23, %s5386_s30 }
  0x40   : > { %p5389_p6 = pnand %p5387_p1, %p5358_p3  ;;  %p5395_p7 = scmp.lt.u32.totalorder %s5386_s30, %s5716_s21 }
  0x41   : > { %p5394_p4 = por %p5393_p5, %p5392_p2 }
  0x42   : > { %p5390_p13 = pneg %p5389_p6 }
  0x43   : > { %p5396_p10 = por %p5395_p7, %p5394_p4 }
  0x45   : > { %p5397_p9 = pnand %p5396_p10, %p5390_p13 }
  0x47   : > { %5400 = shalt.err (!%p5397_p9)
}
  0x48   : > { %s5401_s0 = scalar_lea.vmem %s5726_s15, 1024  ;;  %s5547_s9 = smov [#allocation6]  }
  0x49   : > { %p5402_p11 = scmp.ne.s32.totalorder %s5726_s15, %s5401_s0  ;;  %s5406_s10 = sshll.u32 %s5547_s9, 4  ;;  %s5407_s10 = int_to_ptr.vmem [resolvable:$false] %s5406_s10 }
  0x4a   : > { %s5408_s12 = scalar_lea.vmem %s5407_s10, 2048  ;;  %p5409_p8 = scmp.lt.s32.totalorder %s5726_s15, %s5407_s10 }
  0x4b   : > { %p5404_p1 = pnand %p5402_p11, %p5358_p3  ;;  %p5410_p2 = scmp.lt.s32.totalorder %s5408_s12, %s5401_s0 }
  0x4d   : > { %p5405_p6 = pneg %p5404_p1  ;;  %p5411_p5 = por %p5410_p2, %p5409_p8 }
  0x4f   : > { %p5412_p4 = pnand %p5411_p5, %p5405_p6 }
  0x51   : > { %5415 = shalt.err (!%p5412_p4)
}
  0x52   : > { %s6537_s30 = smov 128   ;;  %328 = sbr.rel (%p5720_p12) target bundleno = 844 (0x34c), region = 44 }
  0x53   : > { %5286 = dma.hbm_to_vmem [thread:$0]  (!%p5674_p0), %s5716_s21, 1024, %s5726_s15, %s295_s22, %s6537_s30, %s6537_s30, %s5546_s11  }
  0x59   : > { %s5760_s19 = sand.u32 1, %s5522_s25   ;;  %p6538_p8 = scmp.ne.s32.totalorder %s6527_s13, 0 }
  0x5a   : > { %s5763_s23 = sshll.u32 %s5760_s19, 6  ;;  %s331_s8 = scalar_lea.sflag [#allocation4], %s5760_s19 }
  0x5b   : > { %s5767_s20 = scalar_lea.vmem [#allocation3], %s5763_s23 }
  0x5c   : > { %5501 = dma.done.wait (%p6538_p8), %s331_s8, 1024  }
  0x5d   : > { %5503 = vsyncadd (%p6538_p8), %s331_s8, 4294966272  ;;  %s340_s15 = scalar_lea.sflag [#allocation7], %s5760_s19  ;;  %s5775_s17 = scalar_lea.vmem [#allocation6], %s5763_s23 }
  0x5e   : > { %5505 = dma.done.wait (%p6538_p8), %s340_s15, 1024  }
  0x5f   : > { %5507 = vsyncadd (%p6538_p8), %s340_s15, 4294966272  ;;  %p391_p0 = scmp.lt.s32.totalorder %s5530_s27, 1  ;;  %v5789_v0 = vld [vmem:[%s6513_s3] sm:$0xff]  ;;  %v5794_v1 = vld [vmem:[%s6513_s3 + $0x8] sm:$0xff]  ;;  %vm416_vm0 = vcmask 130048  }
  0x60   : > { %6539 = vst [vmem:[#allocation17_spill] sm:$0xff] %v5789_v0  ;;  %6540 = vst [vmem:[#allocation18_spill] sm:$0xff] %v5794_v1  ;;  %v5799_v2 = vld [vmem:[%s6513_s3 + $0x10] sm:$0xff]  ;;  %v5804_v3 = vld [vmem:[%s6513_s3 + $0x18] sm:$0xff] }
  0x61   : > { %s392_s11 = scalar_select %p391_p0, %s5530_s27, 1  ;;  %6541 = vst [vmem:[#allocation19_spill] sm:$0xff] %v5799_v2  ;;  %6542 = vst [vmem:[#allocation20_spill] sm:$0xff] %v5804_v3  ;;  %v465_v4 = vld [vmem:[%s6514_s4] sm:$0xff]  ;;  %v466_v5 = vld [vmem:[%s6514_s4 + $0x8] sm:$0xff] }
  0x62   : > { %v516_v6 = vand.u32 4294901760, %v465_v4  ;;  %v519_v7 = vand.u32 4294901760, %v466_v5  ;;  %v1619_v8 = vld [vmem:[%s6515_s5] sm:$0xff]  ;;  %v1620_v9 = vld [vmem:[%s6515_s5 + $0x8] sm:$0xff]  ;;  %v402_v20 = vld [vmem:[%s5767_s20 + $0x10] sm:$0xff] }
  0x63   : > { %s4219_s21 = sshll.u32 %s392_s11, 4  ;;  %v1622_v11 = vand.u32 4294901760, %v1619_v8  ;;  %v1625_v12 = vand.u32 4294901760, %v1620_v9  ;;  %v400_v14 = vld [vmem:[%s5767_s20] sm:$0xff]  ;;  %v401_v15 = vld [vmem:[%s5767_s20 + $0x8] sm:$0xff]  ;;  %v403_v21 = vld [vmem:[%s5767_s20 + $0x18] sm:$0xff] }
  0x64   : > { %s395_s0 = scalar_lea.vmem %s6512_s2, %s4219_s21  ;;  %v5824_v16 = vpack.c.bf16 %v519_v7, %v516_v6  ;;  %v5827_v18 = vsub.f32 %v465_v4, %v516_v6  ;;  %v5829_v19 = vsub.f32 %v466_v5, %v519_v7  ;;  %v404_v22 = vld [vmem:[%s5767_s20 + $0x20] sm:$0xff]  ;;  %v405_v27 = vld [vmem:[%s5767_s20 + $0x28] sm:$0xff]  ;;  %v406_v28 = vld [vmem:[%s5767_s20 + $0x30] sm:$0xff] }
  0x65   : > { %v5818_v10 = vld [vmem:[%s395_s0] sm:$0xff]  ;;  %v5820_v13 = vld [vmem:[%s395_s0 + $0x8] sm:$0xff]  ;;  %v5834_v23 = vpack.c.bf16 %v1625_v12, %v1622_v11  ;;  %v5836_v24 = vsub.f32 %v1619_v8, %v1622_v11  ;;  %v5838_v25 = vsub.f32 %v1620_v9, %v1625_v12  ;;  %v407_v29 = vld [vmem:[%s5767_s20 + $0x38] sm:$0xff]  ;;  %s381_s20 = scalar_lea.vmem [#allocation8], %s5763_s23  ;;  %s6284_s0 = smov 0  }
  0x66   : > { %v408_v17 = vmul.f32 %v400_v14, %v5818_v10  ;;  %v409_v26 = vmul.f32 %v401_v15, %v5820_v13  ;;  %4967 = vmatprep.subr.bf16.mxu1 %v5824_v16  ;;  %v745_v30 = vand.u32 4294901760, %v5827_v18  ;;  %v752_v31 = vand.u32 4294901760, %v5829_v19  ;;  %v425_v34 = vld [vmem:[%s5775_s17] sm:$0xff]  ;;  %v426_v35 = vld [vmem:[%s5775_s17 + $0x8] sm:$0xff]  ;;  %v427_v40 = vld [vmem:[%s5775_s17 + $0x10] sm:$0xff] }
  0x67   : > { %v410_v32 = vmul.f32 %v402_v20, %v5818_v10  ;;  %v411_v33 = vmul.f32 %v403_v21, %v5820_v13  ;;  %4991 = vmatprep.subr.bf16.mxu0 %v5834_v23  ;;  %4969 = vmatpush3.bf16.msra.mxu1 %v5824_v16  ;;  %v1851_v36 = vand.u32 4294901760, %v5836_v24  ;;  %v1858_v37 = vand.u32 4294901760, %v5838_v25  ;;  %v428_v41 = vld [vmem:[%s5775_s17 + $0x18] sm:$0xff]  ;;  %v429_v46 = vld [vmem:[%s5775_s17 + $0x20] sm:$0xff]  ;;  %v430_v47 = vld [vmem:[%s5775_s17 + $0x28] sm:$0xff] }
  0x68   : > { %417 = vst.msk [vmem:[#allocation2] sm:$0xff] %vm416_vm0, %v408_v17  ;;  %418 = vst.msk [vmem:[#allocation2 + $0x8] sm:$0xff] %vm416_vm0, %v409_v26  ;;  %v412_v38 = vmul.f32 %v404_v22, %v5818_v10  ;;  %v413_v39 = vmul.f32 %v405_v27, %v5820_v13  ;;  %4993 = vmatpush3.bf16.msra.mxu0 %v5834_v23  ;;  %v746_v42 = vsub.f32 %v5827_v18, %v745_v30  ;;  %v431_v52 = vld [vmem:[%s5775_s17 + $0x30] sm:$0xff]  ;;  %v432_v53 = vld [vmem:[%s5775_s17 + $0x38] sm:$0xff]  ;;  %s388_s17 = scalar_lea.vmem [#allocation9], %s5763_s23 }
  0x69   : > { %v753_v43 = vsub.f32 %v5829_v19, %v752_v31  ;;  %419 = vst.msk [vmem:[#allocation2 + $0x10] sm:$0xff] %vm416_vm0, %v410_v32  ;;  %420 = vst.msk [vmem:[#allocation2 + $0x18] sm:$0xff] %vm416_vm0, %v411_v33  ;;  %v414_v44 = vmul.f32 %v406_v28, %v5818_v10  ;;  %v415_v45 = vmul.f32 %v407_v29, %v5820_v13 }
  0x6a   : > { %v1852_v48 = vsub.f32 %v5836_v24, %v1851_v36  ;;  %v1859_v49 = vsub.f32 %v5838_v25, %v1858_v37  ;;  %421 = vst.msk [vmem:[#allocation2 + $0x20] sm:$0xff] %vm416_vm0, %v412_v38  ;;  %422 = vst.msk [vmem:[#allocation2 + $0x28] sm:$0xff] %vm416_vm0, %v413_v39  ;;  %v433_v50 = vmul.f32 %v425_v34, %v5818_v10  ;;  %v747_v54 = vand.u32 4294901760, %v746_v42 }
  0x6b   : > { %v434_v51 = vmul.f32 %v426_v35, %v5820_v13  ;;  %v754_v55 = vand.u32 4294901760, %v753_v43  ;;  %423 = vst.msk [vmem:[#allocation2 + $0x30] sm:$0xff] %vm416_vm0, %v414_v44  ;;  %424 = vst.msk [vmem:[#allocation2 + $0x38] sm:$0xff] %vm416_vm0, %v415_v45  ;;  %v435_v56 = vmul.f32 %v427_v40, %v5818_v10  ;;  %v436_v57 = vmul.f32 %v428_v41, %v5820_v13 }
  0x6c   : > { %v1853_v58 = vand.u32 4294901760, %v1852_v48  ;;  %v1860_v59 = vand.u32 4294901760, %v1859_v49  ;;  %441 = vst.msk [vmem:[#allocation2 + $0x40] sm:$0xff] %vm416_vm0, %v433_v50  ;;  %v437_v60 = vmul.f32 %v429_v46, %v5818_v10  ;;  %v438_v61 = vmul.f32 %v430_v47, %v5820_v13 }
  0x6d   : > { %442 = vst.msk [vmem:[#allocation2 + $0x48] sm:$0xff] %vm416_vm0, %v434_v51  ;;  %v5886_v62 = vpack.c.bf16 %v754_v55, %v747_v54  ;;  %443 = vst.msk [vmem:[#allocation2 + $0x50] sm:$0xff] %vm416_vm0, %v435_v56  ;;  %v439_v63 = vmul.f32 %v431_v52, %v5818_v10  ;;  %v440_v4 = vmul.f32 %v432_v53, %v5820_v13 }
  0x6e   : > { %444 = vst.msk [vmem:[#allocation2 + $0x58] sm:$0xff] %vm416_vm0, %v436_v57  ;;  %v5892_v6 = vpack.c.bf16 %v1860_v59, %v1853_v58  ;;  %445 = vst.msk [vmem:[#allocation2 + $0x60] sm:$0xff] %vm416_vm0, %v437_v60  ;;  %v5896_v7 = vpack.c.bf16 %v752_v31, %v745_v30  ;;  %v5898_v8 = vpack.c.bf16 %v1858_v37, %v1851_v36 }
  0x6f   : > { %v449_v5 = vld [vmem:[#allocation2] sm:$0xff]  ;;  %446 = vst.msk [vmem:[#allocation2 + $0x68] sm:$0xff] %vm416_vm0, %v438_v61  ;;  %4971 = vmatprep.subr.bf16.mxu1 %v5886_v62  ;;  %v450_v11 = vld [vmem:[#allocation2 + $0x8] sm:$0xff]  ;;  %447 = vst.msk [vmem:[#allocation2 + $0x70] sm:$0xff] %vm416_vm0, %v439_v63  ;;  %v5914_v26 = vpack.c.bf16 %v5829_v19, %v5827_v18 }
  0x70   : > { %v468_v9 = vsel %vm416_vm0, %v449_v5, 0  ;;  %448 = vst.msk [vmem:[#allocation2 + $0x78] sm:$0xff] %vm416_vm0, %v440_v4  ;;  %4995 = vmatprep.subr.bf16.mxu0 %v5892_v6  ;;  %v471_v12 = vsel %vm416_vm0, %v450_v11, 0  ;;  %v451_v13 = vld [vmem:[#allocation2 + $0x10] sm:$0xff]  ;;  %v452_v14 = vld [vmem:[#allocation2 + $0x18] sm:$0xff]  ;;  %v5992_v11 = vpack.c.bf16 %v5838_v25, %v5836_v24 }
  0x71   : > { %v5904_v10 = vand.u32 4294901760, %v468_v9  ;;  %v5908_v15 = vand.u32 4294901760, %v471_v12  ;;  %v474_v17 = vsel %vm416_vm0, %v451_v13, 0  ;;  %v477_v20 = vsel %vm416_vm0, %v452_v14, 0  ;;  %v453_v21 = vld [vmem:[#allocation2 + $0x20] sm:$0xff]  ;;  %v454_v22 = vld [vmem:[#allocation2 + $0x28] sm:$0xff] }
  0x72   : > { %v5919_v28 = vand.u32 4294901760, %v474_v17  ;;  %v5921_v29 = vand.u32 4294901760, %v477_v20  ;;  %v480_v30 = vsel %vm416_vm0, %v453_v21, 0  ;;  %v455_v31 = vld [vmem:[#allocation2 + $0x30] sm:$0xff]  ;;  %v456_v32 = vld [vmem:[#allocation2 + $0x38] sm:$0xff]  ;;  %v483_v35 = vsel %vm416_vm0, %v454_v22, 0 }
  0x73   : > { %v5917_v27 = vsub.f32 %v468_v9, %v5904_v10  ;;  %v5925_v33 = vsub.f32 %v471_v12, %v5908_v15  ;;  %v5927_v34 = vand.u32 4294901760, %v480_v30  ;;  %v486_v18 = vsel %vm416_vm0, %v455_v31, 0  ;;  %v457_v51 = vld [vmem:[#allocation2 + $0x40] sm:$0xff] }
  0x74   : > { %v5935_v36 = vsub.f32 %v474_v17, %v5919_v28  ;;  %v5938_v37 = vsub.f32 %v477_v20, %v5921_v29  ;;  %v5940_v38 = vand.u32 4294901760, %v483_v35  ;;  %v5948_v41 = vand.u32 4294901760, %v486_v18  ;;  %v458_v60 = vld [vmem:[#allocation2 + $0x48] sm:$0xff]  ;;  %v459_v61 = vld [vmem:[#allocation2 + $0x50] sm:$0xff] }
  0x75   : > { %v5932_v19 = vand.u32 4294901760, %v5917_v27  ;;  %v5943_v39 = vand.u32 4294901760, %v5925_v33  ;;  %v5946_v40 = vsub.f32 %v480_v30, %v5927_v34  ;;  %v489_v42 = vsel %vm416_vm0, %v456_v32, 0  ;;  %v460_v63 = vld [vmem:[#allocation2 + $0x58] sm:$0xff]  ;;  %v461_v20 = vld [vmem:[#allocation2 + $0x60] sm:$0xff] }
  0x76   : > { %v5954_v44 = vand.u32 4294901760, %v5935_v36  ;;  %v5957_v45 = vand.u32 4294901760, %v5938_v37  ;;  %v5960_v46 = vsub.f32 %v483_v35, %v5940_v38  ;;  %v5968_v49 = vsub.f32 %v486_v18, %v5948_v41  ;;  %v462_v21 = vld [vmem:[#allocation2 + $0x68] sm:$0xff] }
  0x77   : > { %v585_v43 = vsub.f32 %v5917_v27, %v5932_v19  ;;  %v595_v47 = vsub.f32 %v5925_v33, %v5943_v39  ;;  %v5965_v48 = vand.u32 4294901760, %v5946_v40  ;;  %v5970_v50 = vand.u32 4294901760, %v489_v42 }
  0x78   : > { %v605_v53 = vsub.f32 %v5935_v36, %v5954_v44  ;;  %v615_v54 = vsub.f32 %v5938_v37, %v5957_v45  ;;  %v5977_v55 = vand.u32 4294901760, %v5960_v46  ;;  %v5982_v58 = vand.u32 4294901760, %v5968_v49 }
  0x79   : > { %v586_v52 = vand.u32 4294901760, %v585_v43  ;;  %v596_v56 = vand.u32 4294901760, %v595_v47  ;;  %v625_v57 = vsub.f32 %v5946_v40, %v5965_v48  ;;  %v5985_v59 = vsub.f32 %v489_v42, %v5970_v50 }
  0x7a   : > { %v606_v4 = vand.u32 4294901760, %v605_v53  ;;  %v635_v5 = vsub.f32 %v5960_v46, %v5977_v55  ;;  %v492_v9 = vsel %vm416_vm0, %v457_v51, 0  ;;  %v616_v12 = vand.u32 4294901760, %v615_v54 }
  0x7b   : > { %4514 = vmatprep.mubr.f32.mxu1 %v586_v52  ;;  %4682 = vmatprep.mubr.f32.mxu0 %v586_v52  ;;  %v645_v13 = vsub.f32 %v5968_v49, %v5982_v58  ;;  %v5997_v14 = vand.u32 4294901760, %v5985_v59  ;;  %v5999_v17 = vand.u32 4294901760, %v492_v9  ;;  %v626_v22 = vand.u32 4294901760, %v625_v57 }
  0x7c   : > { %4515 = vmatmul.mubr.f32.vlgmr.msra.gmra.mrb[0].mxu1 %v596_v56  ;;  %4683 = vmatmul.mubr.f32.vlgmr.msra.gmra.mrb[0].mxu0 %v596_v56  ;;  %v495_v24 = vsel %vm416_vm0, %v458_v60, 0  ;;  %v498_v25 = vsel %vm416_vm0, %v459_v61, 0  ;;  %v501_v30 = vsel %vm416_vm0, %v460_v63, 0  ;;  %v636_v31 = vand.u32 4294901760, %v635_v5  ;;  %v464_v56 = vld [vmem:[#allocation2 + $0x78] sm:$0xff] }
  0x7d   : > { %4973 = vmatpush3.bf16.msra.mxu1 %v5886_v62  ;;  %4997 = vmatpush3.bf16.msra.mxu0 %v5892_v6  ;;  %v655_v32 = vsub.f32 %v5985_v59, %v5997_v14  ;;  %v6009_v35 = vsub.f32 %v492_v9, %v5999_v17  ;;  %v6011_v18 = vand.u32 4294901760, %v495_v24  ;;  %v463_v62 = vld [vmem:[#allocation2 + $0x70] sm:$0xff]  ;;  %v6013_v6 = vand.u32 4294901760, %v498_v25 }
  0x7e   : > { %4517 = vmatprep.mubr.f32.mxu1 %v606_v4  ;;  %4685 = vmatprep.mubr.f32.mxu0 %v606_v4  ;;  %v6015_v42 = vand.u32 4294901760, %v501_v30  ;;  %v504_v43 = vsel %vm416_vm0, %v461_v20, 0  ;;  %v507_v47 = vsel %vm416_vm0, %v462_v21, 0  ;;  %v646_v51 = vand.u32 4294901760, %v645_v13 }
  0x7f   : > { %4975 = vmatprep.subr.bf16.mxu1 %v5914_v26  ;;  %4999 = vmatprep.subr.bf16.mxu0 %v5992_v11  ;;  %v6022_v52 = vand.u32 4294901760, %v6009_v35  ;;  %v6025_v53 = vsub.f32 %v495_v24, %v6011_v18  ;;  %v6027_v54 = vand.u32 4294901760, %v504_v43  ;;  %v6030_v57 = vsub.f32 %v498_v25, %v6013_v6 }
  0x80   : > { %4518 = vmatmul.mubr.f32.gmra.mrb[2].mxu1 %v616_v12  ;;  %4686 = vmatmul.mubr.f32.gmra.mrb[2].mxu0 %v616_v12  ;;  %v6033_v60 = vsub.f32 %v501_v30, %v6015_v42  ;;  %v6035_v61 = vand.u32 4294901760, %v507_v47  ;;  %v510_v63 = vsel %vm416_vm0, %v463_v62, 0  ;;  %v656_v13 = vand.u32 4294901760, %v655_v32 }
  0x81   : > { %4520 = vmatprep.mubr.f32.mxu1 %v626_v22  ;;  %4688 = vmatprep.mubr.f32.mxu0 %v626_v22  ;;  %v665_v4 = vsub.f32 %v6009_v35, %v6022_v52  ;;  %v6041_v5 = vand.u32 4294901760, %v6025_v53  ;;  %v6044_v9 = vsub.f32 %v504_v43, %v6027_v54  ;;  %v6046_v12 = vand.u32 4294901760, %v510_v63 }
  0x82   : > { %v6049_v20 = vand.u32 4294901760, %v6030_v57  ;;  %v513_v21 = vsel %vm416_vm0, %v464_v56, 0  ;;  %v6055_v25 = vand.u32 4294901760, %v6033_v60  ;;  %v6058_v30 = vsub.f32 %v507_v47, %v6035_v61 }
  0x83   : > { %v666_v22 = vand.u32 4294901760, %v665_v4  ;;  %v675_v24 = vsub.f32 %v6025_v53, %v6041_v5  ;;  %v6063_v62 = vand.u32 4294901760, %v6044_v9  ;;  %v6068_v43 = vand.u32 4294901760, %v513_v21 }
  0x84   : > { %4521 = vmatmul.mubr.f32.gmra.mrb[4].mxu1 %v636_v31  ;;  %4689 = vmatmul.mubr.f32.gmra.mrb[4].mxu0 %v636_v31  ;;  %v685_v32 = vsub.f32 %v6030_v57, %v6049_v20  ;;  %v6066_v31 = vsub.f32 %v510_v63, %v6046_v12  ;;  %v695_v47 = vsub.f32 %v6033_v60, %v6055_v25  ;;  %v6073_v4 = vand.u32 4294901760, %v6058_v30 }
  0x85   : > { %4523 = vmatprep.mubr.f32.mxu1 %v646_v51  ;;  %4691 = vmatprep.mubr.f32.mxu0 %v646_v51  ;;  %v676_v56 = vand.u32 4294901760, %v675_v24  ;;  %v6076_v51 = vsub.f32 %v513_v21, %v6068_v43  ;;  %v705_v63 = vsub.f32 %v6044_v9, %v6063_v62 }
  0x86   : > { %v686_v3 = vand.u32 4294901760, %v685_v32  ;;  %v6081_v2 = vand.u32 4294901760, %v6066_v31  ;;  %v715_v24 = vsub.f32 %v6058_v30, %v6073_v4 }
  0x87   : > { %v6086_v1 = vand.u32 4294901760, %v6076_v51  ;;  %v706_v21 = vand.u32 4294901760, %v705_v63 }
  0x88   : > { %4524 = vmatmul.mubr.f32.gmra.mrb[6].mxu1 %v656_v13  ;;  %4692 = vmatmul.mubr.f32.gmra.mrb[6].mxu0 %v656_v13  ;;  %v696_v13 = vand.u32 4294901760, %v695_v47  ;;  %v716_v32 = vand.u32 4294901760, %v715_v24 }
  0x89   : > { %4526 = vmatprep.mubr.f32.mxu1 %v666_v22  ;;  %4694 = vmatprep.mubr.f32.mxu0 %v666_v22  ;;  %v725_v22 = vsub.f32 %v6066_v31, %v6081_v2  ;;  %v735_v0 = vsub.f32 %v6076_v51, %v6086_v1 }
  0x8b   : > { %v736_v47 = vand.u32 4294901760, %v735_v0 }
  0x8c   : > { %4527 = vmatmul.mubr.f32.gmra.mrb[8].mxu1 %v676_v56  ;;  %4695 = vmatmul.mubr.f32.gmra.mrb[8].mxu0 %v676_v56  ;;  %v726_v56 = vand.u32 4294901760, %v725_v22 }
  0x8d   : > { %4529 = vmatprep.mubr.f32.mxu1 %v686_v3  ;;  %4697 = vmatprep.mubr.f32.mxu0 %v686_v3 }
  0x90   : > { %4530 = vmatmul.mubr.f32.gmra.mrb[10].mxu1 %v696_v13  ;;  %4698 = vmatmul.mubr.f32.gmra.mrb[10].mxu0 %v696_v13 }
  0x91   : > { %4532 = vmatprep.mubr.f32.mxu1 %v706_v21  ;;  %4700 = vmatprep.mubr.f32.mxu0 %v706_v21 }
  0x94   : > { %4533 = vmatmul.mubr.f32.gmra.mrb[12].mxu1 %v716_v32  ;;  %4701 = vmatmul.mubr.f32.gmra.mrb[12].mxu0 %v716_v32 }
  0x95   : > { %4535 = vmatprep.mubr.f32.mxu1 %v726_v56  ;;  %4703 = vmatprep.mubr.f32.mxu0 %v726_v56 }
  0x98   : > { %4536 = vmatmul.mubr.f32.gmra.mrb[14].mxu1 %v736_v47  ;;  %4704 = vmatmul.mubr.f32.gmra.mrb[14].mxu0 %v736_v47 }
  0x99   : > { %4542 = vmatprep.mubr.f32.mxu1 %v5904_v10  ;;  %4710 = vmatprep.mubr.f32.mxu0 %v5904_v10 }
  0x9c   : > { %4543 = vmatmul.mubr.f32.vlgmr.msra.gmra.mrb[0].mxu1 %v5908_v15  ;;  %4711 = vmatmul.mubr.f32.vlgmr.msra.gmra.mrb[0].mxu0 %v5908_v15 }
  0x9d   : > { %4977 = vmatpush3.bf16.msra.mxu1 %v5914_v26  ;;  %5001 = vmatpush3.bf16.msra.mxu0 %v5992_v11 }
  0x9e   : > { %4545 = vmatprep.mubr.f32.mxu1 %v5919_v28  ;;  %4713 = vmatprep.mubr.f32.mxu0 %v5919_v28 }
  0x9f   : > { %4979 = vmatprep.subr.bf16.mxu1 %v5824_v16  ;;  %5003 = vmatprep.subr.bf16.mxu0 %v5834_v23 }
  0xa0   : > { %4546 = vmatmul.mubr.f32.gmra.mrb[2].mxu1 %v5921_v29  ;;  %4714 = vmatmul.mubr.f32.gmra.mrb[2].mxu0 %v5921_v29 }
  0xa1   : > { %4548 = vmatprep.mubr.f32.mxu1 %v5927_v34  ;;  %4716 = vmatprep.mubr.f32.mxu0 %v5927_v34 }
  0xa4   : > { %4549 = vmatmul.mubr.f32.gmra.mrb[4].mxu1 %v5940_v38  ;;  %4717 = vmatmul.mubr.f32.gmra.mrb[4].mxu0 %v5940_v38 }
  0xa5   : > { %4551 = vmatprep.mubr.f32.mxu1 %v5948_v41  ;;  %4719 = vmatprep.mubr.f32.mxu0 %v5948_v41 }
  0xa8   : > { %4552 = vmatmul.mubr.f32.gmra.mrb[6].mxu1 %v5970_v50  ;;  %4720 = vmatmul.mubr.f32.gmra.mrb[6].mxu0 %v5970_v50 }
  0xa9   : > { %4554 = vmatprep.mubr.f32.mxu1 %v5999_v17  ;;  %4722 = vmatprep.mubr.f32.mxu0 %v5999_v17 }
  0xac   : > { %4555 = vmatmul.mubr.f32.gmra.mrb[8].mxu1 %v6011_v18  ;;  %4723 = vmatmul.mubr.f32.gmra.mrb[8].mxu0 %v6011_v18 }
  0xad   : > { %4557 = vmatprep.mubr.f32.mxu1 %v6013_v6  ;;  %4725 = vmatprep.mubr.f32.mxu0 %v6013_v6 }
  0xb0   : > { %4558 = vmatmul.mubr.f32.gmra.mrb[10].mxu1 %v6015_v42  ;;  %4726 = vmatmul.mubr.f32.gmra.mrb[10].mxu0 %v6015_v42 }
  0xb1   : > { %4560 = vmatprep.mubr.f32.mxu1 %v6027_v54  ;;  %4728 = vmatprep.mubr.f32.mxu0 %v6027_v54 }
  0xb4   : > { %4561 = vmatmul.mubr.f32.gmra.mrb[12].mxu1 %v6035_v61  ;;  %4729 = vmatmul.mubr.f32.gmra.mrb[12].mxu0 %v6035_v61 }
  0xb5   : > { %4563 = vmatprep.mubr.f32.mxu1 %v6046_v12  ;;  %4731 = vmatprep.mubr.f32.mxu0 %v6046_v12 }
  0xb8   : > { %4564 = vmatmul.mubr.f32.gmra.mrb[14].mxu1 %v6068_v43  ;;  %4732 = vmatmul.mubr.f32.gmra.mrb[14].mxu0 %v6068_v43 }
  0xb9   : > { %4570 = vmatprep.mubr.f32.mxu1 %v5917_v27  ;;  %4738 = vmatprep.mubr.f32.mxu0 %v5917_v27 }
  0xbc   : > { %4571 = vmatmul.mubr.f32.vlgmr.msra.gmra.mrb[0].mxu1 %v5925_v33  ;;  %4739 = vmatmul.mubr.f32.vlgmr.msra.gmra.mrb[0].mxu0 %v5925_v33 }
  0xbd   : > { %4981 = vmatpush3.bf16.msra.mxu1 %v5824_v16  ;;  %5005 = vmatpush3.bf16.msra.mxu0 %v5834_v23 }
  0xbe   : > { %4573 = vmatprep.mubr.f32.mxu1 %v5935_v36  ;;  %4741 = vmatprep.mubr.f32.mxu0 %v5935_v36 }
  0xbf   : > { %4983 = vmatprep.subr.bf16.mxu1 %v5896_v7  ;;  %5007 = vmatprep.subr.bf16.mxu0 %v5898_v8 }
  0xc0   : > { %4574 = vmatmul.mubr.f32.gmra.mrb[2].mxu1 %v5938_v37  ;;  %4742 = vmatmul.mubr.f32.gmra.mrb[2].mxu0 %v5938_v37 }
  0xc1   : > { %4576 = vmatprep.mubr.f32.mxu1 %v5946_v40  ;;  %4744 = vmatprep.mubr.f32.mxu0 %v5946_v40 }
  0xc4   : > { %4577 = vmatmul.mubr.f32.gmra.mrb[4].mxu1 %v5960_v46  ;;  %4745 = vmatmul.mubr.f32.gmra.mrb[4].mxu0 %v5960_v46 }
  0xc5   : > { %4579 = vmatprep.mubr.f32.mxu1 %v5968_v49  ;;  %4747 = vmatprep.mubr.f32.mxu0 %v5968_v49 }
  0xc8   : > { %4580 = vmatmul.mubr.f32.gmra.mrb[6].mxu1 %v5985_v59  ;;  %4748 = vmatmul.mubr.f32.gmra.mrb[6].mxu0 %v5985_v59 }
  0xc9   : > { %4582 = vmatprep.mubr.f32.mxu1 %v6009_v35  ;;  %4750 = vmatprep.mubr.f32.mxu0 %v6009_v35 }
  0xcc   : > { %4583 = vmatmul.mubr.f32.gmra.mrb[8].mxu1 %v6025_v53  ;;  %4751 = vmatmul.mubr.f32.gmra.mrb[8].mxu0 %v6025_v53 }
  0xcd   : > { %4585 = vmatprep.mubr.f32.mxu1 %v6030_v57  ;;  %4753 = vmatprep.mubr.f32.mxu0 %v6030_v57 }
  0xd0   : > { %4586 = vmatmul.mubr.f32.gmra.mrb[10].mxu1 %v6033_v60  ;;  %4754 = vmatmul.mubr.f32.gmra.mrb[10].mxu0 %v6033_v60 }
  0xd1   : > { %4588 = vmatprep.mubr.f32.mxu1 %v6044_v9  ;;  %4756 = vmatprep.mubr.f32.mxu0 %v6044_v9 }
  0xd4   : > { %4589 = vmatmul.mubr.f32.gmra.mrb[12].mxu1 %v6058_v30  ;;  %4757 = vmatmul.mubr.f32.gmra.mrb[12].mxu0 %v6058_v30 }
  0xd5   : > { %4591 = vmatprep.mubr.f32.mxu1 %v6066_v31  ;;  %4759 = vmatprep.mubr.f32.mxu0 %v6066_v31 }
  0xd8   : > { %4592 = vmatmul.mubr.f32.gmra.mrb[14].mxu1 %v6076_v51  ;;  %4760 = vmatmul.mubr.f32.gmra.mrb[14].mxu0 %v6076_v51 }
  0xd9   : > { %4598 = vmatprep.mubr.f32.mxu1 %v5932_v19  ;;  %4766 = vmatprep.mubr.f32.mxu0 %v5932_v19 }
  0xdc   : > { %4599 = vmatmul.mubr.f32.vlgmr.msra.gmra.mrb[0].mxu1 %v5943_v39  ;;  %4767 = vmatmul.mubr.f32.vlgmr.msra.gmra.mrb[0].mxu0 %v5943_v39 }
  0xdd   : > { %4985 = vmatpush3.bf16.msra.mxu1 %v5896_v7  ;;  %5009 = vmatpush3.bf16.msra.mxu0 %v5898_v8 }
  0xde   : > { %4601 = vmatprep.mubr.f32.mxu1 %v5954_v44  ;;  %4769 = vmatprep.mubr.f32.mxu0 %v5954_v44 }
  0xdf   : > { %4987 = vmatprep.subr.bf16.mxu1 %v5824_v16  ;;  %5011 = vmatprep.subr.bf16.mxu0 %v5834_v23 }
  0xe0   : > { %4602 = vmatmul.mubr.f32.gmra.mrb[2].mxu1 %v5957_v45  ;;  %4770 = vmatmul.mubr.f32.gmra.mrb[2].mxu0 %v5957_v45 }
  0xe1   : > { %4604 = vmatprep.mubr.f32.mxu1 %v5965_v48  ;;  %4772 = vmatprep.mubr.f32.mxu0 %v5965_v48 }
  0xe4   : > { %4605 = vmatmul.mubr.f32.gmra.mrb[4].mxu1 %v5977_v55  ;;  %4773 = vmatmul.mubr.f32.gmra.mrb[4].mxu0 %v5977_v55 }
  0xe5   : > { %4607 = vmatprep.mubr.f32.mxu1 %v5982_v58  ;;  %4775 = vmatprep.mubr.f32.mxu0 %v5982_v58 }
  0xe8   : > { %4608 = vmatmul.mubr.f32.gmra.mrb[6].mxu1 %v5997_v14  ;;  %4776 = vmatmul.mubr.f32.gmra.mrb[6].mxu0 %v5997_v14 }
  0xe9   : > { %4610 = vmatprep.mubr.f32.mxu1 %v6022_v52  ;;  %4778 = vmatprep.mubr.f32.mxu0 %v6022_v52 }
  0xec   : > { %4611 = vmatmul.mubr.f32.gmra.mrb[8].mxu1 %v6041_v5  ;;  %4779 = vmatmul.mubr.f32.gmra.mrb[8].mxu0 %v6041_v5 }
  0xed   : > { %4613 = vmatprep.mubr.f32.mxu1 %v6049_v20  ;;  %4781 = vmatprep.mubr.f32.mxu0 %v6049_v20 }
  0xf0   : > { %4614 = vmatmul.mubr.f32.gmra.mrb[10].mxu1 %v6055_v25  ;;  %4782 = vmatmul.mubr.f32.gmra.mrb[10].mxu0 %v6055_v25 }
  0xf1   : > { %4616 = vmatprep.mubr.f32.mxu1 %v6063_v62  ;;  %4784 = vmatprep.mubr.f32.mxu0 %v6063_v62 }
  0xf4   : > { %4617 = vmatmul.mubr.f32.gmra.mrb[12].mxu1 %v6073_v4  ;;  %4785 = vmatmul.mubr.f32.gmra.mrb[12].mxu0 %v6073_v4 }
  0xf5   : > { %4619 = vmatprep.mubr.f32.mxu1 %v6081_v2  ;;  %4787 = vmatprep.mubr.f32.mxu0 %v6081_v2 }
  0xf8   : > { %4620 = vmatmul.mubr.f32.gmra.mrb[14].mxu1 %v6086_v1  ;;  %4788 = vmatmul.mubr.f32.gmra.mrb[14].mxu0 %v6086_v1 }
  0xf9   : > { %4626 = vmatprep.mubr.f32.mxu1 %v5904_v10  ;;  %4794 = vmatprep.mubr.f32.mxu0 %v5904_v10 }
  0xfc   : > { %4627 = vmatmul.mubr.f32.vlgmr.msra.gmra.mrb[0].mxu1 %v5908_v15  ;;  %4795 = vmatmul.mubr.f32.vlgmr.msra.gmra.mrb[0].mxu0 %v5908_v15 }
  0xfd   : > { %4989 = vmatpush3.bf16.msra.mxu1 %v5824_v16  ;;  %5013 = vmatpush3.bf16.msra.mxu0 %v5834_v23 }
  0xfe   : > { %4629 = vmatprep.mubr.f32.mxu1 %v5919_v28  ;;  %4797 = vmatprep.mubr.f32.mxu0 %v5919_v28 }
 0x100   : > { %4630 = vmatmul.mubr.f32.gmra.mrb[2].mxu1 %v5921_v29  ;;  %4798 = vmatmul.mubr.f32.gmra.mrb[2].mxu0 %v5921_v29 }
 0x101   : > { %4632 = vmatprep.mubr.f32.mxu1 %v5927_v34  ;;  %4800 = vmatprep.mubr.f32.mxu0 %v5927_v34 }
 0x104   : > { %4633 = vmatmul.mubr.f32.gmra.mrb[4].mxu1 %v5940_v38  ;;  %4801 = vmatmul.mubr.f32.gmra.mrb[4].mxu0 %v5940_v38 }
 0x105   : > { %4635 = vmatprep.mubr.f32.mxu1 %v5948_v41  ;;  %4803 = vmatprep.mubr.f32.mxu0 %v5948_v41 }
 0x108   : > { %4636 = vmatmul.mubr.f32.gmra.mrb[6].mxu1 %v5970_v50  ;;  %4804 = vmatmul.mubr.f32.gmra.mrb[6].mxu0 %v5970_v50 }
 0x109   : > { %4638 = vmatprep.mubr.f32.mxu1 %v5999_v17  ;;  %4806 = vmatprep.mubr.f32.mxu0 %v5999_v17 }
 0x10c   : > { %4639 = vmatmul.mubr.f32.gmra.mrb[8].mxu1 %v6011_v18  ;;  %4807 = vmatmul.mubr.f32.gmra.mrb[8].mxu0 %v6011_v18 }
 0x10d   : > { %4641 = vmatprep.mubr.f32.mxu1 %v6013_v6  ;;  %4809 = vmatprep.mubr.f32.mxu0 %v6013_v6 }
 0x110   : > { %4642 = vmatmul.mubr.f32.gmra.mrb[10].mxu1 %v6015_v42  ;;  %4810 = vmatmul.mubr.f32.gmra.mrb[10].mxu0 %v6015_v42 }
 0x111   : > { %4644 = vmatprep.mubr.f32.mxu1 %v6027_v54  ;;  %4812 = vmatprep.mubr.f32.mxu0 %v6027_v54 }
 0x114   : > { %4645 = vmatmul.mubr.f32.gmra.mrb[12].mxu1 %v6035_v61  ;;  %4813 = vmatmul.mubr.f32.gmra.mrb[12].mxu0 %v6035_v61 }
 0x115   : > { %4647 = vmatprep.mubr.f32.mxu1 %v6046_v12  ;;  %4815 = vmatprep.mubr.f32.mxu0 %v6046_v12 }
 0x118   : > { %4648 = vmatmul.mubr.f32.gmra.mrb[14].mxu1 %v6068_v43  ;;  %4816 = vmatmul.mubr.f32.gmra.mrb[14].mxu0 %v6068_v43 }
 0x119   : > { %4654 = vmatprep.mubr.f32.mxu1 %v5904_v10  ;;  %4822 = vmatprep.mubr.f32.mxu0 %v5904_v10 }
 0x11c   : > { %4655 = vmatmul.mubr.f32.vlgmr.msra.gmra.mrb[0].mxu1 %v5908_v15  ;;  %4823 = vmatmul.mubr.f32.vlgmr.msra.gmra.mrb[0].mxu0 %v5908_v15 }
 0x11d   : > { %4657 = vmatprep.mubr.f32.mxu1 %v5919_v28  ;;  %4825 = vmatprep.mubr.f32.mxu0 %v5919_v28 }
 0x120   : > { %4658 = vmatmul.mubr.f32.gmra.mrb[2].mxu1 %v5921_v29  ;;  %4826 = vmatmul.mubr.f32.gmra.mrb[2].mxu0 %v5921_v29 }
 0x121   : > { %4660 = vmatprep.mubr.f32.mxu1 %v5927_v34  ;;  %4828 = vmatprep.mubr.f32.mxu0 %v5927_v34 }
 0x124   : > { %4661 = vmatmul.mubr.f32.gmra.mrb[4].mxu1 %v5940_v38  ;;  %4829 = vmatmul.mubr.f32.gmra.mrb[4].mxu0 %v5940_v38 }
 0x125   : > { %4663 = vmatprep.mubr.f32.mxu1 %v5948_v41  ;;  %4831 = vmatprep.mubr.f32.mxu0 %v5948_v41 }
 0x128   : > { %4664 = vmatmul.mubr.f32.gmra.mrb[6].mxu1 %v5970_v50  ;;  %4832 = vmatmul.mubr.f32.gmra.mrb[6].mxu0 %v5970_v50 }
 0x129   : > { %4666 = vmatprep.mubr.f32.mxu1 %v5999_v17  ;;  %4834 = vmatprep.mubr.f32.mxu0 %v5999_v17 }
 0x12c   : > { %4667 = vmatmul.mubr.f32.gmra.mrb[8].mxu1 %v6011_v18  ;;  %4835 = vmatmul.mubr.f32.gmra.mrb[8].mxu0 %v6011_v18 }
 0x12d   : > { %4669 = vmatprep.mubr.f32.mxu1 %v6013_v6  ;;  %4837 = vmatprep.mubr.f32.mxu0 %v6013_v6 }
 0x130   : > { %4670 = vmatmul.mubr.f32.gmra.mrb[10].mxu1 %v6015_v42  ;;  %4838 = vmatmul.mubr.f32.gmra.mrb[10].mxu0 %v6015_v42 }
 0x131   : > { %4672 = vmatprep.mubr.f32.mxu1 %v6027_v54  ;;  %4840 = vmatprep.mubr.f32.mxu0 %v6027_v54 }
 0x134   : > { %4673 = vmatmul.mubr.f32.gmra.mrb[12].mxu1 %v6035_v61  ;;  %4841 = vmatmul.mubr.f32.gmra.mrb[12].mxu0 %v6035_v61 }
 0x135   : > { %4675 = vmatprep.mubr.f32.mxu1 %v6046_v12  ;;  %4843 = vmatprep.mubr.f32.mxu0 %v6046_v12 }
 0x138   : > { %4676 = vmatmul.mubr.f32.gmra.mrb[14].mxu1 %v6068_v43  ;;  %4844 = vmatmul.mubr.f32.gmra.mrb[14].mxu0 %v6068_v43 }
 0x1ef   : > { %v4656_v0 = vpop.f32.mrb[0].mxu1  ;;  %v4824_v1 = vpop.f32.mrb[0].mxu0 }
 0x1f0   : > { %v1525_v2 = vpop.f32.mrb[1].mxu1  ;;  %v2631_v3 = vpop.f32.mrb[1].mxu0 }
 0x1f3   : > { %v4659_v16 = vpop.f32.mrb[2].mxu1  ;;  %v4827_v23 = vpop.f32.mrb[2].mxu0 }
 0x1f4   : > { %v1537_v7 = vpop.f32.mrb[3].mxu1  ;;  %v2643_v8 = vpop.f32.mrb[3].mxu0 }
 0x1f7   : > { %v4662_v10 = vpop.f32.mrb[4].mxu1  ;;  %v4830_v15 = vpop.f32.mrb[4].mxu0 }
 0x1f8   : > { %v1549_v26 = vpop.f32.mrb[5].mxu1  ;;  %v2655_v27 = vpop.f32.mrb[5].mxu0 }
 0x1fb   : > { %v4665_v28 = vpop.f32.mrb[6].mxu1  ;;  %v4833_v29 = vpop.f32.mrb[6].mxu0 }
 0x1fc   : > { %v1561_v33 = vpop.f32.mrb[7].mxu1  ;;  %v2667_v34 = vpop.f32.mrb[7].mxu0 }
 0x1ff   : > { %v4668_v19 = vpop.f32.mrb[8].mxu1  ;;  %v4836_v36 = vpop.f32.mrb[8].mxu0 }
 0x200   : > { %v5062_v37 = vadd.f32 %v4824_v1, %v4668_v19  ;;  %v2726_v38 = vsub.f32 %v4656_v0, %v4836_v36  ;;  %v1573_v39 = vpop.f32.mrb[9].mxu1  ;;  %v2679_v40 = vpop.f32.mrb[9].mxu0 }
 0x201   : > { %v5063_v41 = vadd.f32 %v2631_v3, %v1573_v39  ;;  %v2725_v44 = vsub.f32 %v1525_v2, %v2679_v40 }
 0x202   : > { %2750 = vst.msk [vmem:[#allocation2 + $0x48] sm:$0xff] %vm416_vm0, %v5062_v37  ;;  %2734 = vst.msk [vmem:[#allocation2 + $0x8] sm:$0xff] %vm416_vm0, %v2726_v38 }
 0x203   : > { %2749 = vst.msk [vmem:[#allocation2 + $0x40] sm:$0xff] %vm416_vm0, %v5063_v41  ;;  %2733 = vst.msk [vmem:[#allocation2] sm:$0xff] %vm416_vm0, %v2725_v44  ;;  %v4671_v45 = vpop.f32.mrb[10].mxu1  ;;  %v4839_v46 = vpop.f32.mrb[10].mxu0 }
 0x204   : > { %v5064_v48 = vadd.f32 %v4827_v23, %v4671_v45  ;;  %v2728_v49 = vsub.f32 %v4659_v16, %v4839_v46  ;;  %v1585_v50 = vpop.f32.mrb[11].mxu1  ;;  %v2691_v55 = vpop.f32.mrb[11].mxu0 }
 0x205   : > { %v5065_v58 = vadd.f32 %v2643_v8, %v1585_v50  ;;  %v2727_v59 = vsub.f32 %v1537_v7, %v2691_v55 }
 0x206   : > { %2752 = vst.msk [vmem:[#allocation2 + $0x58] sm:$0xff] %vm416_vm0, %v5064_v48  ;;  %2736 = vst.msk [vmem:[#allocation2 + $0x18] sm:$0xff] %vm416_vm0, %v2728_v49 }
 0x207   : > { %2751 = vst.msk [vmem:[#allocation2 + $0x50] sm:$0xff] %vm416_vm0, %v5065_v58  ;;  %2735 = vst.msk [vmem:[#allocation2 + $0x10] sm:$0xff] %vm416_vm0, %v2727_v59  ;;  %v4674_v11 = vpop.f32.mrb[12].mxu1  ;;  %v4842_v14 = vpop.f32.mrb[12].mxu0 }
 0x208   : > { %v5066_v17 = vadd.f32 %v4830_v15, %v4674_v11  ;;  %v2730_v35 = vsub.f32 %v4662_v10, %v4842_v14  ;;  %v1597_v18 = vpop.f32.mrb[13].mxu1  ;;  %v2703_v6 = vpop.f32.mrb[13].mxu0 }
 0x209   : > { %v5067_v42 = vadd.f32 %v2655_v27, %v1597_v18  ;;  %v2729_v52 = vsub.f32 %v1549_v26, %v2703_v6 }
 0x20a   : > { %2754 = vst.msk [vmem:[#allocation2 + $0x68] sm:$0xff] %vm416_vm0, %v5066_v17  ;;  %2738 = vst.msk [vmem:[#allocation2 + $0x28] sm:$0xff] %vm416_vm0, %v2730_v35 }
 0x20b   : > { %2753 = vst.msk [vmem:[#allocation2 + $0x60] sm:$0xff] %vm416_vm0, %v5067_v42  ;;  %2737 = vst.msk [vmem:[#allocation2 + $0x20] sm:$0xff] %vm416_vm0, %v2729_v52  ;;  %v4677_v53 = vpop.f32.mrb[14].mxu1  ;;  %v4845_v54 = vpop.f32.mrb[14].mxu0 }
 0x20c   : > { %v5068_v57 = vadd.f32 %v4833_v29, %v4677_v53  ;;  %v2732_v60 = vsub.f32 %v4665_v28, %v4845_v54  ;;  %v1609_v61 = vpop.f32.mrb[15].mxu1  ;;  %v2715_v5 = vpop.f32.mrb[15].mxu0 }
 0x20d   : > { %v5069_v9 = vadd.f32 %v2667_v34, %v1609_v61  ;;  %v2731_v12 = vsub.f32 %v1561_v33, %v2715_v5 }
 0x20e   : > { %2756 = vst.msk [vmem:[#allocation2 + $0x78] sm:$0xff] %vm416_vm0, %v5068_v57  ;;  %2740 = vst.msk [vmem:[#allocation2 + $0x38] sm:$0xff] %vm416_vm0, %v2732_v60 }
 0x20f   : > { %2755 = vst.msk [vmem:[#allocation2 + $0x70] sm:$0xff] %vm416_vm0, %v5069_v9  ;;  %2739 = vst.msk [vmem:[#allocation2 + $0x30] sm:$0xff] %vm416_vm0, %v2731_v12 }
 0x210 LB: >> { %v6543_v20 = vld [vmem:[#allocation17_spill] sm:$0xff]  ;;  %v6544_v30 = vld [vmem:[#allocation18_spill] sm:$0xff]  ;;  %v6545_v31 = vld [vmem:[#allocation19_spill] sm:$0xff]  ;;  %s6306_s8 = sshll.u32 %s5542_s0, 4  ;;  %s2766_s0 = sadd.s32 1, %s5542_s0   ;;  %s5542_s0 = sphi %s6284_s0, %s2766_s0  }
 0x211   : >> { %v2776_v25 = vsel %vm416_vm0, %v6543_v20, 0  ;;  %v2779_v62 = vsel %vm416_vm0, %v6544_v30, 0  ;;  %v2782_v43 = vsel %vm416_vm0, %v6545_v31, 0  ;;  %v6546_v4 = vld [vmem:[#allocation20_spill] sm:$0xff]  ;;  %s2769_s15 = scalar_lea.vmem [#allocation2], %s6306_s8  ;;  %s3970_s11 = scalar_lea.vmem %s388_s17, %s6306_s8 [#allocation9] }
 0x212   : >> { %v2785_v51 = vsel %vm416_vm0, %v6546_v4, 0  ;;  %v6297_v63 = vand.u32 4294901760, %v2776_v25  ;;  %v6299_v13 = vand.u32 4294901760, %v2779_v62  ;;  %v6301_v24 = vand.u32 4294901760, %v2782_v43  ;;  %s3965_s21 = scalar_lea.vmem %s381_s20, %s6306_s8 [#allocation8]  ;;  %p2763_p3 = scmp.ge.s32.totalorder %s2766_s0, 4  }
 0x213   : >> { %v6303_v21 = vand.u32 4294901760, %v2785_v51  ;;  %s4220_s18 = sshll.u32 (%p2763_p3), %s5530_s27, 10  ;;  %s3995_s12 = sshll.u32 (%p2763_p3), %s381_s20, 4  ;;  %s6420_s12 = int_to_ptr.vmem [resolvable:$true] %s3995_s12 }
 0x214   : >> { %v6309_v22 = vsub.f32 %v2776_v25, %v6297_v63  ;;  %v6312_v32 = vsub.f32 %v2779_v62, %v6299_v13  ;;  %v6315_v56 = vsub.f32 %v2782_v43, %v6301_v24  ;;  %s6416_s10 = scalar_lea.hbm (%p2763_p3), %s6516_s6, %s4220_s18  ;;  %s3974_s30 = scalar_lea.sflag (%p2763_p3), [#allocation5], %s5760_s19 }
 0x215   : >> { %v6318_v47 = vsub.f32 %v2785_v51, %v6303_v21  ;;  %s5416_s13 = scalar_lea.vmem (%p2763_p3), %s6420_s12, 1024  ;;  %p6547_p13 = scmp.ne.s32.totalorder (%p2763_p3), %s6528_s14, 0 }
 0x216   : >> { %v2770_v0 = vld [vmem:[%s2769_s15] sm:$0xff]  ;;  %v2771_v1 = vld [vmem:[%s2769_s15 + $0x8] sm:$0xff]  ;;  %v6322_v8 = vand.u32 4294901760, %v6309_v22  ;;  %v6325_v15 = vand.u32 4294901760, %v6312_v32  ;;  %v6328_v26 = vand.u32 4294901760, %v6315_v56  ;;  %p5417_p12 = scmp.ne.s32.totalorder (%p2763_p3), %s6420_s12, %s5416_s13  ;;  %s5548_s0 = smov (%p2763_p3), [#allocation8]  }
 0x217   : >> { %v4207_v2 = vld [vmem:[%s2769_s15 + $0x40] sm:$0xff]  ;;  %v2788_v3 = vand.u32 4294901760, %v2770_v0  ;;  %v2791_v16 = vand.u32 4294901760, %v2771_v1  ;;  %v4208_v23 = vld [vmem:[%s2769_s15 + $0x48] sm:$0xff]  ;;  %v6331_v27 = vand.u32 4294901760, %v6318_v47  ;;  %s5420_s8 = sshll.u32 (%p2763_p3), %s5548_s0, 4  ;;  %s5421_s8 = int_to_ptr.vmem [resolvable:$false] %s5420_s8 }
 0x218   : >> { %v3376_v7 = vand.u32 4294901760, %v4207_v2  ;;  %v3379_v10 = vand.u32 4294901760, %v4208_v23  ;;  %v2857_v29 = vsub.f32 %v6309_v22, %v6322_v8  ;;  %v2867_v36 = vsub.f32 %v6312_v32, %v6325_v15  ;;  %p5418_p7 = pnand (%p2763_p3), %p5417_p12, %p6547_p13  ;;  %s5422_s15 = scalar_lea.vmem (%p2763_p3), %s5421_s8, 2048 }
 0x219   : >> { %v6333_v28 = vpack.c.bf16 %v2791_v16, %v2788_v3  ;;  %v2896_v33 = vsub.f32 %v2770_v0, %v2788_v3  ;;  %v2903_v34 = vsub.f32 %v2771_v1, %v2791_v16  ;;  %v2877_v37 = vsub.f32 %v6315_v56, %v6328_v26  ;;  %p5423_p9 = scmp.lt.s32.totalorder (%p2763_p3), %s6420_s12, %s5421_s8  ;;  %p5424_p11 = scmp.lt.s32.totalorder (%p2763_p3), %s5422_s15, %s5416_s13 }
 0x21a   : >> { %v6337_v19 = vpack.c.bf16 %v3379_v10, %v3376_v7  ;;  %v2887_v38 = vsub.f32 %v6318_v47, %v6331_v27  ;;  %v2858_v39 = vand.u32 4294901760, %v2857_v29  ;;  %v3484_v44 = vsub.f32 %v4207_v2, %v3376_v7  ;;  %p5419_p10 = pneg (%p2763_p3), %p5418_p7 }
 0x21b   : >> { %5015 = vmatprep.subr.bf16.mxu1 %v6333_v28  ;;  %v2897_v40 = vand.u32 4294901760, %v2896_v33  ;;  %v2904_v41 = vand.u32 4294901760, %v2903_v34  ;;  %v2868_v45 = vand.u32 4294901760, %v2867_v36  ;;  %v2878_v46 = vand.u32 4294901760, %v2877_v37  ;;  %p5425_p1 = por (%p2763_p3), %p5424_p11, %p5423_p9 }
 0x21c   : >> { %5039 = vmatprep.subr.bf16.mxu0 %v6337_v19  ;;  %5017 = vmatpush3.bf16.msra.mxu1 %v6333_v28  ;;  %v3491_v48 = vsub.f32 %v4208_v23, %v3379_v10  ;;  %v3485_v55 = vand.u32 4294901760, %v3484_v44  ;;  %v2888_v59 = vand.u32 4294901760, %v2887_v38  ;;  %v5022_v52 = vpack.c.bf16 %v2903_v34, %v2896_v33 }
 0x21d   : >> { %5041 = vmatpush3.bf16.msra.mxu0 %v6337_v19  ;;  %4850 = vmatprep.mubr.f32.mxu1 %v2858_v39  ;;  %v2898_v49 = vsub.f32 %v2896_v33, %v2897_v40  ;;  %v2905_v50 = vsub.f32 %v2903_v34, %v2904_v41  ;;  %v5030_v57 = vpack.c.bf16 %v2904_v41, %v2897_v40  ;;  %p5426_p6 = pnand (%p2763_p3), %p5425_p1, %p5419_p10 }
 0x21e   : >> { %4910 = vmatprep.mubr.f32.mxu0 %v2858_v39  ;;  %v3492_v58 = vand.u32 4294901760, %v3491_v48  ;;  %v3486_v17 = vsub.f32 %v3484_v44, %v3485_v55  ;;  %v5046_v54 = vpack.c.bf16 %v3491_v48, %v3484_v44 }
 0x21f   : >> { %4851 = vmatmul.mubr.f32.vlgmr.msra.gmra.mrb[0].mxu1 %v2868_v45  ;;  %v2899_v11 = vand.u32 4294901760, %v2898_v49  ;;  %v2906_v14 = vand.u32 4294901760, %v2905_v50 }
 0x220   : >> { %4911 = vmatmul.mubr.f32.vlgmr.msra.gmra.mrb[0].mxu0 %v2868_v45  ;;  %4853 = vmatprep.mubr.f32.mxu1 %v2878_v46  ;;  %v3493_v35 = vsub.f32 %v3491_v48, %v3492_v58  ;;  %v3487_v6 = vand.u32 4294901760, %v3486_v17  ;;  %v5054_v60 = vpack.c.bf16 %v3492_v58, %v3485_v55 }
 0x221   : >> { %4913 = vmatprep.mubr.f32.mxu0 %v2878_v46  ;;  %v5018_v18 = vpack.c.bf16 %v2906_v14, %v2899_v11 }
 0x222   : >> { %v3494_v42 = vand.u32 4294901760, %v3493_v35 }
 0x223   : >> { %4854 = vmatmul.mubr.f32.gmra.mrb[2].mxu1 %v2888_v59  ;;  %5019 = vmatprep.subr.bf16.mxu1 %v5018_v18 }
 0x224   : >> { %4914 = vmatmul.mubr.f32.gmra.mrb[2].mxu0 %v2888_v59  ;;  %v5042_v53 = vpack.c.bf16 %v3494_v42, %v3487_v6  ;;  %5021 = vmatpush3.bf16.msra.mxu1 %v5018_v18 }
 0x225   : >> { %4860 = vmatprep.mubr.f32.mxu1 %v6297_v63  ;;  %4920 = vmatprep.mubr.f32.mxu0 %v6297_v63 }
 0x226   : >> { %5043 = vmatprep.subr.bf16.mxu0 %v5042_v53  ;;  %5023 = vmatprep.subr.bf16.mxu1 %v5022_v52 }
 0x227   : >> { %5045 = vmatpush3.bf16.msra.mxu0 %v5042_v53  ;;  %4861 = vmatmul.mubr.f32.vlgmr.msra.gmra.mrb[0].mxu1 %v6299_v13 }
 0x228   : >> { %4863 = vmatprep.mubr.f32.mxu1 %v6301_v24  ;;  %5047 = vmatprep.subr.bf16.mxu0 %v5046_v54 }
 0x229   : >> { %5025 = vmatpush3.bf16.msra.mxu1 %v5022_v52 }
 0x22a   : >> { %4921 = vmatmul.mubr.f32.vlgmr.msra.gmra.mrb[0].mxu0 %v6299_v13  ;;  %5027 = vmatprep.subr.bf16.mxu1 %v6333_v28 }
 0x22b   : >> { %4923 = vmatprep.mubr.f32.mxu0 %v6301_v24  ;;  %4864 = vmatmul.mubr.f32.gmra.mrb[2].mxu1 %v6303_v21 }
 0x22c   : >> { %5049 = vmatpush3.bf16.msra.mxu0 %v5046_v54  ;;  %4870 = vmatprep.mubr.f32.mxu1 %v6309_v22 }
 0x22d   : >> { %5051 = vmatprep.subr.bf16.mxu0 %v6337_v19 }
 0x22e   : >> { %4924 = vmatmul.mubr.f32.gmra.mrb[2].mxu0 %v6303_v21 }
 0x22f   : >> { %4930 = vmatprep.mubr.f32.mxu0 %v6309_v22  ;;  %4871 = vmatmul.mubr.f32.vlgmr.msra.gmra.mrb[0].mxu1 %v6312_v32 }
 0x230   : >> { %4873 = vmatprep.mubr.f32.mxu1 %v6315_v56  ;;  %5029 = vmatpush3.bf16.msra.mxu1 %v6333_v28 }
 0x231   : >> { %5031 = vmatprep.subr.bf16.mxu1 %v5030_v57 }
 0x232   : >> { %4931 = vmatmul.mubr.f32.vlgmr.msra.gmra.mrb[0].mxu0 %v6312_v32 }
 0x233   : >> { %4933 = vmatprep.mubr.f32.mxu0 %v6315_v56  ;;  %4874 = vmatmul.mubr.f32.gmra.mrb[2].mxu1 %v6318_v47 }
 0x234   : >> { %5053 = vmatpush3.bf16.msra.mxu0 %v6337_v19  ;;  %4880 = vmatprep.mubr.f32.mxu1 %v6322_v8 }
 0x235   : >> { %5055 = vmatprep.subr.bf16.mxu0 %v5054_v60 }
 0x236   : >> { %4934 = vmatmul.mubr.f32.gmra.mrb[2].mxu0 %v6318_v47 }
 0x237   : >> { %4940 = vmatprep.mubr.f32.mxu0 %v6322_v8  ;;  %4881 = vmatmul.mubr.f32.vlgmr.msra.gmra.mrb[0].mxu1 %v6325_v15 }
 0x238   : >> { %4883 = vmatprep.mubr.f32.mxu1 %v6328_v26  ;;  %5033 = vmatpush3.bf16.msra.mxu1 %v5030_v57 }
 0x239   : >> { %5035 = vmatprep.subr.bf16.mxu1 %v6333_v28 }
 0x23a   : >> { %4941 = vmatmul.mubr.f32.vlgmr.msra.gmra.mrb[0].mxu0 %v6325_v15 }
 0x23b   : >> { %4943 = vmatprep.mubr.f32.mxu0 %v6328_v26  ;;  %4884 = vmatmul.mubr.f32.gmra.mrb[2].mxu1 %v6331_v27 }
 0x23c   : >> { %5057 = vmatpush3.bf16.msra.mxu0 %v5054_v60  ;;  %4890 = vmatprep.mubr.f32.mxu1 %v6297_v63 }
 0x23d   : >> { %5059 = vmatprep.subr.bf16.mxu0 %v6337_v19 }
 0x23e   : >> { %4944 = vmatmul.mubr.f32.gmra.mrb[2].mxu0 %v6331_v27 }
 0x23f   : >> { %4950 = vmatprep.mubr.f32.mxu0 %v6297_v63  ;;  %4891 = vmatmul.mubr.f32.vlgmr.msra.gmra.mrb[0].mxu1 %v6299_v13 }
 0x240   : >> { %4893 = vmatprep.mubr.f32.mxu1 %v6301_v24  ;;  %5037 = vmatpush3.bf16.msra.mxu1 %v6333_v28 }
 0x242   : >> { %4951 = vmatmul.mubr.f32.vlgmr.msra.gmra.mrb[0].mxu0 %v6299_v13 }
 0x243   : >> { %4953 = vmatprep.mubr.f32.mxu0 %v6301_v24  ;;  %4894 = vmatmul.mubr.f32.gmra.mrb[2].mxu1 %v6303_v21 }
 0x244   : >> { %5061 = vmatpush3.bf16.msra.mxu0 %v6337_v19  ;;  %4900 = vmatprep.mubr.f32.mxu1 %v6297_v63 }
 0x246   : >> { %4954 = vmatmul.mubr.f32.gmra.mrb[2].mxu0 %v6303_v21 }
 0x247   : >> { %4960 = vmatprep.mubr.f32.mxu0 %v6297_v63  ;;  %4901 = vmatmul.mubr.f32.vlgmr.msra.gmra.mrb[0].mxu1 %v6299_v13 }
 0x248   : >> { %4903 = vmatprep.mubr.f32.mxu1 %v6301_v24 }
 0x24a   : >> { %4961 = vmatmul.mubr.f32.vlgmr.msra.gmra.mrb[0].mxu0 %v6299_v13 }
 0x24b   : >> { %4963 = vmatprep.mubr.f32.mxu0 %v6301_v24  ;;  %4904 = vmatmul.mubr.f32.gmra.mrb[2].mxu1 %v6303_v21 }
 0x24e   : >> { %4964 = vmatmul.mubr.f32.gmra.mrb[2].mxu0 %v6303_v21 }
 0x31a   : >> { %v4902_v61 = vpop.f32.mrb[0].mxu1 }
 0x31b   : >> { %v3353_v5 = vpop.f32.mrb[1].mxu1 }
 0x31d   : >> { %v4962_v9 = vpop.f32.mrb[0].mxu0 }
 0x31e   : >> { %v3941_v12 = vpop.f32.mrb[1].mxu0  ;;  %v4905_v20 = vpop.f32.mrb[2].mxu1 }
 0x31f   : >> { %v5230_v25 = vadd.f32 %v4962_v9, %v4905_v20  ;;  %v3365_v30 = vpop.f32.mrb[3].mxu1  ;;  %2765 = sbr.rel (!%p2763_p3) target bundleno = 528 (0x210), region = 133 }
 0x320   : >> { %v5231_v62 = vadd.f32 %v3941_v12, %v3365_v30 }
 0x321   : >> { %3972 = vst.msk [vmem:[%s3970_s11 + $0x8] sm:$0xff] %vm416_vm0, %v5230_v25  ;;  %v4965_v31 = vpop.f32.mrb[2].mxu0 }
 0x322   : >> { %v3964_v43 = vsub.f32 %v4902_v61, %v4965_v31  ;;  %3971 = vst.msk [vmem:[%s3970_s11] sm:$0xff] %vm416_vm0, %v5231_v62  ;;  %v3953_v4 = vpop.f32.mrb[3].mxu0 }
 0x323   : >> { %v3963_v51 = vsub.f32 %v3353_v5, %v3953_v4 }
 0x324   : >> { %3967 = vst.msk [vmem:[%s3965_s21 + $0x8] sm:$0xff] %vm416_vm0, %v3964_v43 }
 0x325   : >> { %3966 = vst.msk [vmem:[%s3965_s21] sm:$0xff] %vm416_vm0, %v3963_v51 }
 0x326   : > { %5429 = shalt.err (!%p5426_p6)
}
 0x327   : > { %s5430_s20 = scalar_lea.hbm %s6416_s10, 1024  ;;  %s5434_s22 = scalar_lea.hbm %s6516_s6, 2048 }
 0x328   : > { %p5431_p2 = scmp.ne.s32.totalorder %s6416_s10, %s5430_s20  ;;  %p5435_p8 = scmp.lt.u32.totalorder %s6416_s10, %s6516_s6 }
 0x329   : > { %p5436_p0 = scmp.lt.u32.totalorder %s5434_s22, %s5430_s20  ;;  %p5438_p12 = scmp.lt.u32.totalorder %s5430_s20, %s6416_s10 }
 0x32a   : > { %p5432_p5 = pnand %p5431_p2, %p6547_p13 }
 0x32b   : > { %p5437_p3 = por %p5436_p0, %p5435_p8 }
 0x32c   : > { %p5433_p4 = pneg %p5432_p5 }
 0x32d   : > { %p5439_p7 = por %p5438_p12, %p5437_p3 }
 0x32f   : > { %p5440_p10 = pnand %p5439_p7, %p5433_p4 }
 0x331   : > { %5443 = shalt.err (!%p5440_p10)
}
 0x332   : > { %s5549_s13 = smov 128   ;;  %s5550_s8 = smov 8  }
 0x333   : > { %5276 = dma.vmem_to_hbm [thread:$0]  (%p6547_p13), %s6420_s12, 1024, %s6416_s10, %s3974_s30, %s5549_s13, %s5549_s13, %s5550_s8  }
 0x334   : > { %s6454_s11 = scalar_lea.hbm %s6517_s7, %s4220_s18  ;;  %s4014_s21 = sshll.u32 %s388_s17, 4  ;;  %s6458_s21 = int_to_ptr.vmem [resolvable:$true] %s4014_s21 }
 0x335   : > { %s3979_s22 = scalar_lea.sflag [#allocation10], %s5760_s19  ;;  %s5444_s9 = scalar_lea.vmem %s6458_s21, 1024 }
 0x336   : > { %p5445_p9 = scmp.ne.s32.totalorder %s6458_s21, %s5444_s9  ;;  %s5551_s10 = smov [#allocation9]  }
 0x337   : > { %s5448_s27 = sshll.u32 %s5551_s10, 4  ;;  %s5449_s27 = int_to_ptr.vmem [resolvable:$false] %s5448_s27 }
 0x338   : > { %p5446_p11 = pnand %p5445_p9, %p6547_p13  ;;  %s5450_s12 = scalar_lea.vmem %s5449_s27, 2048 }
 0x339   : > { %p5451_p6 = scmp.lt.s32.totalorder %s6458_s21, %s5449_s27  ;;  %p5452_p2 = scmp.lt.s32.totalorder %s5450_s12, %s5444_s9 }
 0x33a   : > { %p5447_p1 = pneg %p5446_p11 }
 0x33b   : > { %p5453_p5 = por %p5452_p2, %p5451_p6 }
 0x33d   : > { %p5454_p4 = pnand %p5453_p5, %p5447_p1 }
 0x33f   : > { %5457 = shalt.err (!%p5454_p4)
}
 0x340   : > { %s5458_s23 = scalar_lea.hbm %s6454_s11, 1024  ;;  %s5462_s30 = scalar_lea.hbm %s6517_s7, 2048 }
 0x341   : > { %p5459_p8 = scmp.ne.s32.totalorder %s6454_s11, %s5458_s23  ;;  %p5463_p12 = scmp.lt.u32.totalorder %s6454_s11, %s6517_s7 }
 0x342   : > { %p5464_p7 = scmp.lt.u32.totalorder %s5462_s30, %s5458_s23  ;;  %p5466_p9 = scmp.lt.u32.totalorder %s5458_s23, %s6454_s11 }
 0x343   : > { %p5460_p0 = pnand %p5459_p8, %p6547_p13 }
 0x344   : > { %p5465_p10 = por %p5464_p7, %p5463_p12 }
 0x345   : > { %p5461_p3 = pneg %p5460_p0 }
 0x346   : > { %p5467_p11 = por %p5466_p9, %p5465_p10 }
 0x348   : > { %p5468_p1 = pnand %p5467_p11, %p5461_p3 }
 0x34a   : > { %5471 = shalt.err (!%p5468_p1)
}
 0x34b   : > { %5277 = dma.vmem_to_hbm [thread:$0]  (%p6547_p13), %s6458_s21, 1024, %s6454_s11, %s3979_s22, %s5549_s13, %s5549_s13, %s5550_s8  }
 0x34c PF: > { %s4029_s20 = sand.u32 1, %s5518_s24   ;;  %p6548_p6 = scmp.ne.s32.totalorder %s6530_s16, 0 }
 0x34d   : > { %p6549_p2 = scmp.ge.s32.totalorder %s5538_s29, 2  ;;  %s4030_s9 = scalar_lea.sflag [#allocation5], %s4029_s20 }
 0x34f   : > { %p5288_p5 = pnand %p6549_p2, %p6548_p6 }
 0x351   : > { %5509 = dma.done.wait (!%p5288_p5), %s4030_s9, 1024  }
 0x352   : > { %5511 = vsyncadd (!%p5288_p5), %s4030_s9, 4294966272  ;;  %s4039_s14 = scalar_lea.sflag [#allocation10], %s4029_s20 }
 0x353   : > { %5513 = dma.done.wait (!%p5288_p5), %s4039_s14, 1024  }
 0x354   : > { %5515 = vsyncadd (!%p5288_p5), %s4039_s14, 4294966272  ;;  %s30_s29 = sadd.s32 1, %s5538_s29   ;;  %s6550_s19 = sld [smem:[#allocation16_spill]] }
 0x355   : > { %p27_p4 = scmp.ge.s32.totalorder %s30_s29, 4   ;;  %s6551_s13 = sld [smem:[#allocation15_spill]] }
 0x356   : > { %s6552_s24 = smov %s5522_s25  ;;  %s6553_s25 = smov %s5526_s26 }
 0x357   : > { %s6555_s27 = smov %s5534_s28  ;;  %29 = sbr.rel (!%p27_p4) target bundleno = 12 (0xc), region = 144 }
 0x35a   : > { %s6554_s26 = smov %s6550_s19 }
 0x35b   : > { %s6556_s28 = smov %s6551_s13 }
 0x35e   :  { %4044 = vsyncpa [#allocation4], 1 }
 0x35f   :  { %4046 = vsyncpa [#allocation4 + $0x1], 1 }
 0x360   :  { %4047 = vsyncpa [#allocation7], 1 }
 0x361   :  { %4049 = vsyncpa [#allocation7 + $0x1], 1 }
 0x362   :  { %4050 = vsyncpa [#allocation5], 1 }
 0x363   :  { %4052 = vsyncpa [#allocation5 + $0x1], 1 }
 0x364   :  { %4053 = vsyncpa [#allocation10], 1 }
 0x365   :  { %4055 = vsyncpa [#allocation10 + $0x1], 1 }

// kernel: tpu_custom_call.1
= control target key start
LH: loop header
LB: loop body
LE: loop exit
PB: predicated region body
PF: predicated region fallthrough
CT: control target
= control target key end

     0   :  { %s6510_s0 = inlined_call_operand.hbm [shape: f32[2,4,16,16], index: 0, kind: input, shape index: {}]   ;;  %s6511_s1 = inlined_call_operand.hbm [shape: f32[2,4,16,16], index: 1, kind: input, shape index: {}]   ;;  %s6512_s2 = inlined_call_operand.vmem [shape: f32[2,1,16,16], index: 2, kind: input, shape index: {}]   ;;  %s6513_s3 = inlined_call_operand.vmem [shape: f32[32,16], index: 3, kind: input, shape index: {}]   ;;  %s6514_s4 = inlined_call_operand.vmem [shape: f32[16,16], index: 4, kind: input, shape index: {}]   ;;  %s6515_s5 = inlined_call_operand.vmem [shape: f32[16,16], index: 5, kind: input, shape index: {}]   ;;  %s6516_s6 = inlined_call_operand.hbm [shape: f32[2,4,16,16], index: 6, kind: output, shape index: {0}]   ;;  %s6517_s7 = inlined_call_operand.hbm [shape: f32[2,4,16,16], index: 7, kind: output, shape index: {1}]  }
   0x1   :  { %6524 = sst [smem:[#allocation21_spill]] %s6510_s0 }
   0x2   :  { %13 = vsyncpa [#allocation4], 0 }
   0x3   :  { %15 = vsyncpa [#allocation4 + $0x1], 0 }
   0x4   :  { %16 = vsyncpa [#allocation7], 0 }
   0x5   :  { %18 = vsyncpa [#allocation7 + $0x1], 0 }
   0x6   :  { %19 = vsyncpa [#allocation5], 0 }
   0x7   :  { %21 = vsyncpa [#allocation5 + $0x1], 0 }
   0x8   :  { %22 = vsyncpa [#allocation10], 0 }
   0x9   :  { %24 = vsyncpa [#allocation10 + $0x1], 0  ;;  %s5592_s24 = smov 0   ;;  %s5594_s25 = smov 0  }
   0xa   :  { %s5596_s26 = smov 0   ;;  %s5598_s27 = smov 0  }
   0xb   :  { %s5600_s28 = smov 0   ;;  %s5602_s29 = smov 0  }
   0xc LB: > { %s4188_s30 = sadd.s32 4294967295, %s5538_s29   ;;  %s4189_s8 = sadd.s32 4294967294, %s5538_s29   ;;  %s5538_s29 = sphi %s5602_s29, %s30_s29   ;;  %s5534_s28 = sphi %s5600_s28, %s6556_s28   ;;  %s5530_s27 = sphi %s5598_s27, %s6555_s27   ;;  %s5526_s26 = sphi %s5596_s26, %s6554_s26   ;;  %s5522_s25 = sphi %s5594_s25, %s6553_s25   ;;  %s5518_s24 = sphi %s5592_s24, %s6552_s24  }
   0xd   : > { %s42_s9 = sadd.s32 1, %s5534_s28  ;;  %s51_s10 = sadd.s32 1, %s5526_s26 }
   0xe   : > { %p44_p0 = scmp.ge.s32.totalorder %s42_s9, 2  ;;  %p58_p1 = scmp.ne.s32.totalorder %s5526_s26, %s5522_s25 }
   0xf   : > { %p59_p2 = scmp.eq.s32.totalorder %s5538_s29, 0  ;;  %p64_p3 = scmp.ne.s32.totalorder %s5522_s25, %s5518_s24 }
  0x10   : > { %s6558_s9 = smov (%p44_p0, %s42_s9), 0  ;;  %p65_p5 = scmp.eq.s32.totalorder %s4188_s30, 0 }
  0x11   : > { %6525 = sst [smem:[#allocation15_spill]] %s6558_s9  ;;  %p5633_p4 = por %p59_p2, %p58_p1 }
  0x12   : > { %s46_s12 = ssub.s32 %s5534_s28, %s6558_s9  ;;  %p207_p6 = scmp.eq.s32.totalorder %s4188_s30, 1 }
  0x13   : > { %p49_p7 = scmp.eq.s32.totalorder %s46_s12, 0  ;;  %p5639_p8 = por %p65_p5, %p64_p3 }
  0x14   : > { %p5643_p9 = por %p207_p6, %p58_p1  ;;  %p213_p10 = scmp.eq.s32.totalorder %s4189_s8, 1 }
  0x15   : > { %s6527_s13 = scalar_select %p5639_p8, 1, 0 }
  0x16   : > { %s6528_s14 = scalar_select %p5643_p9, 1, 0 }
  0x17   : > { %s5648_s15 = scalar_select %p49_p7, %s5526_s26, %s51_s10  }
  0x18   : > { %p5650_p11 = por %p213_p10, %p64_p3  ;;  %p5294_p13 = scmp.lt.s32.totalorder %s5538_s29, 2 }
  0x19   : > { %6529 = sst [smem:[#allocation16_spill]] %s5648_s15  ;;  %s5657_s17 = sand.u32 1, %s5526_s26  }
  0x1a   : > { %s6530_s16 = scalar_select %p5650_p11, 1, 0 }
  0x1b   : > { %s6518_s18 = sshll.u32 %s5657_s17, 6  ;;  %s6519_s19 = sshll.u32 %s5534_s28, 10 }
  0x1c   : > { %s6531_s0 = sld [smem:[#allocation21_spill]]  ;;  %s274_s23 = scalar_lea.vmem [#allocation3], %s6518_s18 }
  0x1d   : > { %s284_s30 = sshll.u32 %s274_s23, 4  ;;  %p5674_p0 = pnand %p5294_p13, %p5633_p4  ;;  %s5670_s30 = int_to_ptr.vmem [resolvable:$true] %s284_s30 }
  0x1e   : > { %s271_s10 = scalar_lea.sflag [#allocation4], %s5657_s17 }
  0x1f   : > { %p5358_p3 = pneg %p5674_p0 }
  0x22   : > { %s5666_s22 = scalar_lea.hbm %s6531_s0, %s6519_s19  ;;  %s5361_s11 = scalar_lea.hbm %s6531_s0, 2048 }
  0x23   : > { %s5356_s12 = scalar_lea.hbm %s5666_s22, 1024  ;;  %p5362_p4 = scmp.lt.u32.totalorder %s5666_s22, %s6531_s0 }
  0x24   : > { %p5357_p2 = scmp.ne.s32.totalorder %s5666_s22, %s5356_s12  ;;  %p5363_p7 = scmp.lt.u32.totalorder %s5361_s11, %s5356_s12 }
  0x25   : > { %p5365_p13 = scmp.lt.u32.totalorder %s5356_s12, %s5666_s22 }
  0x26   : > { %p5359_p5 = pnand %p5358_p3, %p5357_p2  ;;  %p5364_p10 = por %p5363_p7, %p5362_p4 }
  0x28   : > { %p5360_p6 = pneg %p5359_p5  ;;  %p5366_p12 = por %p5365_p13, %p5364_p10 }
  0x2a   : > { %p5367_p1 = pnand %p5366_p12, %p5360_p6 }
  0x2c   : > { %5370 = shalt.err (!%p5367_p1)
}
  0x2d   : > { %s5371_s19 = scalar_lea.vmem %s5670_s30, 1024  ;;  %s5544_s20 = smov [#allocation3]  }
  0x2e   : > { %p5372_p2 = scmp.ne.s32.totalorder %s5670_s30, %s5371_s19  ;;  %s5376_s21 = sshll.u32 %s5544_s20, 4  ;;  %s5377_s21 = int_to_ptr.vmem [resolvable:$false] %s5376_s21 }
  0x2f   : > { %s5378_s18 = scalar_lea.vmem %s5377_s21, 2048  ;;  %p5379_p9 = scmp.lt.s32.totalorder %s5670_s30, %s5377_s21 }
  0x30   : > { %p5374_p5 = pnand %p5372_p2, %p5358_p3  ;;  %p5380_p4 = scmp.lt.s32.totalorder %s5378_s18, %s5371_s19 }
  0x32   : > { %p5375_p11 = pneg %p5374_p5  ;;  %p5381_p7 = por %p5380_p4, %p5379_p9 }
  0x34   : > { %p5382_p10 = pnand %p5381_p7, %p5375_p11 }
  0x36   : > { %5385 = shalt.err (!%p5382_p10)
}
  0x37   : > { %s6522_s12 = smov 128   ;;  %s5546_s11 = smov 8  }
  0x38   : > { %5283 = dma.hbm_to_vmem [thread:$0]  (!%p5674_p0), %s5666_s22, 1024, %s5670_s30, %s271_s10, %s6522_s12, %s6522_s12, %s5546_s11  }
  0x39   : > { %p324_p9 = scmp.lt.s32.totalorder %s5538_s29, 3  ;;  %s6533_s19 = sshll.u32 %s5534_s28, 10 }
  0x3a   : > { %s5716_s21 = scalar_lea.hbm %s6511_s1, %s6533_s19  ;;  %p6534_p11 = scmp.ge.s32.totalorder %s5538_s29, 1 }
  0x3b   : > { %s6536_s0 = sshll.u32 %s5657_s17, 6  ;;  %s295_s22 = scalar_lea.sflag [#allocation7], %s5657_s17 }
  0x3c   : > { %p5720_p12 = pnand %p6534_p11, %p324_p9  ;;  %s298_s9 = scalar_lea.vmem [#allocation6], %s6536_s0 }
  0x3d   : > { %s308_s15 = sshll.u32 %s298_s9, 4  ;;  %s5386_s30 = scalar_lea.hbm %s5716_s21, 1024  ;;  %s5726_s15 = int_to_ptr.vmem [resolvable:$true] %s308_s15 }
  0x3e   : > { %p5387_p1 = scmp.ne.s32.totalorder %s5716_s21, %s5386_s30  ;;  %s5391_s23 = scalar_lea.hbm %s6511_s1, 2048 }
  0x3f   : > { %p5392_p2 = scmp.lt.u32.totalorder %s5716_s21, %s6511_s1  ;;  %p5393_p5 = scmp.lt.u32.totalorder %s5391_s23, %s5386_s30 }
  0x40   : > { %p5389_p6 = pnand %p5387_p1, %p5358_p3  ;;  %p5395_p7 = scmp.lt.u32.totalorder %s5386_s30, %s5716_s21 }
  0x41   : > { %p5394_p4 = por %p5393_p5, %p5392_p2 }
  0x42   : > { %p5390_p13 = pneg %p5389_p6 }
  0x43   : > { %p5396_p10 = por %p5395_p7, %p5394_p4 }
  0x45   : > { %p5397_p9 = pnand %p5396_p10, %p5390_p13 }
  0x47   : > { %5400 = shalt.err (!%p5397_p9)
}
  0x48   : > { %s5401_s0 = scalar_lea.vmem %s5726_s15, 1024  ;;  %s5547_s9 = smov [#allocation6]  }
  0x49   : > { %p5402_p11 = scmp.ne.s32.totalorder %s5726_s15, %s5401_s0  ;;  %s5406_s10 = sshll.u32 %s5547_s9, 4  ;;  %s5407_s10 = int_to_ptr.vmem [resolvable:$false] %s5406_s10 }
  0x4a   : > { %s5408_s12 = scalar_lea.vmem %s5407_s10, 2048  ;;  %p5409_p8 = scmp.lt.s32.totalorder %s5726_s15, %s5407_s10 }
  0x4b   : > { %p5404_p1 = pnand %p5402_p11, %p5358_p3  ;;  %p5410_p2 = scmp.lt.s32.totalorder %s5408_s12, %s5401_s0 }
  0x4d   : > { %p5405_p6 = pneg %p5404_p1  ;;  %p5411_p5 = por %p5410_p2, %p5409_p8 }
  0x4f   : > { %p5412_p4 = pnand %p5411_p5, %p5405_p6 }
  0x51   : > { %5415 = shalt.err (!%p5412_p4)
}
  0x52   : > { %s6537_s30 = smov 128   ;;  %328 = sbr.rel (%p5720_p12) target bundleno = 844 (0x34c), region = 44 }
  0x53   : > { %5286 = dma.hbm_to_vmem [thread:$0]  (!%p5674_p0), %s5716_s21, 1024, %s5726_s15, %s295_s22, %s6537_s30, %s6537_s30, %s5546_s11  }
  0x59   : > { %s5760_s19 = sand.u32 1, %s5522_s25   ;;  %p6538_p8 = scmp.ne.s32.totalorder %s6527_s13, 0 }
  0x5a   : > { %s5763_s23 = sshll.u32 %s5760_s19, 6  ;;  %s331_s8 = scalar_lea.sflag [#allocation4], %s5760_s19 }
  0x5b   : > { %s5767_s20 = scalar_lea.vmem [#allocation3], %s5763_s23 }
  0x5c   : > { %5501 = dma.done.wait (%p6538_p8), %s331_s8, 1024  }
  0x5d   : > { %5503 = vsyncadd (%p6538_p8), %s331_s8, 4294966272  ;;  %s340_s15 = scalar_lea.sflag [#allocation7], %s5760_s19  ;;  %s5775_s17 = scalar_lea.vmem [#allocation6], %s5763_s23 }
  0x5e   : > { %5505 = dma.done.wait (%p6538_p8), %s340_s15, 1024  }
  0x5f   : > { %5507 = vsyncadd (%p6538_p8), %s340_s15, 4294966272  ;;  %p391_p0 = scmp.lt.s32.totalorder %s5530_s27, 1  ;;  %v5789_v0 = vld [vmem:[%s6513_s3] sm:$0xff]  ;;  %v5794_v1 = vld [vmem:[%s6513_s3 + $0x8] sm:$0xff]  ;;  %vm416_vm0 = vcmask 130048  }
  0x60   : > { %6539 = vst [vmem:[#allocation17_spill] sm:$0xff] %v5789_v0  ;;  %6540 = vst [vmem:[#allocation18_spill] sm:$0xff] %v5794_v1  ;;  %v5799_v2 = vld [vmem:[%s6513_s3 + $0x10] sm:$0xff]  ;;  %v5804_v3 = vld [vmem:[%s6513_s3 + $0x18] sm:$0xff] }
  0x61   : > { %s392_s11 = scalar_select %p391_p0, %s5530_s27, 1  ;;  %6541 = vst [vmem:[#allocation19_spill] sm:$0xff] %v5799_v2  ;;  %6542 = vst [vmem:[#allocation20_spill] sm:$0xff] %v5804_v3  ;;  %v465_v4 = vld [vmem:[%s6514_s4] sm:$0xff]  ;;  %v466_v5 = vld [vmem:[%s6514_s4 + $0x8] sm:$0xff] }
  0x62   : > { %v516_v6 = vand.u32 4294901760, %v465_v4  ;;  %v519_v7 = vand.u32 4294901760, %v466_v5  ;;  %v1619_v8 = vld [vmem:[%s6515_s5] sm:$0xff]  ;;  %v1620_v9 = vld [vmem:[%s6515_s5 + $0x8] sm:$0xff]  ;;  %v402_v20 = vld [vmem:[%s5767_s20 + $0x10] sm:$0xff] }
  0x63   : > { %s4219_s21 = sshll.u32 %s392_s11, 4  ;;  %v1622_v11 = vand.u32 4294901760, %v1619_v8  ;;  %v1625_v12 = vand.u32 4294901760, %v1620_v9  ;;  %v400_v14 = vld [vmem:[%s5767_s20] sm:$0xff]  ;;  %v401_v15 = vld [vmem:[%s5767_s20 + $0x8] sm:$0xff]  ;;  %v403_v21 = vld [vmem:[%s5767_s20 + $0x18] sm:$0xff] }
  0x64   : > { %s395_s0 = scalar_lea.vmem %s6512_s2, %s4219_s21  ;;  %v5824_v16 = vpack.c.bf16 %v519_v7, %v516_v6  ;;  %v5827_v18 = vsub.f32 %v465_v4, %v516_v6  ;;  %v5829_v19 = vsub.f32 %v466_v5, %v519_v7  ;;  %v404_v22 = vld [vmem:[%s5767_s20 + $0x20] sm:$0xff]  ;;  %v405_v27 = vld [vmem:[%s5767_s20 + $0x28] sm:$0xff]  ;;  %v406_v28 = vld [vmem:[%s5767_s20 + $0x30] sm:$0xff] }
  0x65   : > { %v5818_v10 = vld [vmem:[%s395_s0] sm:$0xff]  ;;  %v5820_v13 = vld [vmem:[%s395_s0 + $0x8] sm:$0xff]  ;;  %v5834_v23 = vpack.c.bf16 %v1625_v12, %v1622_v11  ;;  %v5836_v24 = vsub.f32 %v1619_v8, %v1622_v11  ;;  %v5838_v25 = vsub.f32 %v1620_v9, %v1625_v12  ;;  %v407_v29 = vld [vmem:[%s5767_s20 + $0x38] sm:$0xff]  ;;  %s381_s20 = scalar_lea.vmem [#allocation8], %s5763_s23  ;;  %s6284_s0 = smov 0  }
  0x66   : > { %v408_v17 = vmul.f32 %v400_v14, %v5818_v10  ;;  %v409_v26 = vmul.f32 %v401_v15, %v5820_v13  ;;  %4967 = vmatprep.subr.bf16.mxu1 %v5824_v16  ;;  %v745_v30 = vand.u32 4294901760, %v5827_v18  ;;  %v752_v31 = vand.u32 4294901760, %v5829_v19  ;;  %v425_v34 = vld [vmem:[%s5775_s17] sm:$0xff]  ;;  %v426_v35 = vld [vmem:[%s5775_s17 + $0x8] sm:$0xff]  ;;  %v427_v40 = vld [vmem:[%s5775_s17 + $0x10] sm:$0xff] }
  0x67   : > { %v410_v32 = vmul.f32 %v402_v20, %v5818_v10  ;;  %v411_v33 = vmul.f32 %v403_v21, %v5820_v13  ;;  %4991 = vmatprep.subr.bf16.mxu0 %v5834_v23  ;;  %4969 = vmatpush3.bf16.msra.mxu1 %v5824_v16  ;;  %v1851_v36 = vand.u32 4294901760, %v5836_v24  ;;  %v1858_v37 = vand.u32 4294901760, %v5838_v25  ;;  %v428_v41 = vld [vmem:[%s5775_s17 + $0x18] sm:$0xff]  ;;  %v429_v46 = vld [vmem:[%s5775_s17 + $0x20] sm:$0xff]  ;;  %v430_v47 = vld [vmem:[%s5775_s17 + $0x28] sm:$0xff] }
  0x68   : > { %417 = vst.msk [vmem:[#allocation2] sm:$0xff] %vm416_vm0, %v408_v17  ;;  %418 = vst.msk [vmem:[#allocation2 + $0x8] sm:$0xff] %vm416_vm0, %v409_v26  ;;  %v412_v38 = vmul.f32 %v404_v22, %v5818_v10  ;;  %v413_v39 = vmul.f32 %v405_v27, %v5820_v13  ;;  %4993 = vmatpush3.bf16.msra.mxu0 %v5834_v23  ;;  %v746_v42 = vsub.f32 %v5827_v18, %v745_v30  ;;  %v431_v52 = vld [vmem:[%s5775_s17 + $0x30] sm:$0xff]  ;;  %v432_v53 = vld [vmem:[%s5775_s17 + $0x38] sm:$0xff]  ;;  %s388_s17 = scalar_lea.vmem [#allocation9], %s5763_s23 }
  0x69   : > { %v753_v43 = vsub.f32 %v5829_v19, %v752_v31  ;;  %419 = vst.msk [vmem:[#allocation2 + $0x10] sm:$0xff] %vm416_vm0, %v410_v32  ;;  %420 = vst.msk [vmem:[#allocation2 + $0x18] sm:$0xff] %vm416_vm0, %v411_v33  ;;  %v414_v44 = vmul.f32 %v406_v28, %v5818_v10  ;;  %v415_v45 = vmul.f32 %v407_v29, %v5820_v13 }
  0x6a   : > { %v1852_v48 = vsub.f32 %v5836_v24, %v1851_v36  ;;  %v1859_v49 = vsub.f32 %v5838_v25, %v1858_v37  ;;  %421 = vst.msk [vmem:[#allocation2 + $0x20] sm:$0xff] %vm416_vm0, %v412_v38  ;;  %422 = vst.msk [vmem:[#allocation2 + $0x28] sm:$0xff] %vm416_vm0, %v413_v39  ;;  %v433_v50 = vmul.f32 %v425_v34, %v5818_v10  ;;  %v747_v54 = vand.u32 4294901760, %v746_v42 }
  0x6b   : > { %v434_v51 = vmul.f32 %v426_v35, %v5820_v13  ;;  %v754_v55 = vand.u32 4294901760, %v753_v43  ;;  %423 = vst.msk [vmem:[#allocation2 + $0x30] sm:$0xff] %vm416_vm0, %v414_v44  ;;  %424 = vst.msk [vmem:[#allocation2 + $0x38] sm:$0xff] %vm416_vm0, %v415_v45  ;;  %v435_v56 = vmul.f32 %v427_v40, %v5818_v10  ;;  %v436_v57 = vmul.f32 %v428_v41, %v5820_v13 }
  0x6c   : > { %v1853_v58 = vand.u32 4294901760, %v1852_v48  ;;  %v1860_v59 = vand.u32 4294901760, %v1859_v49  ;;  %441 = vst.msk [vmem:[#allocation2 + $0x40] sm:$0xff] %vm416_vm0, %v433_v50  ;;  %v437_v60 = vmul.f32 %v429_v46, %v5818_v10  ;;  %v438_v61 = vmul.f32 %v430_v47, %v5820_v13 }
  0x6d   : > { %442 = vst.msk [vmem:[#allocation2 + $0x48] sm:$0xff] %vm416_vm0, %v434_v51  ;;  %v5886_v62 = vpack.c.bf16 %v754_v55, %v747_v54  ;;  %443 = vst.msk [vmem:[#allocation2 + $0x50] sm:$0xff] %vm416_vm0, %v435_v56  ;;  %v439_v63 = vmul.f32 %v431_v52, %v5818_v10  ;;  %v440_v4 = vmul.f32 %v432_v53, %v5820_v13 }
  0x6e   : > { %444 = vst.msk [vmem:[#allocation2 + $0x58] sm:$0xff] %vm416_vm0, %v436_v57  ;;  %v5892_v6 = vpack.c.bf16 %v1860_v59, %v1853_v58  ;;  %445 = vst.msk [vmem:[#allocation2 + $0x60] sm:$0xff] %vm416_vm0, %v437_v60  ;;  %v5896_v7 = vpack.c.bf16 %v752_v31, %v745_v30  ;;  %v5898_v8 = vpack.c.bf16 %v1858_v37, %v1851_v36 }
  0x6f   : > { %v449_v5 = vld [vmem:[#allocation2] sm:$0xff]  ;;  %446 = vst.msk [vmem:[#allocation2 + $0x68] sm:$0xff] %vm416_vm0, %v438_v61  ;;  %4971 = vmatprep.subr.bf16.mxu1 %v5886_v62  ;;  %v450_v11 = vld [vmem:[#allocation2 + $0x8] sm:$0xff]  ;;  %447 = vst.msk [vmem:[#allocation2 + $0x70] sm:$0xff] %vm416_vm0, %v439_v63  ;;  %v5914_v26 = vpack.c.bf16 %v5829_v19, %v5827_v18 }
  0x70   : > { %v468_v9 = vsel %vm416_vm0, %v449_v5, 0  ;;  %448 = vst.msk [vmem:[#allocation2 + $0x78] sm:$0xff] %vm416_vm0, %v440_v4  ;;  %4995 = vmatprep.subr.bf16.mxu0 %v5892_v6  ;;  %v471_v12 = vsel %vm416_vm0, %v450_v11, 0  ;;  %v451_v13 = vld [vmem:[#allocation2 + $0x10] sm:$0xff]  ;;  %v452_v14 = vld [vmem:[#allocation2 + $0x18] sm:$0xff]  ;;  %v5992_v11 = vpack.c.bf16 %v5838_v25, %v5836_v24 }
  0x71   : > { %v5904_v10 = vand.u32 4294901760, %v468_v9  ;;  %v5908_v15 = vand.u32 4294901760, %v471_v12  ;;  %v474_v17 = vsel %vm416_vm0, %v451_v13, 0  ;;  %v477_v20 = vsel %vm416_vm0, %v452_v14, 0  ;;  %v453_v21 = vld [vmem:[#allocation2 + $0x20] sm:$0xff]  ;;  %v454_v22 = vld [vmem:[#allocation2 + $0x28] sm:$0xff] }
  0x72   : > { %v5919_v28 = vand.u32 4294901760, %v474_v17  ;;  %v5921_v29 = vand.u32 4294901760, %v477_v20  ;;  %v480_v30 = vsel %vm416_vm0, %v453_v21, 0  ;;  %v455_v31 = vld [vmem:[#allocation2 + $0x30] sm:$0xff]  ;;  %v456_v32 = vld [vmem:[#allocation2 + $0x38] sm:$0xff]  ;;  %v483_v35 = vsel %vm416_vm0, %v454_v22, 0 }
  0x73   : > { %v5917_v27 = vsub.f32 %v468_v9, %v5904_v10  ;;  %v5925_v33 = vsub.f32 %v471_v12, %v5908_v15  ;;  %v5927_v34 = vand.u32 4294901760, %v480_v30  ;;  %v486_v18 = vsel %vm416_vm0, %v455_v31, 0  ;;  %v457_v51 = vld [vmem:[#allocation2 + $0x40] sm:$0xff] }
  0x74   : > { %v5935_v36 = vsub.f32 %v474_v17, %v5919_v28  ;;  %v5938_v37 = vsub.f32 %v477_v20, %v5921_v29  ;;  %v5940_v38 = vand.u32 4294901760, %v483_v35  ;;  %v5948_v41 = vand.u32 4294901760, %v486_v18  ;;  %v458_v60 = vld [vmem:[#allocation2 + $0x48] sm:$0xff]  ;;  %v459_v61 = vld [vmem:[#allocation2 + $0x50] sm:$0xff] }
  0x75   : > { %v5932_v19 = vand.u32 4294901760, %v5917_v27  ;;  %v5943_v39 = vand.u32 4294901760, %v5925_v33  ;;  %v5946_v40 = vsub.f32 %v480_v30, %v5927_v34  ;;  %v489_v42 = vsel %vm416_vm0, %v456_v32, 0  ;;  %v460_v63 = vld [vmem:[#allocation2 + $0x58] sm:$0xff]  ;;  %v461_v20 = vld [vmem:[#allocation2 + $0x60] sm:$0xff] }
  0x76   : > { %v5954_v44 = vand.u32 4294901760, %v5935_v36  ;;  %v5957_v45 = vand.u32 4294901760, %v5938_v37  ;;  %v5960_v46 = vsub.f32 %v483_v35, %v5940_v38  ;;  %v5968_v49 = vsub.f32 %v486_v18, %v5948_v41  ;;  %v462_v21 = vld [vmem:[#allocation2 + $0x68] sm:$0xff] }
  0x77   : > { %v585_v43 = vsub.f32 %v5917_v27, %v5932_v19  ;;  %v595_v47 = vsub.f32 %v5925_v33, %v5943_v39  ;;  %v5965_v48 = vand.u32 4294901760, %v5946_v40  ;;  %v5970_v50 = vand.u32 4294901760, %v489_v42 }
  0x78   : > { %v605_v53 = vsub.f32 %v5935_v36, %v5954_v44  ;;  %v615_v54 = vsub.f32 %v5938_v37, %v5957_v45  ;;  %v5977_v55 = vand.u32 4294901760, %v5960_v46  ;;  %v5982_v58 = vand.u32 4294901760, %v5968_v49 }
  0x79   : > { %v586_v52 = vand.u32 4294901760, %v585_v43  ;;  %v596_v56 = vand.u32 4294901760, %v595_v47  ;;  %v625_v57 = vsub.f32 %v5946_v40, %v5965_v48  ;;  %v5985_v59 = vsub.f32 %v489_v42, %v5970_v50 }
  0x7a   : > { %v606_v4 = vand.u32 4294901760, %v605_v53  ;;  %v635_v5 = vsub.f32 %v5960_v46, %v5977_v55  ;;  %v492_v9 = vsel %vm416_vm0, %v457_v51, 0  ;;  %v616_v12 = vand.u32 4294901760, %v615_v54 }
  0x7b   : > { %4514 = vmatprep.mubr.f32.mxu1 %v586_v52  ;;  %4682 = vmatprep.mubr.f32.mxu0 %v586_v52  ;;  %v645_v13 = vsub.f32 %v5968_v49, %v5982_v58  ;;  %v5997_v14 = vand.u32 4294901760, %v5985_v59  ;;  %v5999_v17 = vand.u32 4294901760, %v492_v9  ;;  %v626_v22 = vand.u32 4294901760, %v625_v57 }
  0x7c   : > { %4515 = vmatmul.mubr.f32.vlgmr.msra.gmra.mrb[0].mxu1 %v596_v56  ;;  %4683 = vmatmul.mubr.f32.vlgmr.msra.gmra.mrb[0].mxu0 %v596_v56  ;;  %v495_v24 = vsel %vm416_vm0, %v458_v60, 0  ;;  %v498_v25 = vsel %vm416_vm0, %v459_v61, 0  ;;  %v501_v30 = vsel %vm416_vm0, %v460_v63, 0  ;;  %v636_v31 = vand.u32 4294901760, %v635_v5  ;;  %v464_v56 = vld [vmem:[#allocation2 + $0x78] sm:$0xff] }
  0x7d   : > { %4973 = vmatpush3.bf16.msra.mxu1 %v5886_v62  ;;  %4997 = vmatpush3.bf16.msra.mxu0 %v5892_v6  ;;  %v655_v32 = vsub.f32 %v5985_v59, %v5997_v14  ;;  %v6009_v35 = vsub.f32 %v492_v9, %v5999_v17  ;;  %v6011_v18 = vand.u32 4294901760, %v495_v24  ;;  %v463_v62 = vld [vmem:[#allocation2 + $0x70] sm:$0xff]  ;;  %v6013_v6 = vand.u32 4294901760, %v498_v25 }
  0x7e   : > { %4517 = vmatprep.mubr.f32.mxu1 %v606_v4  ;;  %4685 = vmatprep.mubr.f32.mxu0 %v606_v4  ;;  %v6015_v42 = vand.u32 4294901760, %v501_v30  ;;  %v504_v43 = vsel %vm416_vm0, %v461_v20, 0  ;;  %v507_v47 = vsel %vm416_vm0, %v462_v21, 0  ;;  %v646_v51 = vand.u32 4294901760, %v645_v13 }
  0x7f   : > { %4975 = vmatprep.subr.bf16.mxu1 %v5914_v26  ;;  %4999 = vmatprep.subr.bf16.mxu0 %v5992_v11  ;;  %v6022_v52 = vand.u32 4294901760, %v6009_v35  ;;  %v6025_v53 = vsub.f32 %v495_v24, %v6011_v18  ;;  %v6027_v54 = vand.u32 4294901760, %v504_v43  ;;  %v6030_v57 = vsub.f32 %v498_v25, %v6013_v6 }
  0x80   : > { %4518 = vmatmul.mubr.f32.gmra.mrb[2].mxu1 %v616_v12  ;;  %4686 = vmatmul.mubr.f32.gmra.mrb[2].mxu0 %v616_v12  ;;  %v6033_v60 = vsub.f32 %v501_v30, %v6015_v42  ;;  %v6035_v61 = vand.u32 4294901760, %v507_v47  ;;  %v510_v63 = vsel %vm416_vm0, %v463_v62, 0  ;;  %v656_v13 = vand.u32 4294901760, %v655_v32 }
  0x81   : > { %4520 = vmatprep.mubr.f32.mxu1 %v626_v22  ;;  %4688 = vmatprep.mubr.f32.mxu0 %v626_v22  ;;  %v665_v4 = vsub.f32 %v6009_v35, %v6022_v52  ;;  %v6041_v5 = vand.u32 4294901760, %v6025_v53  ;;  %v6044_v9 = vsub.f32 %v504_v43, %v6027_v54  ;;  %v6046_v12 = vand.u32 4294901760, %v510_v63 }
  0x82   : > { %v6049_v20 = vand.u32 4294901760, %v6030_v57  ;;  %v513_v21 = vsel %vm416_vm0, %v464_v56, 0  ;;  %v6055_v25 = vand.u32 4294901760, %v6033_v60  ;;  %v6058_v30 = vsub.f32 %v507_v47, %v6035_v61 }
  0x83   : > { %v666_v22 = vand.u32 4294901760, %v665_v4  ;;  %v675_v24 = vsub.f32 %v6025_v53, %v6041_v5  ;;  %v6063_v62 = vand.u32 4294901760, %v6044_v9  ;;  %v6068_v43 = vand.u32 4294901760, %v513_v21 }
  0x84   : > { %4521 = vmatmul.mubr.f32.gmra.mrb[4].mxu1 %v636_v31  ;;  %4689 = vmatmul.mubr.f32.gmra.mrb[4].mxu0 %v636_v31  ;;  %v685_v32 = vsub.f32 %v6030_v57, %v6049_v20  ;;  %v6066_v31 = vsub.f32 %v510_v63, %v6046_v12  ;;  %v695_v47 = vsub.f32 %v6033_v60, %v6055_v25  ;;  %v6073_v4 = vand.u32 4294901760, %v6058_v30 }
  0x85   : > { %4523 = vmatprep.mubr.f32.mxu1 %v646_v51  ;;  %4691 = vmatprep.mubr.f32.mxu0 %v646_v51  ;;  %v676_v56 = vand.u32 4294901760, %v675_v24  ;;  %v6076_v51 = vsub.f32 %v513_v21, %v6068_v43  ;;  %v705_v63 = vsub.f32 %v6044_v9, %v6063_v62 }
  0x86   : > { %v686_v3 = vand.u32 4294901760, %v685_v32  ;;  %v6081_v2 = vand.u32 4294901760, %v6066_v31  ;;  %v715_v24 = vsub.f32 %v6058_v30, %v6073_v4 }
  0x87   : > { %v6086_v1 = vand.u32 4294901760, %v6076_v51  ;;  %v706_v21 = vand.u32 4294901760, %v705_v63 }
  0x88   : > { %4524 = vmatmul.mubr.f32.gmra.mrb[6].mxu1 %v656_v13  ;;  %4692 = vmatmul.mubr.f32.gmra.mrb[6].mxu0 %v656_v13  ;;  %v696_v13 = vand.u32 4294901760, %v695_v47  ;;  %v716_v32 = vand.u32 4294901760, %v715_v24 }
  0x89   : > { %4526 = vmatprep.mubr.f32.mxu1 %v666_v22  ;;  %4694 = vmatprep.mubr.f32.mxu0 %v666_v22  ;;  %v725_v22 = vsub.f32 %v6066_v31, %v6081_v2  ;;  %v735_v0 = vsub.f32 %v6076_v51, %v6086_v1 }
  0x8b   : > { %v736_v47 = vand.u32 4294901760, %v735_v0 }
  0x8c   : > { %4527 = vmatmul.mubr.f32.gmra.mrb[8].mxu1 %v676_v56  ;;  %4695 = vmatmul.mubr.f32.gmra.mrb[8].mxu0 %v676_v56  ;;  %v726_v56 = vand.u32 4294901760, %v725_v22 }
  0x8d   : > { %4529 = vmatprep.mubr.f32.mxu1 %v686_v3  ;;  %4697 = vmatprep.mubr.f32.mxu0 %v686_v3 }
  0x90   : > { %4530 = vmatmul.mubr.f32.gmra.mrb[10].mxu1 %v696_v13  ;;  %4698 = vmatmul.mubr.f32.gmra.mrb[10].mxu0 %v696_v13 }
  0x91   : > { %4532 = vmatprep.mubr.f32.mxu1 %v706_v21  ;;  %4700 = vmatprep.mubr.f32.mxu0 %v706_v21 }
  0x94   : > { %4533 = vmatmul.mubr.f32.gmra.mrb[12].mxu1 %v716_v32  ;;  %4701 = vmatmul.mubr.f32.gmra.mrb[12].mxu0 %v716_v32 }
  0x95   : > { %4535 = vmatprep.mubr.f32.mxu1 %v726_v56  ;;  %4703 = vmatprep.mubr.f32.mxu0 %v726_v56 }
  0x98   : > { %4536 = vmatmul.mubr.f32.gmra.mrb[14].mxu1 %v736_v47  ;;  %4704 = vmatmul.mubr.f32.gmra.mrb[14].mxu0 %v736_v47 }
  0x99   : > { %4542 = vmatprep.mubr.f32.mxu1 %v5904_v10  ;;  %4710 = vmatprep.mubr.f32.mxu0 %v5904_v10 }
  0x9c   : > { %4543 = vmatmul.mubr.f32.vlgmr.msra.gmra.mrb[0].mxu1 %v5908_v15  ;;  %4711 = vmatmul.mubr.f32.vlgmr.msra.gmra.mrb[0].mxu0 %v5908_v15 }
  0x9d   : > { %4977 = vmatpush3.bf16.msra.mxu1 %v5914_v26  ;;  %5001 = vmatpush3.bf16.msra.mxu0 %v5992_v11 }
  0x9e   : > { %4545 = vmatprep.mubr.f32.mxu1 %v5919_v28  ;;  %4713 = vmatprep.mubr.f32.mxu0 %v5919_v28 }
  0x9f   : > { %4979 = vmatprep.subr.bf16.mxu1 %v5824_v16  ;;  %5003 = vmatprep.subr.bf16.mxu0 %v5834_v23 }
  0xa0   : > { %4546 = vmatmul.mubr.f32.gmra.mrb[2].mxu1 %v5921_v29  ;;  %4714 = vmatmul.mubr.f32.gmra.mrb[2].mxu0 %v5921_v29 }
  0xa1   : > { %4548 = vmatprep.mubr.f32.mxu1 %v5927_v34  ;;  %4716 = vmatprep.mubr.f32.mxu0 %v5927_v34 }
  0xa4   : > { %4549 = vmatmul.mubr.f32.gmra.mrb[4].mxu1 %v5940_v38  ;;  %4717 = vmatmul.mubr.f32.gmra.mrb[4].mxu0 %v5940_v38 }
  0xa5   : > { %4551 = vmatprep.mubr.f32.mxu1 %v5948_v41  ;;  %4719 = vmatprep.mubr.f32.mxu0 %v5948_v41 }
  0xa8   : > { %4552 = vmatmul.mubr.f32.gmra.mrb[6].mxu1 %v5970_v50  ;;  %4720 = vmatmul.mubr.f32.gmra.mrb[6].mxu0 %v5970_v50 }
  0xa9   : > { %4554 = vmatprep.mubr.f32.mxu1 %v5999_v17  ;;  %4722 = vmatprep.mubr.f32.mxu0 %v5999_v17 }
  0xac   : > { %4555 = vmatmul.mubr.f32.gmra.mrb[8].mxu1 %v6011_v18  ;;  %4723 = vmatmul.mubr.f32.gmra.mrb[8].mxu0 %v6011_v18 }
  0xad   : > { %4557 = vmatprep.mubr.f32.mxu1 %v6013_v6  ;;  %4725 = vmatprep.mubr.f32.mxu0 %v6013_v6 }
  0xb0   : > { %4558 = vmatmul.mubr.f32.gmra.mrb[10].mxu1 %v6015_v42  ;;  %4726 = vmatmul.mubr.f32.gmra.mrb[10].mxu0 %v6015_v42 }
  0xb1   : > { %4560 = vmatprep.mubr.f32.mxu1 %v6027_v54  ;;  %4728 = vmatprep.mubr.f32.mxu0 %v6027_v54 }
  0xb4   : > { %4561 = vmatmul.mubr.f32.gmra.mrb[12].mxu1 %v6035_v61  ;;  %4729 = vmatmul.mubr.f32.gmra.mrb[12].mxu0 %v6035_v61 }
  0xb5   : > { %4563 = vmatprep.mubr.f32.mxu1 %v6046_v12  ;;  %4731 = vmatprep.mubr.f32.mxu0 %v6046_v12 }
  0xb8   : > { %4564 = vmatmul.mubr.f32.gmra.mrb[14].mxu1 %v6068_v43  ;;  %4732 = vmatmul.mubr.f32.gmra.mrb[14].mxu0 %v6068_v43 }
  0xb9   : > { %4570 = vmatprep.mubr.f32.mxu1 %v5917_v27  ;;  %4738 = vmatprep.mubr.f32.mxu0 %v5917_v27 }
  0xbc   : > { %4571 = vmatmul.mubr.f32.vlgmr.msra.gmra.mrb[0].mxu1 %v5925_v33  ;;  %4739 = vmatmul.mubr.f32.vlgmr.msra.gmra.mrb[0].mxu0 %v5925_v33 }
  0xbd   : > { %4981 = vmatpush3.bf16.msra.mxu1 %v5824_v16  ;;  %5005 = vmatpush3.bf16.msra.mxu0 %v5834_v23 }
  0xbe   : > { %4573 = vmatprep.mubr.f32.mxu1 %v5935_v36  ;;  %4741 = vmatprep.mubr.f32.mxu0 %v5935_v36 }
  0xbf   : > { %4983 = vmatprep.subr.bf16.mxu1 %v5896_v7  ;;  %5007 = vmatprep.subr.bf16.mxu0 %v5898_v8 }
  0xc0   : > { %4574 = vmatmul.mubr.f32.gmra.mrb[2].mxu1 %v5938_v37  ;;  %4742 = vmatmul.mubr.f32.gmra.mrb[2].mxu0 %v5938_v37 }
  0xc1   : > { %4576 = vmatprep.mubr.f32.mxu1 %v5946_v40  ;;  %4744 = vmatprep.mubr.f32.mxu0 %v5946_v40 }
  0xc4   : > { %4577 = vmatmul.mubr.f32.gmra.mrb[4].mxu1 %v5960_v46  ;;  %4745 = vmatmul.mubr.f32.gmra.mrb[4].mxu0 %v5960_v46 }
  0xc5   : > { %4579 = vmatprep.mubr.f32.mxu1 %v5968_v49  ;;  %4747 = vmatprep.mubr.f32.mxu0 %v5968_v49 }
  0xc8   : > { %4580 = vmatmul.mubr.f32.gmra.mrb[6].mxu1 %v5985_v59  ;;  %4748 = vmatmul.mubr.f32.gmra.mrb[6].mxu0 %v5985_v59 }
  0xc9   : > { %4582 = vmatprep.mubr.f32.mxu1 %v6009_v35  ;;  %4750 = vmatprep.mubr.f32.mxu0 %v6009_v35 }
  0xcc   : > { %4583 = vmatmul.mubr.f32.gmra.mrb[8].mxu1 %v6025_v53  ;;  %4751 = vmatmul.mubr.f32.gmra.mrb[8].mxu0 %v6025_v53 }
  0xcd   : > { %4585 = vmatprep.mubr.f32.mxu1 %v6030_v57  ;;  %4753 = vmatprep.mubr.f32.mxu0 %v6030_v57 }
  0xd0   : > { %4586 = vmatmul.mubr.f32.gmra.mrb[10].mxu1 %v6033_v60  ;;  %4754 = vmatmul.mubr.f32.gmra.mrb[10].mxu0 %v6033_v60 }
  0xd1   : > { %4588 = vmatprep.mubr.f32.mxu1 %v6044_v9  ;;  %4756 = vmatprep.mubr.f32.mxu0 %v6044_v9 }
  0xd4   : > { %4589 = vmatmul.mubr.f32.gmra.mrb[12].mxu1 %v6058_v30  ;;  %4757 = vmatmul.mubr.f32.gmra.mrb[12].mxu0 %v6058_v30 }
  0xd5   : > { %4591 = vmatprep.mubr.f32.mxu1 %v6066_v31  ;;  %4759 = vmatprep.mubr.f32.mxu0 %v6066_v31 }
  0xd8   : > { %4592 = vmatmul.mubr.f32.gmra.mrb[14].mxu1 %v6076_v51  ;;  %4760 = vmatmul.mubr.f32.gmra.mrb[14].mxu0 %v6076_v51 }
  0xd9   : > { %4598 = vmatprep.mubr.f32.mxu1 %v5932_v19  ;;  %4766 = vmatprep.mubr.f32.mxu0 %v5932_v19 }
  0xdc   : > { %4599 = vmatmul.mubr.f32.vlgmr.msra.gmra.mrb[0].mxu1 %v5943_v39  ;;  %4767 = vmatmul.mubr.f32.vlgmr.msra.gmra.mrb[0].mxu0 %v5943_v39 }
  0xdd   : > { %4985 = vmatpush3.bf16.msra.mxu1 %v5896_v7  ;;  %5009 = vmatpush3.bf16.msra.mxu0 %v5898_v8 }
  0xde   : > { %4601 = vmatprep.mubr.f32.mxu1 %v5954_v44  ;;  %4769 = vmatprep.mubr.f32.mxu0 %v5954_v44 }
  0xdf   : > { %4987 = vmatprep.subr.bf16.mxu1 %v5824_v16  ;;  %5011 = vmatprep.subr.bf16.mxu0 %v5834_v23 }
  0xe0   : > { %4602 = vmatmul.mubr.f32.gmra.mrb[2].mxu1 %v5957_v45  ;;  %4770 = vmatmul.mubr.f32.gmra.mrb[2].mxu0 %v5957_v45 }
  0xe1   : > { %4604 = vmatprep.mubr.f32.mxu1 %v5965_v48  ;;  %4772 = vmatprep.mubr.f32.mxu0 %v5965_v48 }
  0xe4   : > { %4605 = vmatmul.mubr.f32.gmra.mrb[4].mxu1 %v5977_v55  ;;  %4773 = vmatmul.mubr.f32.gmra.mrb[4].mxu0 %v5977_v55 }
  0xe5   : > { %4607 = vmatprep.mubr.f32.mxu1 %v5982_v58  ;;  %4775 = vmatprep.mubr.f32.mxu0 %v5982_v58 }
  0xe8   : > { %4608 = vmatmul.mubr.f32.gmra.mrb[6].mxu1 %v5997_v14  ;;  %4776 = vmatmul.mubr.f32.gmra.mrb[6].mxu0 %v5997_v14 }
  0xe9   : > { %4610 = vmatprep.mubr.f32.mxu1 %v6022_v52  ;;  %4778 = vmatprep.mubr.f32.mxu0 %v6022_v52 }
  0xec   : > { %4611 = vmatmul.mubr.f32.gmra.mrb[8].mxu1 %v6041_v5  ;;  %4779 = vmatmul.mubr.f32.gmra.mrb[8].mxu0 %v6041_v5 }
  0xed   : > { %4613 = vmatprep.mubr.f32.mxu1 %v6049_v20  ;;  %4781 = vmatprep.mubr.f32.mxu0 %v6049_v20 }
  0xf0   : > { %4614 = vmatmul.mubr.f32.gmra.mrb[10].mxu1 %v6055_v25  ;;  %4782 = vmatmul.mubr.f32.gmra.mrb[10].mxu0 %v6055_v25 }
  0xf1   : > { %4616 = vmatprep.mubr.f32.mxu1 %v6063_v62  ;;  %4784 = vmatprep.mubr.f32.mxu0 %v6063_v62 }
  0xf4   : > { %4617 = vmatmul.mubr.f32.gmra.mrb[12].mxu1 %v6073_v4  ;;  %4785 = vmatmul.mubr.f32.gmra.mrb[12].mxu0 %v6073_v4 }
  0xf5   : > { %4619 = vmatprep.mubr.f32.mxu1 %v6081_v2  ;;  %4787 = vmatprep.mubr.f32.mxu0 %v6081_v2 }
  0xf8   : > { %4620 = vmatmul.mubr.f32.gmra.mrb[14].mxu1 %v6086_v1  ;;  %4788 = vmatmul.mubr.f32.gmra.mrb[14].mxu0 %v6086_v1 }
  0xf9   : > { %4626 = vmatprep.mubr.f32.mxu1 %v5904_v10  ;;  %4794 = vmatprep.mubr.f32.mxu0 %v5904_v10 }
  0xfc   : > { %4627 = vmatmul.mubr.f32.vlgmr.msra.gmra.mrb[0].mxu1 %v5908_v15  ;;  %4795 = vmatmul.mubr.f32.vlgmr.msra.gmra.mrb[0].mxu0 %v5908_v15 }
  0xfd   : > { %4989 = vmatpush3.bf16.msra.mxu1 %v5824_v16  ;;  %5013 = vmatpush3.bf16.msra.mxu0 %v5834_v23 }
  0xfe   : > { %4629 = vmatprep.mubr.f32.mxu1 %v5919_v28  ;;  %4797 = vmatprep.mubr.f32.mxu0 %v5919_v28 }
 0x100   : > { %4630 = vmatmul.mubr.f32.gmra.mrb[2].mxu1 %v5921_v29  ;;  %4798 = vmatmul.mubr.f32.gmra.mrb[2].mxu0 %v5921_v29 }
 0x101   : > { %4632 = vmatprep.mubr.f32.mxu1 %v5927_v34  ;;  %4800 = vmatprep.mubr.f32.mxu0 %v5927_v34 }
 0x104   : > { %4633 = vmatmul.mubr.f32.gmra.mrb[4].mxu1 %v5940_v38  ;;  %4801 = vmatmul.mubr.f32.gmra.mrb[4].mxu0 %v5940_v38 }
 0x105   : > { %4635 = vmatprep.mubr.f32.mxu1 %v5948_v41  ;;  %4803 = vmatprep.mubr.f32.mxu0 %v5948_v41 }
 0x108   : > { %4636 = vmatmul.mubr.f32.gmra.mrb[6].mxu1 %v5970_v50  ;;  %4804 = vmatmul.mubr.f32.gmra.mrb[6].mxu0 %v5970_v50 }
 0x109   : > { %4638 = vmatprep.mubr.f32.mxu1 %v5999_v17  ;;  %4806 = vmatprep.mubr.f32.mxu0 %v5999_v17 }
 0x10c   : > { %4639 = vmatmul.mubr.f32.gmra.mrb[8].mxu1 %v6011_v18  ;;  %4807 = vmatmul.mubr.f32.gmra.mrb[8].mxu0 %v6011_v18 }
 0x10d   : > { %4641 = vmatprep.mubr.f32.mxu1 %v6013_v6  ;;  %4809 = vmatprep.mubr.f32.mxu0 %v6013_v6 }
 0x110   : > { %4642 = vmatmul.mubr.f32.gmra.mrb[10].mxu1 %v6015_v42  ;;  %4810 = vmatmul.mubr.f32.gmra.mrb[10].mxu0 %v6015_v42 }
 0x111   : > { %4644 = vmatprep.mubr.f32.mxu1 %v6027_v54  ;;  %4812 = vmatprep.mubr.f32.mxu0 %v6027_v54 }
 0x114   : > { %4645 = vmatmul.mubr.f32.gmra.mrb[12].mxu1 %v6035_v61  ;;  %4813 = vmatmul.mubr.f32.gmra.mrb[12].mxu0 %v6035_v61 }
 0x115   : > { %4647 = vmatprep.mubr.f32.mxu1 %v6046_v12  ;;  %4815 = vmatprep.mubr.f32.mxu0 %v6046_v12 }
 0x118   : > { %4648 = vmatmul.mubr.f32.gmra.mrb[14].mxu1 %v6068_v43  ;;  %4816 = vmatmul.mubr.f32.gmra.mrb[14].mxu0 %v6068_v43 }
 0x119   : > { %4654 = vmatprep.mubr.f32.mxu1 %v5904_v10  ;;  %4822 = vmatprep.mubr.f32.mxu0 %v5904_v10 }
 0x11c   : > { %4655 = vmatmul.mubr.f32.vlgmr.msra.gmra.mrb[0].mxu1 %v5908_v15  ;;  %4823 = vmatmul.mubr.f32.vlgmr.msra.gmra.mrb[0].mxu0 %v5908_v15 }
 0x11d   : > { %4657 = vmatprep.mubr.f32.mxu1 %v5919_v28  ;;  %4825 = vmatprep.mubr.f32.mxu0 %v5919_v28 }
 0x120   : > { %4658 = vmatmul.mubr.f32.gmra.mrb[2].mxu1 %v5921_v29  ;;  %4826 = vmatmul.mubr.f32.gmra.mrb[2].mxu0 %v5921_v29 }
 0x121   : > { %4660 = vmatprep.mubr.f32.mxu1 %v5927_v34  ;;  %4828 = vmatprep.mubr.f32.mxu0 %v5927_v34 }
 0x124   : > { %4661 = vmatmul.mubr.f32.gmra.mrb[4].mxu1 %v5940_v38  ;;  %4829 = vmatmul.mubr.f32.gmra.mrb[4].mxu0 %v5940_v38 }
 0x125   : > { %4663 = vmatprep.mubr.f32.mxu1 %v5948_v41  ;;  %4831 = vmatprep.mubr.f32.mxu0 %v5948_v41 }
 0x128   : > { %4664 = vmatmul.mubr.f32.gmra.mrb[6].mxu1 %v5970_v50  ;;  %4832 = vmatmul.mubr.f32.gmra.mrb[6].mxu0 %v5970_v50 }
 0x129   : > { %4666 = vmatprep.mubr.f32.mxu1 %v5999_v17  ;;  %4834 = vmatprep.mubr.f32.mxu0 %v5999_v17 }
 0x12c   : > { %4667 = vmatmul.mubr.f32.gmra.mrb[8].mxu1 %v6011_v18  ;;  %4835 = vmatmul.mubr.f32.gmra.mrb[8].mxu0 %v6011_v18 }
 0x12d   : > { %4669 = vmatprep.mubr.f32.mxu1 %v6013_v6  ;;  %4837 = vmatprep.mubr.f32.mxu0 %v6013_v6 }
 0x130   : > { %4670 = vmatmul.mubr.f32.gmra.mrb[10].mxu1 %v6015_v42  ;;  %4838 = vmatmul.mubr.f32.gmra.mrb[10].mxu0 %v6015_v42 }
 0x131   : > { %4672 = vmatprep.mubr.f32.mxu1 %v6027_v54  ;;  %4840 = vmatprep.mubr.f32.mxu0 %v6027_v54 }
 0x134   : > { %4673 = vmatmul.mubr.f32.gmra.mrb[12].mxu1 %v6035_v61  ;;  %4841 = vmatmul.mubr.f32.gmra.mrb[12].mxu0 %v6035_v61 }
 0x135   : > { %4675 = vmatprep.mubr.f32.mxu1 %v6046_v12  ;;  %4843 = vmatprep.mubr.f32.mxu0 %v6046_v12 }
 0x138   : > { %4676 = vmatmul.mubr.f32.gmra.mrb[14].mxu1 %v6068_v43  ;;  %4844 = vmatmul.mubr.f32.gmra.mrb[14].mxu0 %v6068_v43 }
 0x1ef   : > { %v4656_v0 = vpop.f32.mrb[0].mxu1  ;;  %v4824_v1 = vpop.f32.mrb[0].mxu0 }
 0x1f0   : > { %v1525_v2 = vpop.f32.mrb[1].mxu1  ;;  %v2631_v3 = vpop.f32.mrb[1].mxu0 }
 0x1f3   : > { %v4659_v16 = vpop.f32.mrb[2].mxu1  ;;  %v4827_v23 = vpop.f32.mrb[2].mxu0 }
 0x1f4   : > { %v1537_v7 = vpop.f32.mrb[3].mxu1  ;;  %v2643_v8 = vpop.f32.mrb[3].mxu0 }
 0x1f7   : > { %v4662_v10 = vpop.f32.mrb[4].mxu1  ;;  %v4830_v15 = vpop.f32.mrb[4].mxu0 }
 0x1f8   : > { %v1549_v26 = vpop.f32.mrb[5].mxu1  ;;  %v2655_v27 = vpop.f32.mrb[5].mxu0 }
 0x1fb   : > { %v4665_v28 = vpop.f32.mrb[6].mxu1  ;;  %v4833_v29 = vpop.f32.mrb[6].mxu0 }
 0x1fc   : > { %v1561_v33 = vpop.f32.mrb[7].mxu1  ;;  %v2667_v34 = vpop.f32.mrb[7].mxu0 }
 0x1ff   : > { %v4668_v19 = vpop.f32.mrb[8].mxu1  ;;  %v4836_v36 = vpop.f32.mrb[8].mxu0 }
 0x200   : > { %v5062_v37 = vadd.f32 %v4824_v1, %v4668_v19  ;;  %v2726_v38 = vsub.f32 %v4656_v0, %v4836_v36  ;;  %v1573_v39 = vpop.f32.mrb[9].mxu1  ;;  %v2679_v40 = vpop.f32.mrb[9].mxu0 }
 0x201   : > { %v5063_v41 = vadd.f32 %v2631_v3, %v1573_v39  ;;  %v2725_v44 = vsub.f32 %v1525_v2, %v2679_v40 }
 0x202   : > { %2750 = vst.msk [vmem:[#allocation2 + $0x48] sm:$0xff] %vm416_vm0, %v5062_v37  ;;  %2734 = vst.msk [vmem:[#allocation2 + $0x8] sm:$0xff] %vm416_vm0, %v2726_v38 }
 0x203   : > { %2749 = vst.msk [vmem:[#allocation2 + $0x40] sm:$0xff] %vm416_vm0, %v5063_v41  ;;  %2733 = vst.msk [vmem:[#allocation2] sm:$0xff] %vm416_vm0, %v2725_v44  ;;  %v4671_v45 = vpop.f32.mrb[10].mxu1  ;;  %v4839_v46 = vpop.f32.mrb[10].mxu0 }
 0x204   : > { %v5064_v48 = vadd.f32 %v4827_v23, %v4671_v45  ;;  %v2728_v49 = vsub.f32 %v4659_v16, %v4839_v46  ;;  %v1585_v50 = vpop.f32.mrb[11].mxu1  ;;  %v2691_v55 = vpop.f32.mrb[11].mxu0 }
 0x205   : > { %v5065_v58 = vadd.f32 %v2643_v8, %v1585_v50  ;;  %v2727_v59 = vsub.f32 %v1537_v7, %v2691_v55 }
 0x206   : > { %2752 = vst.msk [vmem:[#allocation2 + $0x58] sm:$0xff] %vm416_vm0, %v5064_v48  ;;  %2736 = vst.msk [vmem:[#allocation2 + $0x18] sm:$0xff] %vm416_vm0, %v2728_v49 }
 0x207   : > { %2751 = vst.msk [vmem:[#allocation2 + $0x50] sm:$0xff] %vm416_vm0, %v5065_v58  ;;  %2735 = vst.msk [vmem:[#allocation2 + $0x10] sm:$0xff] %vm416_vm0, %v2727_v59  ;;  %v4674_v11 = vpop.f32.mrb[12].mxu1  ;;  %v4842_v14 = vpop.f32.mrb[12].mxu0 }
 0x208   : > { %v5066_v17 = vadd.f32 %v4830_v15, %v4674_v11  ;;  %v2730_v35 = vsub.f32 %v4662_v10, %v4842_v14  ;;  %v1597_v18 = vpop.f32.mrb[13].mxu1  ;;  %v2703_v6 = vpop.f32.mrb[13].mxu0 }
 0x209   : > { %v5067_v42 = vadd.f32 %v2655_v27, %v1597_v18  ;;  %v2729_v52 = vsub.f32 %v1549_v26, %v2703_v6 }
 0x20a   : > { %2754 = vst.msk [vmem:[#allocation2 + $0x68] sm:$0xff] %vm416_vm0, %v5066_v17  ;;  %2738 = vst.msk [vmem:[#allocation2 + $0x28] sm:$0xff] %vm416_vm0, %v2730_v35 }
 0x20b   : > { %2753 = vst.msk [vmem:[#allocation2 + $0x60] sm:$0xff] %vm416_vm0, %v5067_v42  ;;  %2737 = vst.msk [vmem:[#allocation2 + $0x20] sm:$0xff] %vm416_vm0, %v2729_v52  ;;  %v4677_v53 = vpop.f32.mrb[14].mxu1  ;;  %v4845_v54 = vpop.f32.mrb[14].mxu0 }
 0x20c   : > { %v5068_v57 = vadd.f32 %v4833_v29, %v4677_v53  ;;  %v2732_v60 = vsub.f32 %v4665_v28, %v4845_v54  ;;  %v1609_v61 = vpop.f32.mrb[15].mxu1  ;;  %v2715_v5 = vpop.f32.mrb[15].mxu0 }
 0x20d   : > { %v5069_v9 = vadd.f32 %v2667_v34, %v1609_v61  ;;  %v2731_v12 = vsub.f32 %v1561_v33, %v2715_v5 }
 0x20e   : > { %2756 = vst.msk [vmem:[#allocation2 + $0x78] sm:$0xff] %vm416_vm0, %v5068_v57  ;;  %2740 = vst.msk [vmem:[#allocation2 + $0x38] sm:$0xff] %vm416_vm0, %v2732_v60 }
 0x20f   : > { %2755 = vst.msk [vmem:[#allocation2 + $0x70] sm:$0xff] %vm416_vm0, %v5069_v9  ;;  %2739 = vst.msk [vmem:[#allocation2 + $0x30] sm:$0xff] %vm416_vm0, %v2731_v12 }
 0x210 LB: >> { %v6543_v20 = vld [vmem:[#allocation17_spill] sm:$0xff]  ;;  %v6544_v30 = vld [vmem:[#allocation18_spill] sm:$0xff]  ;;  %v6545_v31 = vld [vmem:[#allocation19_spill] sm:$0xff]  ;;  %s6306_s8 = sshll.u32 %s5542_s0, 4  ;;  %s2766_s0 = sadd.s32 1, %s5542_s0   ;;  %s5542_s0 = sphi %s6284_s0, %s2766_s0  }
 0x211   : >> { %v2776_v25 = vsel %vm416_vm0, %v6543_v20, 0  ;;  %v2779_v62 = vsel %vm416_vm0, %v6544_v30, 0  ;;  %v2782_v43 = vsel %vm416_vm0, %v6545_v31, 0  ;;  %v6546_v4 = vld [vmem:[#allocation20_spill] sm:$0xff]  ;;  %s2769_s15 = scalar_lea.vmem [#allocation2], %s6306_s8  ;;  %s3970_s11 = scalar_lea.vmem %s388_s17, %s6306_s8 [#allocation9] }
 0x212   : >> { %v2785_v51 = vsel %vm416_vm0, %v6546_v4, 0  ;;  %v6297_v63 = vand.u32 4294901760, %v2776_v25  ;;  %v6299_v13 = vand.u32 4294901760, %v2779_v62  ;;  %v6301_v24 = vand.u32 4294901760, %v2782_v43  ;;  %s3965_s21 = scalar_lea.vmem %s381_s20, %s6306_s8 [#allocation8]  ;;  %p2763_p3 = scmp.ge.s32.totalorder %s2766_s0, 4  }
 0x213   : >> { %v6303_v21 = vand.u32 4294901760, %v2785_v51  ;;  %s4220_s18 = sshll.u32 (%p2763_p3), %s5530_s27, 10  ;;  %s3995_s12 = sshll.u32 (%p2763_p3), %s381_s20, 4  ;;  %s6420_s12 = int_to_ptr.vmem [resolvable:$true] %s3995_s12 }
 0x214   : >> { %v6309_v22 = vsub.f32 %v2776_v25, %v6297_v63  ;;  %v6312_v32 = vsub.f32 %v2779_v62, %v6299_v13  ;;  %v6315_v56 = vsub.f32 %v2782_v43, %v6301_v24  ;;  %s6416_s10 = scalar_lea.hbm (%p2763_p3), %s6516_s6, %s4220_s18  ;;  %s3974_s30 = scalar_lea.sflag (%p2763_p3), [#allocation5], %s5760_s19 }
 0x215   : >> { %v6318_v47 = vsub.f32 %v2785_v51, %v6303_v21  ;;  %s5416_s13 = scalar_lea.vmem (%p2763_p3), %s6420_s12, 1024  ;;  %p6547_p13 = scmp.ne.s32.totalorder (%p2763_p3), %s6528_s14, 0 }
 0x216   : >> { %v2770_v0 = vld [vmem:[%s2769_s15] sm:$0xff]  ;;  %v2771_v1 = vld [vmem:[%s2769_s15 + $0x8] sm:$0xff]  ;;  %v6322_v8 = vand.u32 4294901760, %v6309_v22  ;;  %v6325_v15 = vand.u32 4294901760, %v6312_v32  ;;  %v6328_v26 = vand.u32 4294901760, %v6315_v56  ;;  %p5417_p12 = scmp.ne.s32.totalorder (%p2763_p3), %s6420_s12, %s5416_s13  ;;  %s5548_s0 = smov (%p2763_p3), [#allocation8]  }
 0x217   : >> { %v4207_v2 = vld [vmem:[%s2769_s15 + $0x40] sm:$0xff]  ;;  %v2788_v3 = vand.u32 4294901760, %v2770_v0  ;;  %v2791_v16 = vand.u32 4294901760, %v2771_v1  ;;  %v4208_v23 = vld [vmem:[%s2769_s15 + $0x48] sm:$0xff]  ;;  %v6331_v27 = vand.u32 4294901760, %v6318_v47  ;;  %s5420_s8 = sshll.u32 (%p2763_p3), %s5548_s0, 4  ;;  %s5421_s8 = int_to_ptr.vmem [resolvable:$false] %s5420_s8 }
 0x218   : >> { %v3376_v7 = vand.u32 4294901760, %v4207_v2  ;;  %v3379_v10 = vand.u32 4294901760, %v4208_v23  ;;  %v2857_v29 = vsub.f32 %v6309_v22, %v6322_v8  ;;  %v2867_v36 = vsub.f32 %v6312_v32, %v6325_v15  ;;  %p5418_p7 = pnand (%p2763_p3), %p5417_p12, %p6547_p13  ;;  %s5422_s15 = scalar_lea.vmem (%p2763_p3), %s5421_s8, 2048 }
 0x219   : >> { %v6333_v28 = vpack.c.bf16 %v2791_v16, %v2788_v3  ;;  %v2896_v33 = vsub.f32 %v2770_v0, %v2788_v3  ;;  %v2903_v34 = vsub.f32 %v2771_v1, %v2791_v16  ;;  %v2877_v37 = vsub.f32 %v6315_v56, %v6328_v26  ;;  %p5423_p9 = scmp.lt.s32.totalorder (%p2763_p3), %s6420_s12, %s5421_s8  ;;  %p5424_p11 = scmp.lt.s32.totalorder (%p2763_p3), %s5422_s15, %s5416_s13 }
 0x21a   : >> { %v6337_v19 = vpack.c.bf16 %v3379_v10, %v3376_v7  ;;  %v2887_v38 = vsub.f32 %v6318_v47, %v6331_v27  ;;  %v2858_v39 = vand.u32 4294901760, %v2857_v29  ;;  %v3484_v44 = vsub.f32 %v4207_v2, %v3376_v7  ;;  %p5419_p10 = pneg (%p2763_p3), %p5418_p7 }
 0x21b   : >> { %5015 = vmatprep.subr.bf16.mxu1 %v6333_v28  ;;  %v2897_v40 = vand.u32 4294901760, %v2896_v33  ;;  %v2904_v41 = vand.u32 4294901760, %v2903_v34  ;;  %v2868_v45 = vand.u32 4294901760, %v2867_v36  ;;  %v2878_v46 = vand.u32 4294901760, %v2877_v37  ;;  %p5425_p1 = por (%p2763_p3), %p5424_p11, %p5423_p9 }
 0x21c   : >> { %5039 = vmatprep.subr.bf16.mxu0 %v6337_v19  ;;  %5017 = vmatpush3.bf16.msra.mxu1 %v6333_v28  ;;  %v3491_v48 = vsub.f32 %v4208_v23, %v3379_v10  ;;  %v3485_v55 = vand.u32 4294901760, %v3484_v44  ;;  %v2888_v59 = vand.u32 4294901760, %v2887_v38  ;;  %v5022_v52 = vpack.c.bf16 %v2903_v34, %v2896_v33 }
 0x21d   : >> { %5041 = vmatpush3.bf16.msra.mxu0 %v6337_v19  ;;  %4850 = vmatprep.mubr.f32.mxu1 %v2858_v39  ;;  %v2898_v49 = vsub.f32 %v2896_v33, %v2897_v40  ;;  %v2905_v50 = vsub.f32 %v2903_v34, %v2904_v41  ;;  %v5030_v57 = vpack.c.bf16 %v2904_v41, %v2897_v40  ;;  %p5426_p6 = pnand (%p2763_p3), %p5425_p1, %p5419_p10 }
 0x21e   : >> { %4910 = vmatprep.mubr.f32.mxu0 %v2858_v39  ;;  %v3492_v58 = vand.u32 4294901760, %v3491_v48  ;;  %v3486_v17 = vsub.f32 %v3484_v44, %v3485_v55  ;;  %v5046_v54 = vpack.c.bf16 %v3491_v48, %v3484_v44 }
 0x21f   : >> { %4851 = vmatmul.mubr.f32.vlgmr.msra.gmra.mrb[0].mxu1 %v2868_v45  ;;  %v2899_v11 = vand.u32 4294901760, %v2898_v49  ;;  %v2906_v14 = vand.u32 4294901760, %v2905_v50 }
 0x220   : >> { %4911 = vmatmul.mubr.f32.vlgmr.msra.gmra.mrb[0].mxu0 %v2868_v45  ;;  %4853 = vmatprep.mubr.f32.mxu1 %v2878_v46  ;;  %v3493_v35 = vsub.f32 %v3491_v48, %v3492_v58  ;;  %v3487_v6 = vand.u32 4294901760, %v3486_v17  ;;  %v5054_v60 = vpack.c.bf16 %v3492_v58, %v3485_v55 }
 0x221   : >> { %4913 = vmatprep.mubr.f32.mxu0 %v2878_v46  ;;  %v5018_v18 = vpack.c.bf16 %v2906_v14, %v2899_v11 }
 0x222   : >> { %v3494_v42 = vand.u32 4294901760, %v3493_v35 }
 0x223   : >> { %4854 = vmatmul.mubr.f32.gmra.mrb[2].mxu1 %v2888_v59  ;;  %5019 = vmatprep.subr.bf16.mxu1 %v5018_v18 }
 0x224   : >> { %4914 = vmatmul.mubr.f32.gmra.mrb[2].mxu0 %v2888_v59  ;;  %v5042_v53 = vpack.c.bf16 %v3494_v42, %v3487_v6  ;;  %5021 = vmatpush3.bf16.msra.mxu1 %v5018_v18 }
 0x225   : >> { %4860 = vmatprep.mubr.f32.mxu1 %v6297_v63  ;;  %4920 = vmatprep.mubr.f32.mxu0 %v6297_v63 }
 0x226   : >> { %5043 = vmatprep.subr.bf16.mxu0 %v5042_v53  ;;  %5023 = vmatprep.subr.bf16.mxu1 %v5022_v52 }
 0x227   : >> { %5045 = vmatpush3.bf16.msra.mxu0 %v5042_v53  ;;  %4861 = vmatmul.mubr.f32.vlgmr.msra.gmra.mrb[0].mxu1 %v6299_v13 }
 0x228   : >> { %4863 = vmatprep.mubr.f32.mxu1 %v6301_v24  ;;  %5047 = vmatprep.subr.bf16.mxu0 %v5046_v54 }
 0x229   : >> { %5025 = vmatpush3.bf16.msra.mxu1 %v5022_v52 }
 0x22a   : >> { %4921 = vmatmul.mubr.f32.vlgmr.msra.gmra.mrb[0].mxu0 %v6299_v13  ;;  %5027 = vmatprep.subr.bf16.mxu1 %v6333_v28 }
 0x22b   : >> { %4923 = vmatprep.mubr.f32.mxu0 %v6301_v24  ;;  %4864 = vmatmul.mubr.f32.gmra.mrb[2].mxu1 %v6303_v21 }
 0x22c   : >> { %5049 = vmatpush3.bf16.msra.mxu0 %v5046_v54  ;;  %4870 = vmatprep.mubr.f32.mxu1 %v6309_v22 }
 0x22d   : >> { %5051 = vmatprep.subr.bf16.mxu0 %v6337_v19 }
 0x22e   : >> { %4924 = vmatmul.mubr.f32.gmra.mrb[2].mxu0 %v6303_v21 }
 0x22f   : >> { %4930 = vmatprep.mubr.f32.mxu0 %v6309_v22  ;;  %4871 = vmatmul.mubr.f32.vlgmr.msra.gmra.mrb[0].mxu1 %v6312_v32 }
 0x230   : >> { %4873 = vmatprep.mubr.f32.mxu1 %v6315_v56  ;;  %5029 = vmatpush3.bf16.msra.mxu1 %v6333_v28 }
 0x231   : >> { %5031 = vmatprep.subr.bf16.mxu1 %v5030_v57 }
 0x232   : >> { %4931 = vmatmul.mubr.f32.vlgmr.msra.gmra.mrb[0].mxu0 %v6312_v32 }
 0x233   : >> { %4933 = vmatprep.mubr.f32.mxu0 %v6315_v56  ;;  %4874 = vmatmul.mubr.f32.gmra.mrb[2].mxu1 %v6318_v47 }
 0x234   : >> { %5053 = vmatpush3.bf16.msra.mxu0 %v6337_v19  ;;  %4880 = vmatprep.mubr.f32.mxu1 %v6322_v8 }
 0x235   : >> { %5055 = vmatprep.subr.bf16.mxu0 %v5054_v60 }
 0x236   : >> { %4934 = vmatmul.mubr.f32.gmra.mrb[2].mxu0 %v6318_v47 }
 0x237   : >> { %4940 = vmatprep.mubr.f32.mxu0 %v6322_v8  ;;  %4881 = vmatmul.mubr.f32.vlgmr.msra.gmra.mrb[0].mxu1 %v6325_v15 }
 0x238   : >> { %4883 = vmatprep.mubr.f32.mxu1 %v6328_v26  ;;  %5033 = vmatpush3.bf16.msra.mxu1 %v5030_v57 }
 0x239   : >> { %5035 = vmatprep.subr.bf16.mxu1 %v6333_v28 }
 0x23a   : >> { %4941 = vmatmul.mubr.f32.vlgmr.msra.gmra.mrb[0].mxu0 %v6325_v15 }
 0x23b   : >> { %4943 = vmatprep.mubr.f32.mxu0 %v6328_v26  ;;  %4884 = vmatmul.mubr.f32.gmra.mrb[2].mxu1 %v6331_v27 }
 0x23c   : >> { %5057 = vmatpush3.bf16.msra.mxu0 %v5054_v60  ;;  %4890 = vmatprep.mubr.f32.mxu1 %v6297_v63 }
 0x23d   : >> { %5059 = vmatprep.subr.bf16.mxu0 %v6337_v19 }
 0x23e   : >> { %4944 = vmatmul.mubr.f32.gmra.mrb[2].mxu0 %v6331_v27 }
 0x23f   : >> { %4950 = vmatprep.mubr.f32.mxu0 %v6297_v63  ;;  %4891 = vmatmul.mubr.f32.vlgmr.msra.gmra.mrb[0].mxu1 %v6299_v13 }
 0x240   : >> { %4893 = vmatprep.mubr.f32.mxu1 %v6301_v24  ;;  %5037 = vmatpush3.bf16.msra.mxu1 %v6333_v28 }
 0x242   : >> { %4951 = vmatmul.mubr.f32.vlgmr.msra.gmra.mrb[0].mxu0 %v6299_v13 }
 0x243   : >> { %4953 = vmatprep.mubr.f32.mxu0 %v6301_v24  ;;  %4894 = vmatmul.mubr.f32.gmra.mrb[2].mxu1 %v6303_v21 }
 0x244   : >> { %5061 = vmatpush3.bf16.msra.mxu0 %v6337_v19  ;;  %4900 = vmatprep.mubr.f32.mxu1 %v6297_v63 }
 0x246   : >> { %4954 = vmatmul.mubr.f32.gmra.mrb[2].mxu0 %v6303_v21 }
 0x247   : >> { %4960 = vmatprep.mubr.f32.mxu0 %v6297_v63  ;;  %4901 = vmatmul.mubr.f32.vlgmr.msra.gmra.mrb[0].mxu1 %v6299_v13 }
 0x248   : >> { %4903 = vmatprep.mubr.f32.mxu1 %v6301_v24 }
 0x24a   : >> { %4961 = vmatmul.mubr.f32.vlgmr.msra.gmra.mrb[0].mxu0 %v6299_v13 }
 0x24b   : >> { %4963 = vmatprep.mubr.f32.mxu0 %v6301_v24  ;;  %4904 = vmatmul.mubr.f32.gmra.mrb[2].mxu1 %v6303_v21 }
 0x24e   : >> { %4964 = vmatmul.mubr.f32.gmra.mrb[2].mxu0 %v6303_v21 }
 0x31a   : >> { %v4902_v61 = vpop.f32.mrb[0].mxu1 }
 0x31b   : >> { %v3353_v5 = vpop.f32.mrb[1].mxu1 }
 0x31d   : >> { %v4962_v9 = vpop.f32.mrb[0].mxu0 }
 0x31e   : >> { %v3941_v12 = vpop.f32.mrb[1].mxu0  ;;  %v4905_v20 = vpop.f32.mrb[2].mxu1 }
 0x31f   : >> { %v5230_v25 = vadd.f32 %v4962_v9, %v4905_v20  ;;  %v3365_v30 = vpop.f32.mrb[3].mxu1  ;;  %2765 = sbr.rel (!%p2763_p3) target bundleno = 528 (0x210), region = 133 }
 0x320   : >> { %v5231_v62 = vadd.f32 %v3941_v12, %v3365_v30 }
 0x321   : >> { %3972 = vst.msk [vmem:[%s3970_s11 + $0x8] sm:$0xff] %vm416_vm0, %v5230_v25  ;;  %v4965_v31 = vpop.f32.mrb[2].mxu0 }
 0x322   : >> { %v3964_v43 = vsub.f32 %v4902_v61, %v4965_v31  ;;  %3971 = vst.msk [vmem:[%s3970_s11] sm:$0xff] %vm416_vm0, %v5231_v62  ;;  %v3953_v4 = vpop.f32.mrb[3].mxu0 }
 0x323   : >> { %v3963_v51 = vsub.f32 %v3353_v5, %v3953_v4 }
 0x324   : >> { %3967 = vst.msk [vmem:[%s3965_s21 + $0x8] sm:$0xff] %vm416_vm0, %v3964_v43 }
 0x325   : >> { %3966 = vst.msk [vmem:[%s3965_s21] sm:$0xff] %vm416_vm0, %v3963_v51 }
 0x326   : > { %5429 = shalt.err (!%p5426_p6)
}
 0x327   : > { %s5430_s20 = scalar_lea.hbm %s6416_s10, 1024  ;;  %s5434_s22 = scalar_lea.hbm %s6516_s6, 2048 }
 0x328   : > { %p5431_p2 = scmp.ne.s32.totalorder %s6416_s10, %s5430_s20  ;;  %p5435_p8 = scmp.lt.u32.totalorder %s6416_s10, %s6516_s6 }
 0x329   : > { %p5436_p0 = scmp.lt.u32.totalorder %s5434_s22, %s5430_s20  ;;  %p5438_p12 = scmp.lt.u32.totalorder %s5430_s20, %s6416_s10 }
 0x32a   : > { %p5432_p5 = pnand %p5431_p2, %p6547_p13 }
 0x32b   : > { %p5437_p3 = por %p5436_p0, %p5435_p8 }
 0x32c   : > { %p5433_p4 = pneg %p5432_p5 }
 0x32d   : > { %p5439_p7 = por %p5438_p12, %p5437_p3 }
 0x32f   : > { %p5440_p10 = pnand %p5439_p7, %p5433_p4 }
 0x331   : > { %5443 = shalt.err (!%p5440_p10)
}
 0x332   : > { %s5549_s13 = smov 128   ;;  %s5550_s8 = smov 8  }
 0x333   : > { %5276 = dma.vmem_to_hbm [thread:$0]  (%p6547_p13), %s6420_s12, 1024, %s6416_s10, %s3974_s30, %s5549_s13, %s5549_s13, %s5550_s8  }
 0x334   : > { %s6454_s11 = scalar_lea.hbm %s6517_s7, %s4220_s18  ;;  %s4014_s21 = sshll.u32 %s388_s17, 4  ;;  %s6458_s21 = int_to_ptr.vmem [resolvable:$true] %s4014_s21 }
 0x335   : > { %s3979_s22 = scalar_lea.sflag [#allocation10], %s5760_s19  ;;  %s5444_s9 = scalar_lea.vmem %s6458_s21, 1024 }
 0x336   : > { %p5445_p9 = scmp.ne.s32.totalorder %s6458_s21, %s5444_s9  ;;  %s5551_s10 = smov [#allocation9]  }
 0x337   : > { %s5448_s27 = sshll.u32 %s5551_s10, 4  ;;  %s5449_s27 = int_to_ptr.vmem [resolvable:$false] %s5448_s27 }
 0x338   : > { %p5446_p11 = pnand %p5445_p9, %p6547_p13  ;;  %s5450_s12 = scalar_lea.vmem %s5449_s27, 2048 }
 0x339   : > { %p5451_p6 = scmp.lt.s32.totalorder %s6458_s21, %s5449_s27  ;;  %p5452_p2 = scmp.lt.s32.totalorder %s5450_s12, %s5444_s9 }
 0x33a   : > { %p5447_p1 = pneg %p5446_p11 }
 0x33b   : > { %p5453_p5 = por %p5452_p2, %p5451_p6 }
 0x33d   : > { %p5454_p4 = pnand %p5453_p5, %p5447_p1 }
 0x33f   : > { %5457 = shalt.err (!%p5454_p4)
}
 0x340   : > { %s5458_s23 = scalar_lea.hbm %s6454_s11, 1024  ;;  %s5462_s30 = scalar_lea.hbm %s6517_s7, 2048 }
 0x341   : > { %p5459_p8 = scmp.ne.s32.totalorder %s6454_s11, %s5458_s23  ;;  %p5463_p12 = scmp.lt.u32.totalorder %s6454_s11, %s6517_s7 }
 0x342   : > { %p5464_p7 = scmp.lt.u32.totalorder %s5462_s30, %s5458_s23  ;;  %p5466_p9 = scmp.lt.u32.totalorder %s5458_s23, %s6454_s11 }
 0x343   : > { %p5460_p0 = pnand %p5459_p8, %p6547_p13 }
 0x344   : > { %p5465_p10 = por %p5464_p7, %p5463_p12 }
 0x345   : > { %p5461_p3 = pneg %p5460_p0 }
 0x346   : > { %p5467_p11 = por %p5466_p9, %p5465_p10 }
 0x348   : > { %p5468_p1 = pnand %p5467_p11, %p5461_p3 }
 0x34a   : > { %5471 = shalt.err (!%p5468_p1)
}
 0x34b   : > { %5277 = dma.vmem_to_hbm [thread:$0]  (%p6547_p13), %s6458_s21, 1024, %s6454_s11, %s3979_s22, %s5549_s13, %s5549_s13, %s5550_s8  }
 0x34c PF: > { %s4029_s20 = sand.u32 1, %s5518_s24   ;;  %p6548_p6 = scmp.ne.s32.totalorder %s6530_s16, 0 }
 0x34d   : > { %p6549_p2 = scmp.ge.s32.totalorder %s5538_s29, 2  ;;  %s4030_s9 = scalar_lea.sflag [#allocation5], %s4029_s20 }
 0x34f   : > { %p5288_p5 = pnand %p6549_p2, %p6548_p6 }
 0x351   : > { %5509 = dma.done.wait (!%p5288_p5), %s4030_s9, 1024  }
 0x352   : > { %5511 = vsyncadd (!%p5288_p5), %s4030_s9, 4294966272  ;;  %s4039_s14 = scalar_lea.sflag [#allocation10], %s4029_s20 }
 0x353   : > { %5513 = dma.done.wait (!%p5288_p5), %s4039_s14, 1024  }
 0x354   : > { %5515 = vsyncadd (!%p5288_p5), %s4039_s14, 4294966272  ;;  %s30_s29 = sadd.s32 1, %s5538_s29   ;;  %s6550_s19 = sld [smem:[#allocation16_spill]] }
 0x355   : > { %p27_p4 = scmp.ge.s32.totalorder %s30_s29, 4   ;;  %s6551_s13 = sld [smem:[#allocation15_spill]] }
 0x356   : > { %s6552_s24 = smov %s5522_s25  ;;  %s6553_s25 = smov %s5526_s26 }
 0x357   : > { %s6555_s27 = smov %s5534_s28  ;;  %29 = sbr.rel (!%p27_p4) target bundleno = 12 (0xc), region = 144 }
 0x35a   : > { %s6554_s26 = smov %s6550_s19 }
 0x35b   : > { %s6556_s28 = smov %s6551_s13 }
 0x35e   :  { %4044 = vsyncpa [#allocation4], 1 }
 0x35f   :  { %4046 = vsyncpa [#allocation4 + $0x1], 1 }
 0x360   :  { %4047 = vsyncpa [#allocation7], 1 }
 0x361   :  { %4049 = vsyncpa [#allocation7 + $0x1], 1 }
 0x362   :  { %4050 = vsyncpa [#allocation5], 1 }
 0x363   :  { %4052 = vsyncpa [#allocation5 + $0x1], 1 }
 0x364   :  { %4053 = vsyncpa [#allocation10], 1 }
 0x365   :  { %4055 = vsyncpa [#allocation10 + $0x1], 1 }

</bundles_post_ra>
